<compile_context>
chip_gen: v5e
topology: v5e:2x2
jax: 0.10.0
libtpu: 0.0.40
codegen_flags: <defaults>
</compile_context>

<pallas_src>
import numpy as np
import jax
import jax.numpy as jnp
from jax.experimental import pallas as pl
from jax.experimental.pallas import tpu as pltpu  # noqa: F401  (kept per template; no TPU-specific API needed here)

# ---------------- configuration (small shapes consistent with the module) ----
CHW = (1, 16, 16)          # (c, h, w)
N_PATCHES = 4
N_BLOCKS = 2
HIDDEN_D = 16
N_HEADS = 2
MLP_RATIO = 4
BATCH = 2

PATCH = CHW[1] // N_PATCHES            # 4
INPUT_D = CHW[0] * PATCH * PATCH       # 16
N_TOK = N_PATCHES * N_PATCHES          # 16
SEQ = N_TOK + 1                        # 17 (class token + patches)
SEQ_PAD = 24                           # per-batch row count padded to 8-multiple
D_HEAD = HIDDEN_D // N_HEADS           # 8
MLP_D = MLP_RATIO * HIDDEN_D           # 64
EPS = 1e-5                             # nn.LayerNorm default
SCALE = 1.0 / float(np.sqrt(D_HEAD))   # folded into Q weights/bias

# ---------------- packed parameter slab layout (single DMA) -------------------
P_LANES = 128
P_ROWS = 104
C_QKVW = 0      # rows blk*16:(blk+1)*16, cols   0: 48 : fused block-diag QKV weight
C_M1W = 48      # rows blk*16:(blk+1)*16, cols  48:112 : MLP fc1 weight (16,64)
C_RIGHT = 112   # 16-lane column of 16-wide vectors / lm weight
R_LMW = 0       # rows  0:16 @ C_RIGHT : patch-embedding weight (16,16)
R_LNV = 16      # rows 16+5*blk ..      : ln1_w, ln1_b, ln2_w, ln2_b, m2b per block
R_M2W = 32      # rows 32:96, cols blk*16:(blk+1)*16 : MLP fc2 weight (64,16)
R_BASE = 32     # rows 32:56, cols 32:48 : per-position additive base
C_BASE = 32     #   (cls+pos at row 0, lm_bias+pos at token rows, 0 at pad rows)
R_BIAS = 96     # row 96+blk : cols 0:48 fused QKV bias | cols 48:112 MLP fc1 bias


# ---------------- plain-JAX glue ---------------------------------------------
def get_positional_embeddings(seq_len, d):
    i = np.arange(seq_len, dtype=np.float64)[:, None]
    j = np.arange(d, dtype=np.float64)[None, :]
    even = (np.arange(d) % 2 == 0)[None, :]
    ang_even = i / np.power(10000.0, j / d)
    ang_odd = i / np.power(10000.0, (j - 1) / d)
    res = np.where(even, np.sin(ang_even), np.cos(ang_odd))
    return jnp.asarray(res, dtype=jnp.float32)


def patchify(images, n_patches):
    # matches torch patchify: flatten order per patch is (c, ph, pw)
    n, c, h, w = images.shape
    ps = h // n_patches
    x = images.reshape(n, c, n_patches, ps, n_patches, ps)
    x = x.transpose(0, 2, 4, 1, 3, 5)
    return x.reshape(n, n_patches * n_patches, c * ps * ps)


# ---------------- in-kernel math helpers --------------------------------------
def _erf_f32(x):
    # float32 erf via the Eigen/XLA rational polynomial; avoids relying on a
    # lax.erf lowering inside Mosaic.
    x = jnp.clip(x, -4.0, 4.0)
    x2 = x * x
    p = jnp.float32(-2.72614225801306e-10)
    p = p * x2 + jnp.float32(2.77068142495902e-08)
    p = p * x2 + jnp.float32(-2.10102402082508e-06)
    p = p * x2 + jnp.float32(-5.69250639462346e-05)
    p = p * x2 + jnp.float32(-7.34990630326855e-04)
    p = p * x2 + jnp.float32(-2.95459980854025e-03)
    p = p * x2 + jnp.float32(-1.60960333262415e-02)
    p = p * x
    q = jnp.float32(-1.45660718464996e-05)
    q = q * x2 + jnp.float32(-2.13374055278905e-04)
    q = q * x2 + jnp.float32(-1.68282697438203e-03)
    q = q * x2 + jnp.float32(-7.37332916720468e-03)
    q = q * x2 + jnp.float32(-1.42647390514189e-02)
    # VPU divide -> EUP approximate reciprocal (idle slot, error ~1e-4)
    return p * pl.reciprocal(q, approx=True)


def _gelu_exact(x):
    # nn.GELU default (erf-based, not tanh approximation)
    return 0.5 * x * (1.0 + _erf_f32(x * jnp.float32(0.7071067811865476)))


def _layernorm(x, w, b):
    mu = jnp.mean(x, axis=-1, keepdims=True)
    var = jnp.mean((x - mu) ** 2, axis=-1, keepdims=True)
    return (x - mu) * jax.lax.rsqrt(var + EPS) * w + b


def _softmax_lastdim(x):
    m = jnp.max(x, axis=-1, keepdims=True)
    e = jnp.exp(x - m)
    s = jnp.sum(e, axis=-1, keepdims=True)
    # approximate reciprocal lowers to the otherwise-idle EUP slot
    return e * pl.reciprocal(s, approx=True)


# ---------------- Pallas kernel -----------------------------------------------
def vit_kernel(patches_ref, p_ref, out_ref):
    f32 = jnp.float32
    nb = patches_ref.shape[0] // SEQ_PAD      # batch elements folded in this call

    # ---- parameters (static slices of the packed slab) ----------------------
    lm_w = p_ref[R_LMW:R_LMW + INPUT_D, C_RIGHT:C_RIGHT + HIDDEN_D]     # (16,16)
    base = p_ref[R_BASE:R_BASE + SEQ_PAD, C_BASE:C_BASE + HIDDEN_D]     # (24,16)

    # ---- token assembly, entirely in registers -------------------------------
    # patches_pad has zero rows at the class-token / pad positions, and `base`
    # carries cls+pos / lm_bias+pos / 0 for those positions, so a single MXU
    # matmul plus one add produces the padded token matrix (no VMEM scratch).
    x = jnp.dot(patches_ref[...], lm_w, preferred_element_type=f32)
    x = x + jnp.concatenate([base] * nb, axis=0)                        # (nb*24,16)

    # pad key columns must never receive softmax weight
    key_valid = jax.lax.broadcasted_iota(
        jnp.int32, (nb * N_HEADS, SEQ_PAD, SEQ_PAD), 2) < SEQ

    for blk in range(N_BLOCKS):
        g = blk * HIDDEN_D
        qkv_w = p_ref[g:g + HIDDEN_D, C_QKVW:C_QKVW + 3 * HIDDEN_D]     # (16,48)
        m1_w = p_ref[g:g + HIDDEN_D, C_M1W:C_M1W + MLP_D]               # (16,64)
        m2_w = p_ref[R_M2W:R_M2W + MLP_D, g:g + HIDDEN_D]               # (64,16)
        rb = R_BIAS + blk
        qkv_b = p_ref[rb:rb + 1, C_QKVW:C_QKVW + 3 * HIDDEN_D]          # (1,48)
        m1_b = p_ref[rb:rb + 1, C_M1W:C_M1W + MLP_D]                    # (1,64)
        v0 = R_LNV + 5 * blk
        ln1_w = p_ref[v0 + 0:v0 + 1, C_RIGHT:C_RIGHT + HIDDEN_D]
        ln1_b = p_ref[v0 + 1:v0 + 2, C_RIGHT:C_RIGHT + HIDDEN_D]
        ln2_w = p_ref[v0 + 2:v0 + 3, C_RIGHT:C_RIGHT + HIDDEN_D]
        ln2_b = p_ref[v0 + 3:v0 + 4, C_RIGHT:C_RIGHT + HIDDEN_D]
        m2_b = p_ref[v0 + 4:v0 + 5, C_RIGHT:C_RIGHT + HIDDEN_D]

        # --- MSA: fused block-diagonal QKV projection, batched attention -----
        h = _layernorm(x, ln1_w, ln1_b)
        qkv = jnp.dot(h, qkv_w, preferred_element_type=f32) + qkv_b     # (nb*24,48)

        # merged (batch, head) axis -> single batched contraction
        q_parts, k_parts, v_parts = [], [], []
        for b in range(nb):
            r0 = b * SEQ_PAD
            for hd in range(N_HEADS):
                c = hd * D_HEAD
                q_parts.append(qkv[r0:r0 + SEQ_PAD, c:c + D_HEAD])
                k_parts.append(qkv[r0:r0 + SEQ_PAD,
                                   HIDDEN_D + c:HIDDEN_D + c + D_HEAD])
                v_parts.append(qkv[r0:r0 + SEQ_PAD,
                                   2 * HIDDEN_D + c:2 * HIDDEN_D + c + D_HEAD])
        q3 = jnp.stack(q_parts)          # (nb*NH, 24, 8); 1/sqrt(Dh) already folded
        k3 = jnp.stack(k_parts)
        v3 = jnp.stack(v_parts)

        s = jnp.einsum("bqd,bkd->bqk", q3, k3,
                       preferred_element_type=f32)                      # (nb*NH,24,24)
        s = jnp.where(key_valid, s, f32(-1e30))
        att = _softmax_lastdim(s)
        o3 = jnp.einsum("bqk,bkd->bqd", att, v3,
                        preferred_element_type=f32)                     # (nb*NH,24,8)

        # reassemble (heads along lanes, batches along sublanes); stays in vregs
        msa = jnp.concatenate(
            [jnp.concatenate([o3[b * N_HEADS + hd] for hd in range(N_HEADS)],
                             axis=1)
             for b in range(nb)], axis=0)                               # (nb*24,16)
        x = x + msa

        # --- MLP branch (whole batch at once) ---
        h2 = _layernorm(x, ln2_w, ln2_b)
        m = jnp.dot(h2, m1_w, preferred_element_type=f32) + m1_b
        m = _gelu_exact(m)
        m = jnp.dot(m, m2_w, preferred_element_type=f32) + m2_b
        x = x + m

    out_ref[...] = x


def _full_spec(shape):
    nd = len(shape)
    return pl.BlockSpec(shape, lambda i, _nd=nd: (0,) * _nd)


@jax.jit
def tang_vit_forward(images, param_slab):
    n = images.shape[0]
    patches = patchify(images, N_PATCHES)                    # (n, N_TOK, INPUT_D)
    # place the 16 patch rows at rows 1..16 of each 24-row per-batch slot;
    # row 0 (class token) and rows 17..23 (pad) stay zero — the kernel's
    # `base` add fills in cls / bias / positional terms.
    patches_pad = jnp.pad(patches, ((0, 0), (1, SEQ_PAD - SEQ), (0, 0)))
    patches_pad = patches_pad.reshape(n * SEQ_PAD, INPUT_D)

    out = pl.pallas_call(
        vit_kernel,
        out_shape=jax.ShapeDtypeStruct((n * SEQ_PAD, HIDDEN_D), jnp.float32),
        grid=(1,),   # whole batch folded into a single step (tiny workload)
        in_specs=[_full_spec((n * SEQ_PAD, INPUT_D)),
                  _full_spec((P_ROWS, P_LANES))],
        out_specs=pl.BlockSpec((n * SEQ_PAD, HIDDEN_D), lambda i: (0, 0)),
    )(patches_pad, param_slab)
    return out.reshape(n, SEQ_PAD, HIDDEN_D)[:, :SEQ, :]


# ---------------- deterministic parameter init (PyTorch-like) -----------------
def _linear(key, in_f, out_f):
    kw, kb = jax.random.split(key)
    bound = 1.0 / np.sqrt(in_f)
    w = jax.random.uniform(kw, (out_f, in_f), jnp.float32, -bound, bound)
    b = jax.random.uniform(kb, (out_f,), jnp.float32, -bound, bound)
    return w, b


def init_params(seed=0):
    key = jax.random.PRNGKey(seed)
    k_lm, k_cls, *k_blocks = jax.random.split(key, 2 + N_BLOCKS)
    lm_w, lm_b = _linear(k_lm, INPUT_D, HIDDEN_D)
    cls = jax.random.uniform(k_cls, (1, HIDDEN_D), jnp.float32)   # torch.rand
    pos = get_positional_embeddings(SEQ, HIDDEN_D)

    qw, qb, kw_, kb_, vw, vb = [], [], [], [], [], []
    m1w, m1b, m2w, m2b = [], [], [], []
    for kblk in k_blocks:
        ks = jax.random.split(kblk, 3 * N_HEADS + 2)
        hq, hk, hv, hqb, hkb, hvb = [], [], [], [], [], []
        for hd in range(N_HEADS):
            w, b = _linear(ks[3 * hd + 0], D_HEAD, D_HEAD); hq.append(w); hqb.append(b)
            w, b = _linear(ks[3 * hd + 1], D_HEAD, D_HEAD); hk.append(w); hkb.append(b)
            w, b = _linear(ks[3 * hd + 2], D_HEAD, D_HEAD); hv.append(w); hvb.append(b)
        qw.append(jnp.stack(hq)); qb.append(jnp.stack(hqb))
        kw_.append(jnp.stack(hk)); kb_.append(jnp.stack(hkb))
        vw.append(jnp.stack(hv)); vb.append(jnp.stack(hvb))
        w1, b1 = _linear(ks[-2], HIDDEN_D, MLP_D)
        w2, b2 = _linear(ks[-1], MLP_D, HIDDEN_D)
        m1w.append(w1); m1b.append(b1); m2w.append(w2); m2b.append(b2)

    qw_t = jnp.stack(qw).transpose(0, 1, 3, 2)     # (NB, NH, Dh, Dh) in (in,out)
    kw_t = jnp.stack(kw_).transpose(0, 1, 3, 2)
    vw_t = jnp.stack(vw).transpose(0, 1, 3, 2)
    qb_s = jnp.stack(qb)                           # (NB, NH, Dh)
    kb_s = jnp.stack(kb_)
    vb_s = jnp.stack(vb)

    # ---- fused block-diagonal QKV projection, 1/sqrt(Dh) folded into Q ------
    qkv_w = np.zeros((N_BLOCKS, HIDDEN_D, 3 * HIDDEN_D), np.float32)
    qkv_b = np.zeros((N_BLOCKS, 1, 3 * HIDDEN_D), np.float32)
    qw_np, kw_np, vw_np = np.asarray(qw_t), np.asarray(kw_t), np.asarray(vw_t)
    qb_np, kb_np, vb_np = np.asarray(qb_s), np.asarray(kb_s), np.asarray(vb_s)
    for blk in range(N_BLOCKS):
        for hd in range(N_HEADS):
            r0, r1 = hd * D_HEAD, (hd + 1) * D_HEAD
            qkv_w[blk, r0:r1, 0 * HIDDEN_D + r0:0 * HIDDEN_D + r1] = qw_np[blk, hd] * SCALE
            qkv_w[blk, r0:r1, 1 * HIDDEN_D + r0:1 * HIDDEN_D + r1] = kw_np[blk, hd]
            qkv_w[blk, r0:r1, 2 * HIDDEN_D + r0:2 * HIDDEN_D + r1] = vw_np[blk, hd]
            qkv_b[blk, 0, 0 * HIDDEN_D + r0:0 * HIDDEN_D + r1] = qb_np[blk, hd] * SCALE
            qkv_b[blk, 0, 1 * HIDDEN_D + r0:1 * HIDDEN_D + r1] = kb_np[blk, hd]
            qkv_b[blk, 0, 2 * HIDDEN_D + r0:2 * HIDDEN_D + r1] = vb_np[blk, hd]

    return dict(
        lm_w_t=lm_w.T,                                   # (INPUT_D, HIDDEN_D)
        lm_b=lm_b.reshape(1, HIDDEN_D),
        cls=cls,
        pos=pos,
        ln1_w=jnp.ones((N_BLOCKS, 1, HIDDEN_D), jnp.float32),
        ln1_b=jnp.zeros((N_BLOCKS, 1, HIDDEN_D), jnp.float32),
        ln2_w=jnp.ones((N_BLOCKS, 1, HIDDEN_D), jnp.float32),
        ln2_b=jnp.zeros((N_BLOCKS, 1, HIDDEN_D), jnp.float32),
        qkv_w=jnp.asarray(qkv_w),                        # (NB, 16, 48) fused
        qkv_b=jnp.asarray(qkv_b),                        # (NB, 1, 48)
        # raw per-head params kept only for the pure-JAX reference
        qw_t=qw_t, qb=qb_s.reshape(N_BLOCKS, N_HEADS, 1, D_HEAD),
        kw_t=kw_t, kb=kb_s.reshape(N_BLOCKS, N_HEADS, 1, D_HEAD),
        vw_t=vw_t, vb=vb_s.reshape(N_BLOCKS, N_HEADS, 1, D_HEAD),
        m1w_t=jnp.stack(m1w).transpose(0, 2, 1),         # (NB, HIDDEN_D, MLP_D)
        m1b=jnp.stack(m1b).reshape(N_BLOCKS, 1, MLP_D),
        m2w_t=jnp.stack(m2w).transpose(0, 2, 1),         # (NB, MLP_D, HIDDEN_D)
        m2b=jnp.stack(m2b).reshape(N_BLOCKS, 1, HIDDEN_D),
    )


def pack_param_slab(p):
    """Pack all parameters into one lane-dense (P_ROWS, 128) f32 slab (1 DMA)."""
    slab = np.zeros((P_ROWS, P_LANES), np.float32)

    # patch-embedding weight in the right 16-lane column (rows 0:16)
    slab[R_LMW:R_LMW + INPUT_D, C_RIGHT:C_RIGHT + HIDDEN_D] = np.asarray(p["lm_w_t"])

    # per-position additive base: row 0 = cls + pos[0], rows 1..16 = lm_b + pos[1:],
    # rows 17..23 (pad) = 0.  Folding cls / lm_bias / pos here lets the kernel
    # build the padded token matrix with one matmul + one add.
    base = np.zeros((SEQ_PAD, HIDDEN_D), np.float32)
    pos = np.asarray(p["pos"])
    base[0] = np.asarray(p["cls"])[0] + pos[0]
    base[1:SEQ] = np.asarray(p["lm_b"])[0] + pos[1:SEQ]
    slab[R_BASE:R_BASE + SEQ_PAD, C_BASE:C_BASE + HIDDEN_D] = base

    for blk in range(N_BLOCKS):
        g = blk * HIDDEN_D
        slab[g:g + HIDDEN_D, C_QKVW:C_QKVW + 3 * HIDDEN_D] = np.asarray(p["qkv_w"])[blk]
        slab[g:g + HIDDEN_D, C_M1W:C_M1W + MLP_D] = np.asarray(p["m1w_t"])[blk]
        slab[R_M2W:R_M2W + MLP_D, g:g + HIDDEN_D] = np.asarray(p["m2w_t"])[blk]
        rb = R_BIAS + blk
        slab[rb, C_QKVW:C_QKVW + 3 * HIDDEN_D] = np.asarray(p["qkv_b"])[blk, 0]
        slab[rb, C_M1W:C_M1W + MLP_D] = np.asarray(p["m1b"])[blk, 0]
        v0 = R_LNV + 5 * blk
        slab[v0 + 0, C_RIGHT:C_RIGHT + HIDDEN_D] = np.asarray(p["ln1_w"])[blk, 0]
        slab[v0 + 1, C_RIGHT:C_RIGHT + HIDDEN_D] = np.asarray(p["ln1_b"])[blk, 0]
        slab[v0 + 2, C_RIGHT:C_RIGHT + HIDDEN_D] = np.asarray(p["ln2_w"])[blk, 0]
        slab[v0 + 3, C_RIGHT:C_RIGHT + HIDDEN_D] = np.asarray(p["ln2_b"])[blk, 0]
        slab[v0 + 4, C_RIGHT:C_RIGHT + HIDDEN_D] = np.asarray(p["m2b"])[blk, 0]
    return jnp.asarray(slab)


# ---------------- pure-JAX reference (for a sanity check) ---------------------
def _layernorm_ref(x, w, b):
    mu = jnp.mean(x, axis=-1, keepdims=True)
    var = jnp.mean((x - mu) ** 2, axis=-1, keepdims=True)
    return (x - mu) / jnp.sqrt(var + EPS) * w + b


def reference_forward(images, p):
    n = images.shape[0]
    patches = patchify(images, N_PATCHES)
    tokens = patches @ p["lm_w_t"] + p["lm_b"][0]
    cls = jnp.broadcast_to(p["cls"][None], (n, 1, HIDDEN_D))
    x = jnp.concatenate([cls, tokens], axis=1) + p["pos"][None]
    for blk in range(N_BLOCKS):
        h = _layernorm_ref(x, p["ln1_w"][blk, 0], p["ln1_b"][blk, 0])
        heads = []
        for hd in range(N_HEADS):
            s = h[..., hd * D_HEAD:(hd + 1) * D_HEAD]
            q = s @ p["qw_t"][blk, hd] + p["qb"][blk, hd, 0]
            k = s @ p["kw_t"][blk, hd] + p["kb"][blk, hd, 0]
            v = s @ p["vw_t"][blk, hd] + p["vb"][blk, hd, 0]
            att = jax.nn.softmax(
                jnp.einsum("nqd,nkd->nqk", q, k) / (D_HEAD ** 0.5), axis=-1)
            heads.append(jnp.einsum("nqk,nkd->nqd", att, v))
        x = x + jnp.concatenate(heads, axis=-1)
        h2 = _layernorm_ref(x, p["ln2_w"][blk, 0], p["ln2_b"][blk, 0])
        m = h2 @ p["m1w_t"][blk] + p["m1b"][blk, 0]
        m = jax.nn.gelu(m, approximate=False)
        m = m @ p["m2w_t"][blk] + p["m2b"][blk, 0]
        x = x + m
    return x


# ---------------- main ---------------------------------------------------------
if __name__ == "__main__":
    key = jax.random.PRNGKey(0)
    k_img, _ = jax.random.split(key)
    images = jax.random.normal(k_img, (BATCH,) + CHW, jnp.float32)   # NCHW
    params = init_params(seed=0)
    slab = pack_param_slab(params)

    out = tang_vit_forward(images, slab)
    out = jax.block_until_ready(out)

    ref = reference_forward(images, params)
    err = float(jnp.max(jnp.abs(out - ref)))
    assert out.shape == (BATCH, SEQ, HIDDEN_D)
    assert err < 3e-2, f"kernel/reference mismatch: max abs err = {err}"
    print("KERNEL_OK")
</pallas_src>

<mosaic_0001>
module attributes {stable_mosaic.version = 11 : i64} {
  func.func @vit_kernel(%arg0: i32, %arg1: memref<48x16xf32, #tpu.memory_space<vmem>>, %arg2: memref<104x128xf32, #tpu.memory_space<vmem>>, %arg3: memref<48x16xf32, #tpu.memory_space<vmem>>) attributes {dimension_semantics = [#tpu.dimension_semantics<arbitrary>], iteration_bounds = array<i64: 1>, scalar_prefetch = 0 : i64, scratch_operands = 0 : i64, tpu.core_type = #tpu.core_type<tc>, window_params = [{pipeline_mode = #tpu.pipeline_mode<synchronous>, transform_indices = @transform_0, window_bounds = array<i64: 48, 16>}, {pipeline_mode = #tpu.pipeline_mode<synchronous>, transform_indices = @transform_1, window_bounds = array<i64: 104, 128>}, {pipeline_mode = #tpu.pipeline_mode<synchronous>, transform_indices = @transform_2, window_bounds = array<i64: 48, 16>}]} {
    %c0 = arith.constant 0 : index
    %c112 = arith.constant 112 : index
    %0 = vector.load %arg2[%c0, %c112] : memref<104x128xf32, #tpu.memory_space<vmem>>, vector<16x16xf32>
    %c32 = arith.constant 32 : index
    %c32_0 = arith.constant 32 : index
    %1 = vector.load %arg2[%c32, %c32_0] : memref<104x128xf32, #tpu.memory_space<vmem>>, vector<24x16xf32>
    %c0_1 = arith.constant 0 : index
    %c0_2 = arith.constant 0 : index
    %2 = vector.load %arg1[%c0_1, %c0_2] : memref<48x16xf32, #tpu.memory_space<vmem>>, vector<48x16xf32>
    %cst = arith.constant dense<0.000000e+00> : vector<48x16xf32>
    %3 = tpu.matmul %2, %0, %cst {dimension_numbers = #tpu.dot_dimension_numbers<[1], [0], [0], [1], [0, 0, 1, 1], [], []>} : vector<48x16xf32>, vector<16x16xf32>, vector<48x16xf32> -> vector<48x16xf32>
    %4 = tpu.concatenate %1, %1 in 0 : vector<24x16xf32>, vector<24x16xf32> -> vector<48x16xf32>
    %5 = arith.addf %3, %4 : vector<48x16xf32>
    %6 = tpu.iota {dimensions = array<i32: 2>} : vector<4x24x24xi32>
    %c17_i32 = arith.constant 17 : i32
    %7 = vector.broadcast %c17_i32 : i32 to vector<4x24x24xi32>
    %8 = arith.cmpi slt, %6, %7 : vector<4x24x24xi32>
    %c0_3 = arith.constant 0 : index
    %c0_4 = arith.constant 0 : index
    %9 = vector.load %arg2[%c0_3, %c0_4] : memref<104x128xf32, #tpu.memory_space<vmem>>, vector<16x48xf32>
    %c0_5 = arith.constant 0 : index
    %c48 = arith.constant 48 : index
    %10 = vector.load %arg2[%c0_5, %c48] : memref<104x128xf32, #tpu.memory_space<vmem>>, vector<16x64xf32>
    %c32_6 = arith.constant 32 : index
    %c0_7 = arith.constant 0 : index
    %11 = vector.load %arg2[%c32_6, %c0_7] : memref<104x128xf32, #tpu.memory_space<vmem>>, vector<64x16xf32>
    %c96 = arith.constant 96 : index
    %c0_8 = arith.constant 0 : index
    %12 = vector.load %arg2[%c96, %c0_8] : memref<104x128xf32, #tpu.memory_space<vmem>>, vector<1x48xf32>
    %c96_9 = arith.constant 96 : index
    %c48_10 = arith.constant 48 : index
    %13 = vector.load %arg2[%c96_9, %c48_10] : memref<104x128xf32, #tpu.memory_space<vmem>>, vector<1x64xf32>
    %c16 = arith.constant 16 : index
    %c112_11 = arith.constant 112 : index
    %14 = vector.load %arg2[%c16, %c112_11] : memref<104x128xf32, #tpu.memory_space<vmem>>, vector<1x16xf32>
    %c17 = arith.constant 17 : index
    %c112_12 = arith.constant 112 : index
    %15 = vector.load %arg2[%c17, %c112_12] : memref<104x128xf32, #tpu.memory_space<vmem>>, vector<1x16xf32>
    %c18 = arith.constant 18 : index
    %c112_13 = arith.constant 112 : index
    %16 = vector.load %arg2[%c18, %c112_13] : memref<104x128xf32, #tpu.memory_space<vmem>>, vector<1x16xf32>
    %c19 = arith.constant 19 : index
    %c112_14 = arith.constant 112 : index
    %17 = vector.load %arg2[%c19, %c112_14] : memref<104x128xf32, #tpu.memory_space<vmem>>, vector<1x16xf32>
    %c20 = arith.constant 20 : index
    %c112_15 = arith.constant 112 : index
    %18 = vector.load %arg2[%c20, %c112_15] : memref<104x128xf32, #tpu.memory_space<vmem>>, vector<1x16xf32>
    %cst_16 = arith.constant dense<0.000000e+00> : vector<48xf32>
    %19 = vector.multi_reduction <add>, %5, %cst_16 [1] : vector<48x16xf32> to vector<48xf32>
    %20 = vector.shape_cast %19 : vector<48xf32> to vector<48x1xf32>
    %cst_17 = arith.constant 1.600000e+01 : f32
    %21 = vector.broadcast %cst_17 : f32 to vector<48x1xf32>
    %22 = arith.divf %20, %21 : vector<48x1xf32>
    %23 = vector.broadcast %22 : vector<48x1xf32> to vector<48x16xf32>
    %24 = arith.subf %5, %23 : vector<48x16xf32>
    %25 = arith.mulf %24, %24 : vector<48x16xf32>
    %cst_18 = arith.constant dense<0.000000e+00> : vector<48xf32>
    %26 = vector.multi_reduction <add>, %25, %cst_18 [1] : vector<48x16xf32> to vector<48xf32>
    %27 = vector.shape_cast %26 : vector<48xf32> to vector<48x1xf32>
    %cst_19 = arith.constant 1.600000e+01 : f32
    %28 = vector.broadcast %cst_19 : f32 to vector<48x1xf32>
    %29 = arith.divf %27, %28 : vector<48x1xf32>
    %30 = vector.broadcast %22 : vector<48x1xf32> to vector<48x16xf32>
    %31 = arith.subf %5, %30 : vector<48x16xf32>
    %cst_20 = arith.constant 9.99999974E-6 : f32
    %32 = vector.broadcast %cst_20 : f32 to vector<48x1xf32>
    %33 = arith.addf %29, %32 : vector<48x1xf32>
    %34 = math.rsqrt %33 : vector<48x1xf32>
    %35 = vector.broadcast %34 : vector<48x1xf32> to vector<48x16xf32>
    %36 = arith.mulf %31, %35 : vector<48x16xf32>
    %37 = vector.broadcast %14 : vector<1x16xf32> to vector<48x16xf32>
    %38 = arith.mulf %36, %37 : vector<48x16xf32>
    %39 = vector.broadcast %15 : vector<1x16xf32> to vector<48x16xf32>
    %40 = arith.addf %38, %39 : vector<48x16xf32>
    %cst_21 = arith.constant dense<0.000000e+00> : vector<48x48xf32>
    %41 = tpu.matmul %40, %9, %cst_21 {dimension_numbers = #tpu.dot_dimension_numbers<[1], [0], [0], [1], [0, 0, 1, 1], [], []>} : vector<48x16xf32>, vector<16x48xf32>, vector<48x48xf32> -> vector<48x48xf32>
    %42 = vector.broadcast %12 : vector<1x48xf32> to vector<48x48xf32>
    %43 = arith.addf %41, %42 : vector<48x48xf32>
    %44 = vector.extract_strided_slice %43 {offsets = [0, 0], sizes = [24, 8], strides = [1, 1]} : vector<48x48xf32> to vector<24x8xf32>
    %45 = vector.extract_strided_slice %43 {offsets = [0, 16], sizes = [24, 8], strides = [1, 1]} : vector<48x48xf32> to vector<24x8xf32>
    %46 = vector.extract_strided_slice %43 {offsets = [0, 32], sizes = [24, 8], strides = [1, 1]} : vector<48x48xf32> to vector<24x8xf32>
    %47 = vector.extract_strided_slice %43 {offsets = [0, 8], sizes = [24, 8], strides = [1, 1]} : vector<48x48xf32> to vector<24x8xf32>
    %48 = vector.extract_strided_slice %43 {offsets = [0, 24], sizes = [24, 8], strides = [1, 1]} : vector<48x48xf32> to vector<24x8xf32>
    %49 = vector.extract_strided_slice %43 {offsets = [0, 40], sizes = [24, 8], strides = [1, 1]} : vector<48x48xf32> to vector<24x8xf32>
    %50 = vector.extract_strided_slice %43 {offsets = [24, 0], sizes = [24, 8], strides = [1, 1]} : vector<48x48xf32> to vector<24x8xf32>
    %51 = vector.extract_strided_slice %43 {offsets = [24, 16], sizes = [24, 8], strides = [1, 1]} : vector<48x48xf32> to vector<24x8xf32>
    %52 = vector.extract_strided_slice %43 {offsets = [24, 32], sizes = [24, 8], strides = [1, 1]} : vector<48x48xf32> to vector<24x8xf32>
    %53 = vector.extract_strided_slice %43 {offsets = [24, 8], sizes = [24, 8], strides = [1, 1]} : vector<48x48xf32> to vector<24x8xf32>
    %54 = vector.extract_strided_slice %43 {offsets = [24, 24], sizes = [24, 8], strides = [1, 1]} : vector<48x48xf32> to vector<24x8xf32>
    %55 = vector.extract_strided_slice %43 {offsets = [24, 40], sizes = [24, 8], strides = [1, 1]} : vector<48x48xf32> to vector<24x8xf32>
    %56 = vector.shape_cast %44 : vector<24x8xf32> to vector<1x24x8xf32>
    %57 = vector.shape_cast %47 : vector<24x8xf32> to vector<1x24x8xf32>
    %58 = vector.shape_cast %50 : vector<24x8xf32> to vector<1x24x8xf32>
    %59 = vector.shape_cast %53 : vector<24x8xf32> to vector<1x24x8xf32>
    %60 = tpu.concatenate %56, %57, %58, %59 in 0 : vector<1x24x8xf32>, vector<1x24x8xf32>, vector<1x24x8xf32>, vector<1x24x8xf32> -> vector<4x24x8xf32>
    %61 = vector.shape_cast %45 : vector<24x8xf32> to vector<1x24x8xf32>
    %62 = vector.shape_cast %48 : vector<24x8xf32> to vector<1x24x8xf32>
    %63 = vector.shape_cast %51 : vector<24x8xf32> to vector<1x24x8xf32>
    %64 = vector.shape_cast %54 : vector<24x8xf32> to vector<1x24x8xf32>
    %65 = tpu.concatenate %61, %62, %63, %64 in 0 : vector<1x24x8xf32>, vector<1x24x8xf32>, vector<1x24x8xf32>, vector<1x24x8xf32> -> vector<4x24x8xf32>
    %66 = vector.shape_cast %46 : vector<24x8xf32> to vector<1x24x8xf32>
    %67 = vector.shape_cast %49 : vector<24x8xf32> to vector<1x24x8xf32>
    %68 = vector.shape_cast %52 : vector<24x8xf32> to vector<1x24x8xf32>
    %69 = vector.shape_cast %55 : vector<24x8xf32> to vector<1x24x8xf32>
    %70 = tpu.concatenate %66, %67, %68, %69 in 0 : vector<1x24x8xf32>, vector<1x24x8xf32>, vector<1x24x8xf32>, vector<1x24x8xf32> -> vector<4x24x8xf32>
    "tpu.trace_start"() <{level = 10 : i32, message = "bqd,bkd->bqk"}> : () -> ()
    %cst_22 = arith.constant dense<0.000000e+00> : vector<4x24x24xf32>
    %71 = tpu.matmul %60, %65, %cst_22 {dimension_numbers = #tpu.dot_dimension_numbers<[2], [2], [1], [1], [0, 0, 0, 1, 1, 1], [0], [0]>} : vector<4x24x8xf32>, vector<4x24x8xf32>, vector<4x24x24xf32> -> vector<4x24x24xf32>
    %cst_23 = arith.constant -1.000000e+30 : f32
    "tpu.trace_stop"() : () -> ()
    %72 = vector.broadcast %cst_23 : f32 to vector<4x24x24xf32>
    %73 = arith.select %8, %71, %72 : vector<4x24x24xi1>, vector<4x24x24xf32>
    %cst_24 = arith.constant dense<0xFF800000> : vector<4x24xf32>
    %74 = vector.multi_reduction <maximumf>, %73, %cst_24 [2] : vector<4x24x24xf32> to vector<4x24xf32>
    %75 = vector.shape_cast %74 : vector<4x24xf32> to vector<4x24x1xf32>
    %76 = vector.broadcast %75 : vector<4x24x1xf32> to vector<4x24x24xf32>
    %77 = arith.subf %73, %76 : vector<4x24x24xf32>
    %78 = math.exp %77 : vector<4x24x24xf32>
    %cst_25 = arith.constant dense<0.000000e+00> : vector<4x24xf32>
    %79 = vector.multi_reduction <add>, %78, %cst_25 [2] : vector<4x24x24xf32> to vector<4x24xf32>
    %80 = vector.shape_cast %79 : vector<4x24xf32> to vector<4x24x1xf32>
    %81 = tpu.reciprocal %80 {approx = true} : vector<4x24x1xf32> -> vector<4x24x1xf32>
    %82 = vector.broadcast %81 : vector<4x24x1xf32> to vector<4x24x24xf32>
    %83 = arith.mulf %78, %82 : vector<4x24x24xf32>
    "tpu.trace_start"() <{level = 10 : i32, message = "bqk,bkd->bqd"}> : () -> ()
    %cst_26 = arith.constant dense<0.000000e+00> : vector<4x24x8xf32>
    %84 = tpu.matmul %83, %70, %cst_26 {dimension_numbers = #tpu.dot_dimension_numbers<[2], [1], [1], [2], [0, 0, 0, 1, 1, 2], [0], [0]>} : vector<4x24x24xf32>, vector<4x24x8xf32>, vector<4x24x8xf32> -> vector<4x24x8xf32>
    "tpu.trace_stop"() : () -> ()
    %85 = vector.extract_strided_slice %84 {offsets = [0, 0, 0], sizes = [1, 24, 8], strides = [1, 1, 1]} : vector<4x24x8xf32> to vector<1x24x8xf32>
    %86 = vector.shape_cast %85 : vector<1x24x8xf32> to vector<24x8xf32>
    %87 = vector.extract_strided_slice %84 {offsets = [1, 0, 0], sizes = [1, 24, 8], strides = [1, 1, 1]} : vector<4x24x8xf32> to vector<1x24x8xf32>
    %88 = vector.shape_cast %87 : vector<1x24x8xf32> to vector<24x8xf32>
    %89 = tpu.concatenate %86, %88 in 1 : vector<24x8xf32>, vector<24x8xf32> -> vector<24x16xf32>
    %90 = vector.extract_strided_slice %84 {offsets = [2, 0, 0], sizes = [1, 24, 8], strides = [1, 1, 1]} : vector<4x24x8xf32> to vector<1x24x8xf32>
    %91 = vector.shape_cast %90 : vector<1x24x8xf32> to vector<24x8xf32>
    %92 = vector.extract_strided_slice %84 {offsets = [3, 0, 0], sizes = [1, 24, 8], strides = [1, 1, 1]} : vector<4x24x8xf32> to vector<1x24x8xf32>
    %93 = vector.shape_cast %92 : vector<1x24x8xf32> to vector<24x8xf32>
    %94 = tpu.concatenate %91, %93 in 1 : vector<24x8xf32>, vector<24x8xf32> -> vector<24x16xf32>
    %95 = tpu.concatenate %89, %94 in 0 : vector<24x16xf32>, vector<24x16xf32> -> vector<48x16xf32>
    %96 = arith.addf %5, %95 : vector<48x16xf32>
    %cst_27 = arith.constant dense<0.000000e+00> : vector<48xf32>
    %97 = vector.multi_reduction <add>, %96, %cst_27 [1] : vector<48x16xf32> to vector<48xf32>
    %98 = vector.shape_cast %97 : vector<48xf32> to vector<48x1xf32>
    %cst_28 = arith.constant 1.600000e+01 : f32
    %99 = vector.broadcast %cst_28 : f32 to vector<48x1xf32>
    %100 = arith.divf %98, %99 : vector<48x1xf32>
    %101 = vector.broadcast %100 : vector<48x1xf32> to vector<48x16xf32>
    %102 = arith.subf %96, %101 : vector<48x16xf32>
    %103 = arith.mulf %102, %102 : vector<48x16xf32>
    %cst_29 = arith.constant dense<0.000000e+00> : vector<48xf32>
    %104 = vector.multi_reduction <add>, %103, %cst_29 [1] : vector<48x16xf32> to vector<48xf32>
    %105 = vector.shape_cast %104 : vector<48xf32> to vector<48x1xf32>
    %cst_30 = arith.constant 1.600000e+01 : f32
    %106 = vector.broadcast %cst_30 : f32 to vector<48x1xf32>
    %107 = arith.divf %105, %106 : vector<48x1xf32>
    %108 = vector.broadcast %100 : vector<48x1xf32> to vector<48x16xf32>
    %109 = arith.subf %96, %108 : vector<48x16xf32>
    %cst_31 = arith.constant 9.99999974E-6 : f32
    %110 = vector.broadcast %cst_31 : f32 to vector<48x1xf32>
    %111 = arith.addf %107, %110 : vector<48x1xf32>
    %112 = math.rsqrt %111 : vector<48x1xf32>
    %113 = vector.broadcast %112 : vector<48x1xf32> to vector<48x16xf32>
    %114 = arith.mulf %109, %113 : vector<48x16xf32>
    %115 = vector.broadcast %16 : vector<1x16xf32> to vector<48x16xf32>
    %116 = arith.mulf %114, %115 : vector<48x16xf32>
    %117 = vector.broadcast %17 : vector<1x16xf32> to vector<48x16xf32>
    %118 = arith.addf %116, %117 : vector<48x16xf32>
    %cst_32 = arith.constant dense<0.000000e+00> : vector<48x64xf32>
    %119 = tpu.matmul %118, %10, %cst_32 {dimension_numbers = #tpu.dot_dimension_numbers<[1], [0], [0], [1], [0, 0, 1, 1], [], []>} : vector<48x16xf32>, vector<16x64xf32>, vector<48x64xf32> -> vector<48x64xf32>
    %120 = vector.broadcast %13 : vector<1x64xf32> to vector<48x64xf32>
    %121 = arith.addf %119, %120 : vector<48x64xf32>
    %cst_33 = arith.constant 5.000000e-01 : f32
    %122 = vector.broadcast %cst_33 : f32 to vector<48x64xf32>
    %123 = arith.mulf %122, %121 : vector<48x64xf32>
    %cst_34 = arith.constant 0.707106769 : f32
    %124 = vector.broadcast %cst_34 : f32 to vector<48x64xf32>
    %125 = arith.mulf %121, %124 : vector<48x64xf32>
    %cst_35 = arith.constant -4.000000e+00 : f32
    %cst_36 = arith.constant 4.000000e+00 : f32
    %126 = vector.broadcast %cst_35 : f32 to vector<48x64xf32>
    %127 = arith.maximumf %126, %125 : vector<48x64xf32>
    %128 = vector.broadcast %cst_36 : f32 to vector<48x64xf32>
    %129 = arith.minimumf %128, %127 : vector<48x64xf32>
    %130 = arith.mulf %129, %129 : vector<48x64xf32>
    %cst_37 = arith.constant -2.72614237E-10 : f32
    %131 = vector.broadcast %cst_37 : f32 to vector<48x64xf32>
    %132 = arith.mulf %131, %130 : vector<48x64xf32>
    %cst_38 = arith.constant 2.77068146E-8 : f32
    %133 = vector.broadcast %cst_38 : f32 to vector<48x64xf32>
    %134 = arith.addf %132, %133 : vector<48x64xf32>
    %135 = arith.mulf %134, %130 : vector<48x64xf32>
    %cst_39 = arith.constant -2.10102394E-6 : f32
    %136 = vector.broadcast %cst_39 : f32 to vector<48x64xf32>
    %137 = arith.addf %135, %136 : vector<48x64xf32>
    %138 = arith.mulf %137, %130 : vector<48x64xf32>
    %cst_40 = arith.constant -5.69250624E-5 : f32
    %139 = vector.broadcast %cst_40 : f32 to vector<48x64xf32>
    %140 = arith.addf %138, %139 : vector<48x64xf32>
    %141 = arith.mulf %140, %130 : vector<48x64xf32>
    %cst_41 = arith.constant -7.34990637E-4 : f32
    %142 = vector.broadcast %cst_41 : f32 to vector<48x64xf32>
    %143 = arith.addf %141, %142 : vector<48x64xf32>
    %144 = arith.mulf %143, %130 : vector<48x64xf32>
    %cst_42 = arith.constant -2.954600e-03 : f32
    %145 = vector.broadcast %cst_42 : f32 to vector<48x64xf32>
    %146 = arith.addf %144, %145 : vector<48x64xf32>
    %147 = arith.mulf %146, %130 : vector<48x64xf32>
    %cst_43 = arith.constant -0.0160960332 : f32
    %148 = vector.broadcast %cst_43 : f32 to vector<48x64xf32>
    %149 = arith.addf %147, %148 : vector<48x64xf32>
    %150 = arith.mulf %149, %129 : vector<48x64xf32>
    %cst_44 = arith.constant -1.45660715E-5 : f32
    %151 = vector.broadcast %cst_44 : f32 to vector<48x64xf32>
    %152 = arith.mulf %151, %130 : vector<48x64xf32>
    %cst_45 = arith.constant -2.13374049E-4 : f32
    %153 = vector.broadcast %cst_45 : f32 to vector<48x64xf32>
    %154 = arith.addf %152, %153 : vector<48x64xf32>
    %155 = arith.mulf %154, %130 : vector<48x64xf32>
    %cst_46 = arith.constant -0.00168282702 : f32
    %156 = vector.broadcast %cst_46 : f32 to vector<48x64xf32>
    %157 = arith.addf %155, %156 : vector<48x64xf32>
    %158 = arith.mulf %157, %130 : vector<48x64xf32>
    %cst_47 = arith.constant -0.00737332925 : f32
    %159 = vector.broadcast %cst_47 : f32 to vector<48x64xf32>
    %160 = arith.addf %158, %159 : vector<48x64xf32>
    %161 = arith.mulf %160, %130 : vector<48x64xf32>
    %cst_48 = arith.constant -0.0142647391 : f32
    %162 = vector.broadcast %cst_48 : f32 to vector<48x64xf32>
    %163 = arith.addf %161, %162 : vector<48x64xf32>
    %164 = tpu.reciprocal %163 {approx = true} : vector<48x64xf32> -> vector<48x64xf32>
    %165 = arith.mulf %150, %164 : vector<48x64xf32>
    %cst_49 = arith.constant 1.000000e+00 : f32
    %166 = vector.broadcast %cst_49 : f32 to vector<48x64xf32>
    %167 = arith.addf %166, %165 : vector<48x64xf32>
    %168 = arith.mulf %123, %167 : vector<48x64xf32>
    %cst_50 = arith.constant dense<0.000000e+00> : vector<48x16xf32>
    %169 = tpu.matmul %168, %11, %cst_50 {dimension_numbers = #tpu.dot_dimension_numbers<[1], [0], [0], [1], [0, 0, 1, 1], [], []>} : vector<48x64xf32>, vector<64x16xf32>, vector<48x16xf32> -> vector<48x16xf32>
    %170 = vector.broadcast %18 : vector<1x16xf32> to vector<48x16xf32>
    %171 = arith.addf %169, %170 : vector<48x16xf32>
    %172 = arith.addf %96, %171 : vector<48x16xf32>
    %c16_51 = arith.constant 16 : index
    %c0_52 = arith.constant 0 : index
    %173 = vector.load %arg2[%c16_51, %c0_52] : memref<104x128xf32, #tpu.memory_space<vmem>>, vector<16x48xf32>
    %c16_53 = arith.constant 16 : index
    %c48_54 = arith.constant 48 : index
    %174 = vector.load %arg2[%c16_53, %c48_54] : memref<104x128xf32, #tpu.memory_space<vmem>>, vector<16x64xf32>
    %c32_55 = arith.constant 32 : index
    %c16_56 = arith.constant 16 : index
    %175 = vector.load %arg2[%c32_55, %c16_56] : memref<104x128xf32, #tpu.memory_space<vmem>>, vector<64x16xf32>
    %c97 = arith.constant 97 : index
    %c0_57 = arith.constant 0 : index
    %176 = vector.load %arg2[%c97, %c0_57] : memref<104x128xf32, #tpu.memory_space<vmem>>, vector<1x48xf32>
    %c97_58 = arith.constant 97 : index
    %c48_59 = arith.constant 48 : index
    %177 = vector.load %arg2[%c97_58, %c48_59] : memref<104x128xf32, #tpu.memory_space<vmem>>, vector<1x64xf32>
    %c21 = arith.constant 21 : index
    %c112_60 = arith.constant 112 : index
    %178 = vector.load %arg2[%c21, %c112_60] : memref<104x128xf32, #tpu.memory_space<vmem>>, vector<1x16xf32>
    %c22 = arith.constant 22 : index
    %c112_61 = arith.constant 112 : index
    %179 = vector.load %arg2[%c22, %c112_61] : memref<104x128xf32, #tpu.memory_space<vmem>>, vector<1x16xf32>
    %c23 = arith.constant 23 : index
    %c112_62 = arith.constant 112 : index
    %180 = vector.load %arg2[%c23, %c112_62] : memref<104x128xf32, #tpu.memory_space<vmem>>, vector<1x16xf32>
    %c24 = arith.constant 24 : index
    %c112_63 = arith.constant 112 : index
    %181 = vector.load %arg2[%c24, %c112_63] : memref<104x128xf32, #tpu.memory_space<vmem>>, vector<1x16xf32>
    %c25 = arith.constant 25 : index
    %c112_64 = arith.constant 112 : index
    %182 = vector.load %arg2[%c25, %c112_64] : memref<104x128xf32, #tpu.memory_space<vmem>>, vector<1x16xf32>
    %cst_65 = arith.constant dense<0.000000e+00> : vector<48xf32>
    %183 = vector.multi_reduction <add>, %172, %cst_65 [1] : vector<48x16xf32> to vector<48xf32>
    %184 = vector.shape_cast %183 : vector<48xf32> to vector<48x1xf32>
    %cst_66 = arith.constant 1.600000e+01 : f32
    %185 = vector.broadcast %cst_66 : f32 to vector<48x1xf32>
    %186 = arith.divf %184, %185 : vector<48x1xf32>
    %187 = vector.broadcast %186 : vector<48x1xf32> to vector<48x16xf32>
    %188 = arith.subf %172, %187 : vector<48x16xf32>
    %189 = arith.mulf %188, %188 : vector<48x16xf32>
    %cst_67 = arith.constant dense<0.000000e+00> : vector<48xf32>
    %190 = vector.multi_reduction <add>, %189, %cst_67 [1] : vector<48x16xf32> to vector<48xf32>
    %191 = vector.shape_cast %190 : vector<48xf32> to vector<48x1xf32>
    %cst_68 = arith.constant 1.600000e+01 : f32
    %192 = vector.broadcast %cst_68 : f32 to vector<48x1xf32>
    %193 = arith.divf %191, %192 : vector<48x1xf32>
    %194 = vector.broadcast %186 : vector<48x1xf32> to vector<48x16xf32>
    %195 = arith.subf %172, %194 : vector<48x16xf32>
    %cst_69 = arith.constant 9.99999974E-6 : f32
    %196 = vector.broadcast %cst_69 : f32 to vector<48x1xf32>
    %197 = arith.addf %193, %196 : vector<48x1xf32>
    %198 = math.rsqrt %197 : vector<48x1xf32>
    %199 = vector.broadcast %198 : vector<48x1xf32> to vector<48x16xf32>
    %200 = arith.mulf %195, %199 : vector<48x16xf32>
    %201 = vector.broadcast %178 : vector<1x16xf32> to vector<48x16xf32>
    %202 = arith.mulf %200, %201 : vector<48x16xf32>
    %203 = vector.broadcast %179 : vector<1x16xf32> to vector<48x16xf32>
    %204 = arith.addf %202, %203 : vector<48x16xf32>
    %cst_70 = arith.constant dense<0.000000e+00> : vector<48x48xf32>
    %205 = tpu.matmul %204, %173, %cst_70 {dimension_numbers = #tpu.dot_dimension_numbers<[1], [0], [0], [1], [0, 0, 1, 1], [], []>} : vector<48x16xf32>, vector<16x48xf32>, vector<48x48xf32> -> vector<48x48xf32>
    %206 = vector.broadcast %176 : vector<1x48xf32> to vector<48x48xf32>
    %207 = arith.addf %205, %206 : vector<48x48xf32>
    %208 = vector.extract_strided_slice %207 {offsets = [0, 0], sizes = [24, 8], strides = [1, 1]} : vector<48x48xf32> to vector<24x8xf32>
    %209 = vector.extract_strided_slice %207 {offsets = [0, 16], sizes = [24, 8], strides = [1, 1]} : vector<48x48xf32> to vector<24x8xf32>
    %210 = vector.extract_strided_slice %207 {offsets = [0, 32], sizes = [24, 8], strides = [1, 1]} : vector<48x48xf32> to vector<24x8xf32>
    %211 = vector.extract_strided_slice %207 {offsets = [0, 8], sizes = [24, 8], strides = [1, 1]} : vector<48x48xf32> to vector<24x8xf32>
    %212 = vector.extract_strided_slice %207 {offsets = [0, 24], sizes = [24, 8], strides = [1, 1]} : vector<48x48xf32> to vector<24x8xf32>
    %213 = vector.extract_strided_slice %207 {offsets = [0, 40], sizes = [24, 8], strides = [1, 1]} : vector<48x48xf32> to vector<24x8xf32>
    %214 = vector.extract_strided_slice %207 {offsets = [24, 0], sizes = [24, 8], strides = [1, 1]} : vector<48x48xf32> to vector<24x8xf32>
    %215 = vector.extract_strided_slice %207 {offsets = [24, 16], sizes = [24, 8], strides = [1, 1]} : vector<48x48xf32> to vector<24x8xf32>
    %216 = vector.extract_strided_slice %207 {offsets = [24, 32], sizes = [24, 8], strides = [1, 1]} : vector<48x48xf32> to vector<24x8xf32>
    %217 = vector.extract_strided_slice %207 {offsets = [24, 8], sizes = [24, 8], strides = [1, 1]} : vector<48x48xf32> to vector<24x8xf32>
    %218 = vector.extract_strided_slice %207 {offsets = [24, 24], sizes = [24, 8], strides = [1, 1]} : vector<48x48xf32> to vector<24x8xf32>
    %219 = vector.extract_strided_slice %207 {offsets = [24, 40], sizes = [24, 8], strides = [1, 1]} : vector<48x48xf32> to vector<24x8xf32>
    %220 = vector.shape_cast %208 : vector<24x8xf32> to vector<1x24x8xf32>
    %221 = vector.shape_cast %211 : vector<24x8xf32> to vector<1x24x8xf32>
    %222 = vector.shape_cast %214 : vector<24x8xf32> to vector<1x24x8xf32>
    %223 = vector.shape_cast %217 : vector<24x8xf32> to vector<1x24x8xf32>
    %224 = tpu.concatenate %220, %221, %222, %223 in 0 : vector<1x24x8xf32>, vector<1x24x8xf32>, vector<1x24x8xf32>, vector<1x24x8xf32> -> vector<4x24x8xf32>
    %225 = vector.shape_cast %209 : vector<24x8xf32> to vector<1x24x8xf32>
    %226 = vector.shape_cast %212 : vector<24x8xf32> to vector<1x24x8xf32>
    %227 = vector.shape_cast %215 : vector<24x8xf32> to vector<1x24x8xf32>
    %228 = vector.shape_cast %218 : vector<24x8xf32> to vector<1x24x8xf32>
    %229 = tpu.concatenate %225, %226, %227, %228 in 0 : vector<1x24x8xf32>, vector<1x24x8xf32>, vector<1x24x8xf32>, vector<1x24x8xf32> -> vector<4x24x8xf32>
    %230 = vector.shape_cast %210 : vector<24x8xf32> to vector<1x24x8xf32>
    %231 = vector.shape_cast %213 : vector<24x8xf32> to vector<1x24x8xf32>
    %232 = vector.shape_cast %216 : vector<24x8xf32> to vector<1x24x8xf32>
    %233 = vector.shape_cast %219 : vector<24x8xf32> to vector<1x24x8xf32>
    %234 = tpu.concatenate %230, %231, %232, %233 in 0 : vector<1x24x8xf32>, vector<1x24x8xf32>, vector<1x24x8xf32>, vector<1x24x8xf32> -> vector<4x24x8xf32>
    "tpu.trace_start"() <{level = 10 : i32, message = "bqd,bkd->bqk"}> : () -> ()
    %cst_71 = arith.constant dense<0.000000e+00> : vector<4x24x24xf32>
    %235 = tpu.matmul %224, %229, %cst_71 {dimension_numbers = #tpu.dot_dimension_numbers<[2], [2], [1], [1], [0, 0, 0, 1, 1, 1], [0], [0]>} : vector<4x24x8xf32>, vector<4x24x8xf32>, vector<4x24x24xf32> -> vector<4x24x24xf32>
    %cst_72 = arith.constant -1.000000e+30 : f32
    "tpu.trace_stop"() : () -> ()
    %236 = vector.broadcast %cst_72 : f32 to vector<4x24x24xf32>
    %237 = arith.select %8, %235, %236 : vector<4x24x24xi1>, vector<4x24x24xf32>
    %cst_73 = arith.constant dense<0xFF800000> : vector<4x24xf32>
    %238 = vector.multi_reduction <maximumf>, %237, %cst_73 [2] : vector<4x24x24xf32> to vector<4x24xf32>
    %239 = vector.shape_cast %238 : vector<4x24xf32> to vector<4x24x1xf32>
    %240 = vector.broadcast %239 : vector<4x24x1xf32> to vector<4x24x24xf32>
    %241 = arith.subf %237, %240 : vector<4x24x24xf32>
    %242 = math.exp %241 : vector<4x24x24xf32>
    %cst_74 = arith.constant dense<0.000000e+00> : vector<4x24xf32>
    %243 = vector.multi_reduction <add>, %242, %cst_74 [2] : vector<4x24x24xf32> to vector<4x24xf32>
    %244 = vector.shape_cast %243 : vector<4x24xf32> to vector<4x24x1xf32>
    %245 = tpu.reciprocal %244 {approx = true} : vector<4x24x1xf32> -> vector<4x24x1xf32>
    %246 = vector.broadcast %245 : vector<4x24x1xf32> to vector<4x24x24xf32>
    %247 = arith.mulf %242, %246 : vector<4x24x24xf32>
    "tpu.trace_start"() <{level = 10 : i32, message = "bqk,bkd->bqd"}> : () -> ()
    %cst_75 = arith.constant dense<0.000000e+00> : vector<4x24x8xf32>
    %248 = tpu.matmul %247, %234, %cst_75 {dimension_numbers = #tpu.dot_dimension_numbers<[2], [1], [1], [2], [0, 0, 0, 1, 1, 2], [0], [0]>} : vector<4x24x24xf32>, vector<4x24x8xf32>, vector<4x24x8xf32> -> vector<4x24x8xf32>
    "tpu.trace_stop"() : () -> ()
    %249 = vector.extract_strided_slice %248 {offsets = [0, 0, 0], sizes = [1, 24, 8], strides = [1, 1, 1]} : vector<4x24x8xf32> to vector<1x24x8xf32>
    %250 = vector.shape_cast %249 : vector<1x24x8xf32> to vector<24x8xf32>
    %251 = vector.extract_strided_slice %248 {offsets = [1, 0, 0], sizes = [1, 24, 8], strides = [1, 1, 1]} : vector<4x24x8xf32> to vector<1x24x8xf32>
    %252 = vector.shape_cast %251 : vector<1x24x8xf32> to vector<24x8xf32>
    %253 = tpu.concatenate %250, %252 in 1 : vector<24x8xf32>, vector<24x8xf32> -> vector<24x16xf32>
    %254 = vector.extract_strided_slice %248 {offsets = [2, 0, 0], sizes = [1, 24, 8], strides = [1, 1, 1]} : vector<4x24x8xf32> to vector<1x24x8xf32>
    %255 = vector.shape_cast %254 : vector<1x24x8xf32> to vector<24x8xf32>
    %256 = vector.extract_strided_slice %248 {offsets = [3, 0, 0], sizes = [1, 24, 8], strides = [1, 1, 1]} : vector<4x24x8xf32> to vector<1x24x8xf32>
    %257 = vector.shape_cast %256 : vector<1x24x8xf32> to vector<24x8xf32>
    %258 = tpu.concatenate %255, %257 in 1 : vector<24x8xf32>, vector<24x8xf32> -> vector<24x16xf32>
    %259 = tpu.concatenate %253, %258 in 0 : vector<24x16xf32>, vector<24x16xf32> -> vector<48x16xf32>
    %260 = arith.addf %172, %259 : vector<48x16xf32>
    %cst_76 = arith.constant dense<0.000000e+00> : vector<48xf32>
    %261 = vector.multi_reduction <add>, %260, %cst_76 [1] : vector<48x16xf32> to vector<48xf32>
    %262 = vector.shape_cast %261 : vector<48xf32> to vector<48x1xf32>
    %cst_77 = arith.constant 1.600000e+01 : f32
    %263 = vector.broadcast %cst_77 : f32 to vector<48x1xf32>
    %264 = arith.divf %262, %263 : vector<48x1xf32>
    %265 = vector.broadcast %264 : vector<48x1xf32> to vector<48x16xf32>
    %266 = arith.subf %260, %265 : vector<48x16xf32>
    %267 = arith.mulf %266, %266 : vector<48x16xf32>
    %cst_78 = arith.constant dense<0.000000e+00> : vector<48xf32>
    %268 = vector.multi_reduction <add>, %267, %cst_78 [1] : vector<48x16xf32> to vector<48xf32>
    %269 = vector.shape_cast %268 : vector<48xf32> to vector<48x1xf32>
    %cst_79 = arith.constant 1.600000e+01 : f32
    %270 = vector.broadcast %cst_79 : f32 to vector<48x1xf32>
    %271 = arith.divf %269, %270 : vector<48x1xf32>
    %272 = vector.broadcast %264 : vector<48x1xf32> to vector<48x16xf32>
    %273 = arith.subf %260, %272 : vector<48x16xf32>
    %cst_80 = arith.constant 9.99999974E-6 : f32
    %274 = vector.broadcast %cst_80 : f32 to vector<48x1xf32>
    %275 = arith.addf %271, %274 : vector<48x1xf32>
    %276 = math.rsqrt %275 : vector<48x1xf32>
    %277 = vector.broadcast %276 : vector<48x1xf32> to vector<48x16xf32>
    %278 = arith.mulf %273, %277 : vector<48x16xf32>
    %279 = vector.broadcast %180 : vector<1x16xf32> to vector<48x16xf32>
    %280 = arith.mulf %278, %279 : vector<48x16xf32>
    %281 = vector.broadcast %181 : vector<1x16xf32> to vector<48x16xf32>
    %282 = arith.addf %280, %281 : vector<48x16xf32>
    %cst_81 = arith.constant dense<0.000000e+00> : vector<48x64xf32>
    %283 = tpu.matmul %282, %174, %cst_81 {dimension_numbers = #tpu.dot_dimension_numbers<[1], [0], [0], [1], [0, 0, 1, 1], [], []>} : vector<48x16xf32>, vector<16x64xf32>, vector<48x64xf32> -> vector<48x64xf32>
    %284 = vector.broadcast %177 : vector<1x64xf32> to vector<48x64xf32>
    %285 = arith.addf %283, %284 : vector<48x64xf32>
    %cst_82 = arith.constant 5.000000e-01 : f32
    %286 = vector.broadcast %cst_82 : f32 to vector<48x64xf32>
    %287 = arith.mulf %286, %285 : vector<48x64xf32>
    %cst_83 = arith.constant 0.707106769 : f32
    %288 = vector.broadcast %cst_83 : f32 to vector<48x64xf32>
    %289 = arith.mulf %285, %288 : vector<48x64xf32>
    %cst_84 = arith.constant -4.000000e+00 : f32
    %cst_85 = arith.constant 4.000000e+00 : f32
    %290 = vector.broadcast %cst_84 : f32 to vector<48x64xf32>
    %291 = arith.maximumf %290, %289 : vector<48x64xf32>
    %292 = vector.broadcast %cst_85 : f32 to vector<48x64xf32>
    %293 = arith.minimumf %292, %291 : vector<48x64xf32>
    %294 = arith.mulf %293, %293 : vector<48x64xf32>
    %cst_86 = arith.constant -2.72614237E-10 : f32
    %295 = vector.broadcast %cst_86 : f32 to vector<48x64xf32>
    %296 = arith.mulf %295, %294 : vector<48x64xf32>
    %cst_87 = arith.constant 2.77068146E-8 : f32
    %297 = vector.broadcast %cst_87 : f32 to vector<48x64xf32>
    %298 = arith.addf %296, %297 : vector<48x64xf32>
    %299 = arith.mulf %298, %294 : vector<48x64xf32>
    %cst_88 = arith.constant -2.10102394E-6 : f32
    %300 = vector.broadcast %cst_88 : f32 to vector<48x64xf32>
    %301 = arith.addf %299, %300 : vector<48x64xf32>
    %302 = arith.mulf %301, %294 : vector<48x64xf32>
    %cst_89 = arith.constant -5.69250624E-5 : f32
    %303 = vector.broadcast %cst_89 : f32 to vector<48x64xf32>
    %304 = arith.addf %302, %303 : vector<48x64xf32>
    %305 = arith.mulf %304, %294 : vector<48x64xf32>
    %cst_90 = arith.constant -7.34990637E-4 : f32
    %306 = vector.broadcast %cst_90 : f32 to vector<48x64xf32>
    %307 = arith.addf %305, %306 : vector<48x64xf32>
    %308 = arith.mulf %307, %294 : vector<48x64xf32>
    %cst_91 = arith.constant -2.954600e-03 : f32
    %309 = vector.broadcast %cst_91 : f32 to vector<48x64xf32>
    %310 = arith.addf %308, %309 : vector<48x64xf32>
    %311 = arith.mulf %310, %294 : vector<48x64xf32>
    %cst_92 = arith.constant -0.0160960332 : f32
    %312 = vector.broadcast %cst_92 : f32 to vector<48x64xf32>
    %313 = arith.addf %311, %312 : vector<48x64xf32>
    %314 = arith.mulf %313, %293 : vector<48x64xf32>
    %cst_93 = arith.constant -1.45660715E-5 : f32
    %315 = vector.broadcast %cst_93 : f32 to vector<48x64xf32>
    %316 = arith.mulf %315, %294 : vector<48x64xf32>
    %cst_94 = arith.constant -2.13374049E-4 : f32
    %317 = vector.broadcast %cst_94 : f32 to vector<48x64xf32>
    %318 = arith.addf %316, %317 : vector<48x64xf32>
    %319 = arith.mulf %318, %294 : vector<48x64xf32>
    %cst_95 = arith.constant -0.00168282702 : f32
    %320 = vector.broadcast %cst_95 : f32 to vector<48x64xf32>
    %321 = arith.addf %319, %320 : vector<48x64xf32>
    %322 = arith.mulf %321, %294 : vector<48x64xf32>
    %cst_96 = arith.constant -0.00737332925 : f32
    %323 = vector.broadcast %cst_96 : f32 to vector<48x64xf32>
    %324 = arith.addf %322, %323 : vector<48x64xf32>
    %325 = arith.mulf %324, %294 : vector<48x64xf32>
    %cst_97 = arith.constant -0.0142647391 : f32
    %326 = vector.broadcast %cst_97 : f32 to vector<48x64xf32>
    %327 = arith.addf %325, %326 : vector<48x64xf32>
    %328 = tpu.reciprocal %327 {approx = true} : vector<48x64xf32> -> vector<48x64xf32>
    %329 = arith.mulf %314, %328 : vector<48x64xf32>
    %cst_98 = arith.constant 1.000000e+00 : f32
    %330 = vector.broadcast %cst_98 : f32 to vector<48x64xf32>
    %331 = arith.addf %330, %329 : vector<48x64xf32>
    %332 = arith.mulf %287, %331 : vector<48x64xf32>
    %cst_99 = arith.constant dense<0.000000e+00> : vector<48x16xf32>
    %333 = tpu.matmul %332, %175, %cst_99 {dimension_numbers = #tpu.dot_dimension_numbers<[1], [0], [0], [1], [0, 0, 1, 1], [], []>} : vector<48x64xf32>, vector<64x16xf32>, vector<48x16xf32> -> vector<48x16xf32>
    %334 = vector.broadcast %182 : vector<1x16xf32> to vector<48x16xf32>
    %335 = arith.addf %333, %334 : vector<48x16xf32>
    %336 = arith.addf %260, %335 : vector<48x16xf32>
    %c0_100 = arith.constant 0 : index
    %c0_101 = arith.constant 0 : index
    %337 = vector.load %arg3[%c0_100, %c0_101] : memref<48x16xf32, #tpu.memory_space<vmem>>, vector<48x16xf32>
    tpu.vector_store %arg3[%c0_100, %c0_101], %336 {strides = array<i32>} : memref<48x16xf32, #tpu.memory_space<vmem>>, vector<48x16xf32>,
    return
  }
  func.func @transform_0(%arg0: i32) -> (i32, i32) {
    %c0_i32 = arith.constant 0 : i32
    %c0_i32_0 = arith.constant 0 : i32
    %c0_i32_1 = arith.constant 0 : i32
    return %c0_i32, %c0_i32_0 : i32, i32
  }
  func.func @transform_1(%arg0: i32) -> (i32, i32) {
    %c0_i32 = arith.constant 0 : i32
    %c0_i32_0 = arith.constant 0 : i32
    %c0_i32_1 = arith.constant 0 : i32
    return %c0_i32, %c0_i32_0 : i32, i32
  }
  func.func @transform_2(%arg0: i32) -> (i32, i32) {
    %c0_i32 = arith.constant 0 : i32
    %c0_i32_0 = arith.constant 0 : i32
    %c0_i32_1 = arith.constant 0 : i32
    return %c0_i32, %c0_i32_0 : i32, i32
  }
}

</mosaic_0001>

<bundles_post_ra>
// kernel: tang_vit_forward.1
= control target key start
LH: loop header
LB: loop body
LE: loop exit
PB: predicated region body
PF: predicated region fallthrough
CT: control target
= control target key end

     0   :  { %s3039_s13 = smov 16   ;;  %s3040_s16 = smov 96   ;;  %vm42_vm0 = vcmask 130048   ;;  %v3041_v36 = vmov 16.0   ;;  %s4347_s1 = inlined_call_operand.vmem [shape: f32[104,128], index: 1, kind: input, shape index: {}]   ;;  %s4348_s0 = inlined_call_operand.vmem [shape: f32[48,16], index: 0, kind: input, shape index: {}]   ;;  %s4349_s2 = inlined_call_operand.vmem [shape: f32[48,16], index: 2, kind: output, shape index: {}]  }
   0x1   :  { %v11_v0 = vld [vmem:[%s4347_s1] sm:$0xff]  ;;  %v12_v1 = vld [vmem:[%s4347_s1 + $0x8] sm:$0xff]  ;;  %v15_v5 = vld [vmem:[%s4347_s1 + $0x30] sm:$0xff]  ;;  %2867 = vrcp.f32 %v3041_v36  ;;  %s3042_s10 = smov 120   ;;  %s3043_s11 = smov 112  }
   0x2   :  { %v2760_v2 = vpack.i.bf16 %v11_v0, %v12_v1  ;;  %307 = vmatpush.msra.mxu1 %v12_v1  ;;  %v13_v3 = vld [vmem:[%s4347_s1 + $0x20] sm:$0xff]  ;;  %v14_v4 = vld [vmem:[%s4347_s1 + $0x28] sm:$0xff]  ;;  %v18_v11 = vld [vmem:[%s4348_s0 + $0x10] sm:$0xff]  ;;  %s3044_s12 = smov 8   ;;  %s3045_s23 = smov 80  }
   0x3   :  { %35 = vrot.lane.b32.xlu1 %v14_v4, %s3040_s16  ;;  %v16_v9 = vld [vmem:[%s4348_s0] sm:$0xff]  ;;  %v17_v10 = vld [vmem:[%s4348_s0 + $0x8] sm:$0xff]  ;;  %v19_v12 = vld [vmem:[%s4348_s0 + $0x18] sm:$0xff] }
   0x4   :  { %2761 = vrot.lane.b32.xlu0 %v2760_v2, %s3039_s13  ;;  %308 = vmatpush.msra.mxu1 %v11_v0  ;;  %v20_v13 = vld [vmem:[%s4348_s0 + $0x20] sm:$0xff]  ;;  %v21_v14 = vld [vmem:[%s4348_s0 + $0x28] sm:$0xff]  ;;  %v2855_v45 = vld [vmem:[%s4347_s1 + $0x11] ss:$0 sm:$0xff] }
   0x7   :  { %v2868_v37 = vpop.eup %2867 }
   0x8   :  { %v132_v38 = vmul.f32 16.0, %v2868_v37  ;;  %vm136_vm1 = vweird.f32 %v2868_v37 }
   0xa   :  { %v133_v39 = vsub.f32 1.0, %v132_v38 }
   0xb   :  { %37 = vrot.lane.b32.xlu1 %v15_v5, %s3040_s16 }
   0xc   :  { %33 = vrot.lane.b32.xlu0 %v13_v3, %s3040_s16  ;;  %v134_v40 = vmul.f32 %v2868_v37, %v133_v39 }
   0xe   :  { %v135_v41 = vadd.f32 %v2868_v37, %v134_v40 }
  0x10   :  { %v3128_v42 = vsel %vm136_vm1, %v2868_v37, %v135_v41 }
  0x75   :  { %v36_v19 = vpop.permute.xlu1 %35 }
  0x76   :  { %v2762_v6 = vpop.permute.xlu0 %2761 }
  0x77   :  { %v2763_v7 = vunpack.i.l.bf16 %v2762_v6  ;;  %v2764_v8 = vunpack.i.h.bf16 %v2762_v6 }
  0x79   :  { %75 = vmatpush.msra.mxu0 %v2763_v7 }
  0x7b   :  { %76 = vmatpush.msra.mxu0 %v2764_v8  ;;  %v2856_v8 = vld [vmem:[%s4347_s1 + $0x10] ss:$0 sm:$0xff] }
  0x7c   :  { %2621 = vmatmul.msk.f32.vlgmr.msra.gmra.mxu0 %vm42_vm0, %v16_v9 }
  0x7d   :  { %v38_v23 = vpop.permute.xlu1 %37 }
  0x7e   :  { %v34_v15 = vpop.permute.xlu0 %33 }
  0x84   :  { %2622 = vmatmul.msk.f32.gmra.mxu0 %vm42_vm0, %v17_v10 }
  0x8c   :  { %2623 = vmatmul.msk.f32.gmra.mxu0 %vm42_vm0, %v18_v11 }
  0x94   :  { %2624 = vmatmul.msk.f32.gmra.mxu0 %vm42_vm0, %v19_v12 }
  0x9c   :  { %2625 = vmatmul.msk.f32.gmra.mxu0 %vm42_vm0, %v20_v13 }
  0xa4   :  { %2626 = vmatmul.msk.f32.gmra.mxu0 %vm42_vm0, %v21_v14 }
  0xf9   :  { %v78_v16 = vpop.f32.mrf.mxu0 }
  0xfa   :  { %v3104_v17 = vadd.f32 %v78_v16, %v34_v15 }
  0xfc   :  { %v113_v18 = vsel %vm42_vm0, %v3104_v17, 0.0 }
  0xfd   :  { %114 = vadd.xlane.f32.xlu2 %v113_v18 }
 0x101   :  { %v81_v20 = vpop.f32.mrf.mxu0 }
 0x102   :  { %v3108_v21 = vadd.f32 %v81_v20, %v36_v19 }
 0x104   :  { %v116_v22 = vsel %vm42_vm0, %v3108_v21, 0.0 }
 0x105   :  { %117 = vadd.xlane.f32.xlu2 %v116_v22 }
 0x109   :  { %v84_v24 = vpop.f32.mrf.mxu0 }
 0x10a   :  { %v3112_v25 = vadd.f32 %v84_v24, %v38_v23 }
 0x10c   :  { %v119_v26 = vsel %vm42_vm0, %v3112_v25, 0.0 }
 0x10d   :  { %120 = vadd.xlane.f32.xlu0 %v119_v26 }
 0x111   :  { %v87_v27 = vpop.f32.mrf.mxu0 }
 0x112   :  { %v3116_v28 = vadd.f32 %v87_v27, %v34_v15 }
 0x114   :  { %v122_v29 = vsel %vm42_vm0, %v3116_v28, 0.0 }
 0x115   :  { %123 = vadd.xlane.f32.xlu1 %v122_v29 }
 0x119   :  { %v90_v30 = vpop.f32.mrf.mxu0 }
 0x11a   :  { %v3120_v31 = vadd.f32 %v90_v30, %v36_v19 }
 0x11c   :  { %v125_v32 = vsel %vm42_vm0, %v3120_v31, 0.0 }
 0x11d   :  { %126 = vadd.xlane.f32.xlu2 %v125_v32 }
 0x121   :  { %v93_v33 = vpop.f32.mrf.mxu0  ;;  %265 = vrot.lane.b32.xlu0 %v2855_v45, %s3039_s13 }
 0x122   :  { %v3124_v34 = vadd.f32 %v93_v33, %v38_v23 }
 0x124   :  { %v128_v35 = vsel %vm42_vm0, %v3124_v34, 0.0 }
 0x125   :  { %129 = vadd.xlane.f32.xlu2 %v128_v35 }
 0x170   :  { %v115_v43 = vpop.xlane.xlu2 %114 }
 0x171   :  { %v138_v44 = vmul.f32 %v3128_v42, %v115_v43 }
 0x173   :  { %v3135_v46 = vsub.f32 %v3104_v17, %v138_v44 }
 0x175   :  { %v150_v47 = vmul.f32 %v3135_v46, %v3135_v46 }
 0x177   :  { %v156_v48 = vsel %vm42_vm0, %v150_v47, 0.0 }
 0x178   :  { %157 = vadd.xlane.f32.xlu2 %v156_v48  ;;  %v118_v49 = vpop.xlane.xlu2 %117 }
 0x179   :  { %v139_v50 = vmul.f32 %v3128_v42, %v118_v49 }
 0x17b   :  { %v3143_v51 = vsub.f32 %v3108_v21, %v139_v50 }
 0x17d   :  { %v151_v52 = vmul.f32 %v3143_v51, %v3143_v51 }
 0x17f   :  { %v159_v53 = vsel %vm42_vm0, %v151_v52, 0.0 }
 0x180   :  { %v121_v54 = vpop.xlane.xlu0 %120  ;;  %160 = vadd.xlane.f32.xlu2 %v159_v53 }
 0x181   :  { %v140_v55 = vmul.f32 %v3128_v42, %v121_v54 }
 0x183   :  { %v3150_v56 = vsub.f32 %v3112_v25, %v140_v55 }
 0x185   :  { %v152_v57 = vmul.f32 %v3150_v56, %v3150_v56 }
 0x187   :  { %v162_v58 = vsel %vm42_vm0, %v152_v57, 0.0 }
 0x188   :  { %v124_v59 = vpop.xlane.xlu1 %123  ;;  %163 = vadd.xlane.f32.xlu2 %v162_v58 }
 0x189   :  { %v141_v60 = vmul.f32 %v3128_v42, %v124_v59 }
 0x18b   :  { %v3157_v61 = vsub.f32 %v3116_v28, %v141_v60 }
 0x18d   :  { %v153_v62 = vmul.f32 %v3157_v61, %v3157_v61 }
 0x18f   :  { %v165_v63 = vsel %vm42_vm0, %v153_v62, 0.0 }
 0x190   :  { %166 = vadd.xlane.f32.xlu1 %v165_v63  ;;  %v127_v0 = vpop.xlane.xlu2 %126 }
 0x191   :  { %v142_v1 = vmul.f32 %v3128_v42, %v127_v0 }
 0x193   :  { %v3164_v2 = vsub.f32 %v3120_v31, %v142_v1  ;;  %v3183_v36 = vpop.permute.xlu0 %265 }
 0x195   :  { %v154_v3 = vmul.f32 %v3164_v2, %v3164_v2 }
 0x197   :  { %v168_v4 = vsel %vm42_vm0, %v154_v3, 0.0 }
 0x198   :  { %169 = vadd.xlane.f32.xlu1 %v168_v4  ;;  %v130_v5 = vpop.xlane.xlu2 %129 }
 0x199   :  { %v143_v6 = vmul.f32 %v3128_v42, %v130_v5 }
 0x19b   :  { %v3171_v7 = vsub.f32 %v3124_v34, %v143_v6 }
 0x19d   :  { %v155_v9 = vmul.f32 %v3171_v7, %v3171_v7 }
 0x19f   :  { %v171_v10 = vsel %vm42_vm0, %v155_v9, 0.0 }
 0x1a0   :  { %172 = vadd.xlane.f32.xlu1 %v171_v10  ;;  %254 = vrot.lane.b32.xlu2 %v2856_v8, %s3039_s13 }
 0x1eb   :  { %v158_v11 = vpop.xlane.xlu2 %157 }
 0x1ec   :  { %v174_v12 = vmul.f32 %v158_v11, %v3128_v42 }
 0x1ee   :  { %v180_v13 = vadd.f32 1e-05, %v174_v12 }
 0x1f0   :  { %2869 = vrsqrt.f32 %v180_v13  ;;  %vm192_vm3 = vweird.f32 %v180_v13 }
 0x1f3   :  { %v161_v14 = vpop.xlane.xlu2 %160 }
 0x1f4   :  { %v175_v15 = vmul.f32 %v161_v14, %v3128_v42 }
 0x1f6   :  { %v2870_v16 = vpop.eup %2869  ;;  %v181_v18 = vadd.f32 1e-05, %v175_v15 }
 0x1f7   :  { %v187_v19 = vmul.f32 %v2870_v16, %v180_v13  ;;  %vm193_vm2 = vweird.f32 %v2870_v16 }
 0x1f8   :  { %2871 = vrsqrt.f32 %v181_v18  ;;  %vm194_vm4 = vmor %vm192_vm3, %vm193_vm2  ;;  %vm202_vm6 = vweird.f32 %v181_v18 }
 0x1f9   :  { %v188_v20 = vmul.f32 %v2870_v16, %v187_v19 }
 0x1fb   :  { %v189_v22 = vmul.f32 0.5, %v188_v20  ;;  %v164_v23 = vpop.xlane.xlu2 %163 }
 0x1fc   :  { %v176_v24 = vmul.f32 %v164_v23, %v3128_v42 }
 0x1fd   :  { %v190_v26 = vsub.f32 1.5, %v189_v22 }
 0x1fe   :  { %v2872_v27 = vpop.eup %2871  ;;  %v182_v29 = vadd.f32 1e-05, %v176_v24 }
 0x1ff   :  { %v191_v30 = vmul.f32 %v2870_v16, %v190_v26  ;;  %v197_v32 = vmul.f32 %v2872_v27, %v181_v18  ;;  %vm203_vm5 = vweird.f32 %v2872_v27 }
 0x200   :  { %2873 = vrsqrt.f32 %v182_v29  ;;  %vm204_vm7 = vmor %vm202_vm6, %vm203_vm5  ;;  %vm212_vm9 = vweird.f32 %v182_v29  ;;  %vm352_vm5 = vcmask 64512  }
 0x201   :  { %v198_v33 = vmul.f32 %v2872_v27, %v197_v32  ;;  %v195_v35 = vsel %vm194_vm4, %v2870_v16, %v191_v30 }
 0x202   :  { %v246_v37 = vmul.f32 %v195_v35, %v3135_v46 }
 0x203   :  { %v199_v38 = vmul.f32 0.5, %v198_v33  ;;  %v167_v39 = vpop.xlane.xlu1 %166  ;;  %v3186_v40 = vpop.permute.xlu2 %254 }
 0x204   :  { %v177_v41 = vmul.f32 %v167_v39, %v3128_v42  ;;  %v257_v43 = vmul.f32 %v3186_v40, %v246_v37 }
 0x205   :  { %v200_v44 = vsub.f32 1.5, %v199_v38 }
 0x206   :  { %v2874_v45 = vpop.eup %2873  ;;  %v183_v47 = vadd.f32 1e-05, %v177_v41  ;;  %v268_v48 = vadd.f32 %v3183_v36, %v257_v43 }
 0x207   :  { %v201_v49 = vmul.f32 %v2872_v27, %v200_v44  ;;  %v207_v50 = vmul.f32 %v2874_v45, %v182_v29  ;;  %vm213_vm8 = vweird.f32 %v2874_v45 }
 0x208   :  { %2875 = vrsqrt.f32 %v183_v47  ;;  %2627 = vmatmul.msk.f32.vlgmr.msra.gmra.mxu1 %vm42_vm0, %v268_v48  ;;  %vm214_vm10 = vmor %vm212_vm9, %vm213_vm8  ;;  %vm222_vm12 = vweird.f32 %v183_v47 }
 0x209   :  { %v208_v46 = vmul.f32 %v2874_v45, %v207_v50  ;;  %v205_v52 = vsel %vm204_vm7, %v2872_v27, %v201_v49  ;;  %vm535_vm7 = vcmask 195584  }
 0x20a   :  { %v247_v53 = vmul.f32 %v205_v52, %v3143_v51 }
 0x20b   :  { %v209_v54 = vmul.f32 0.5, %v208_v46  ;;  %v170_v55 = vpop.xlane.xlu1 %169 }
 0x20c   :  { %v178_v57 = vmul.f32 %v170_v55, %v3128_v42  ;;  %v258_v58 = vmul.f32 %v3186_v40, %v247_v53 }
 0x20d   :  { %v210_v59 = vsub.f32 1.5, %v209_v54 }
 0x20e   :  { %v2876_v60 = vpop.eup %2875  ;;  %v184_v62 = vadd.f32 1e-05, %v178_v57  ;;  %v269_v63 = vadd.f32 %v3183_v36, %v258_v58 }
 0x20f   :  { %v211_v0 = vmul.f32 %v2874_v45, %v210_v59  ;;  %v217_v1 = vmul.f32 %v2876_v60, %v183_v47  ;;  %vm223_vm11 = vweird.f32 %v2876_v60 }
 0x210   :  { %2877 = vrsqrt.f32 %v184_v62  ;;  %2628 = vmatmul.msk.f32.gmra.mxu1 %vm42_vm0, %v269_v63  ;;  %vm224_vm13 = vmor %vm222_vm12, %vm223_vm11  ;;  %vm232_vm15 = vweird.f32 %v184_v62 }
 0x211   :  { %v218_v51 = vmul.f32 %v2876_v60, %v217_v1  ;;  %v215_v3 = vsel %vm214_vm10, %v2874_v45, %v211_v0 }
 0x212   :  { %v248_v4 = vmul.f32 %v215_v3, %v3150_v56 }
 0x213   :  { %v219_v5 = vmul.f32 0.5, %v218_v51  ;;  %v173_v6 = vpop.xlane.xlu1 %172 }
 0x214   :  { %v179_v8 = vmul.f32 %v173_v6, %v3128_v42  ;;  %v259_v9 = vmul.f32 %v3186_v40, %v248_v4 }
 0x215   :  { %v220_v10 = vsub.f32 1.5, %v219_v5 }
 0x216   :  { %v2878_v11 = vpop.eup %2877  ;;  %v185_v12 = vadd.f32 1e-05, %v179_v8  ;;  %v270_v13 = vadd.f32 %v3183_v36, %v259_v9 }
 0x217   :  { %v221_v14 = vmul.f32 %v2876_v60, %v220_v10  ;;  %v227_v15 = vmul.f32 %v2878_v11, %v184_v62  ;;  %vm233_vm14 = vweird.f32 %v2878_v11 }
 0x218   :  { %2879 = vrsqrt.f32 %v185_v12  ;;  %2629 = vmatmul.msk.f32.gmra.mxu1 %vm42_vm0, %v270_v13  ;;  %vm234_vm1 = vmor %vm232_vm15, %vm233_vm14  ;;  %vm242_vm3 = vweird.f32 %v185_v12 }
 0x219   :  { %v228_v56 = vmul.f32 %v2878_v11, %v227_v15  ;;  %v225_v16 = vsel %vm224_vm13, %v2876_v60, %v221_v14 }
 0x21a   :  { %v249_v18 = vmul.f32 %v225_v16, %v3157_v61 }
 0x21b   :  { %v229_v19 = vmul.f32 0.5, %v228_v56 }
 0x21c   :  { %v260_v20 = vmul.f32 %v3186_v40, %v249_v18 }
 0x21d   :  { %v230_v22 = vsub.f32 1.5, %v229_v19 }
 0x21e   :  { %v2880_v23 = vpop.eup %2879  ;;  %v271_v24 = vadd.f32 %v3183_v36, %v260_v20 }
 0x21f   :  { %v231_v26 = vmul.f32 %v2878_v11, %v230_v22  ;;  %v237_v27 = vmul.f32 %v2880_v23, %v185_v12  ;;  %vm243_vm2 = vweird.f32 %v2880_v23  ;;  %v96_v12 = vlaneseq }
 0x220   :  { %2630 = vmatmul.msk.f32.gmra.mxu1 %vm42_vm0, %v271_v24  ;;  %vm244_vm4 = vmor %vm242_vm3, %vm243_vm2 }
 0x221   :  { %v238_v29 = vmul.f32 %v2880_v23, %v237_v27  ;;  %v235_v30 = vsel %vm234_vm1, %v2878_v11, %v231_v26  ;;  %v3327_v14 = vand.u32 127, %v96_v12 }
 0x222   :  { %v250_v32 = vmul.f32 %v235_v30, %v3164_v2  ;;  %v3217_v2 = vld [vmem:[%s4347_s1 + $0x60] ss:$0 sm:$0xff] }
 0x223   :  { %v239_v33 = vmul.f32 0.5, %v238_v29  ;;  %vm98_vm6 = vcmp.lt.s32.totalorder %v3327_v14, 17 }
 0x224   :  { %v261_v61 = vmul.f32 %v3186_v40, %v250_v32 }
 0x225   :  { %v240_v35 = vsub.f32 1.5, %v239_v33 }
 0x226   :  { %v272_v37 = vadd.f32 %v3183_v36, %v261_v61 }
 0x227   :  { %v241_v38 = vmul.f32 %v2880_v23, %v240_v35 }
 0x228   :  { %2631 = vmatmul.msk.f32.gmra.mxu1 %vm42_vm0, %v272_v37 }
 0x229   :  { %v245_v39 = vsel %vm244_vm4, %v2880_v23, %v241_v38 }
 0x22a   :  { %v251_v41 = vmul.f32 %v245_v39, %v3171_v7 }
 0x22c   :  { %v262_v43 = vmul.f32 %v3186_v40, %v251_v41 }
 0x22e   :  { %v273_v44 = vadd.f32 %v3183_v36, %v262_v43 }
 0x230   :  { %2632 = vmatmul.msk.f32.gmra.mxu1 %vm42_vm0, %v273_v44 }
 0x285   :  { %v310_v45 = vpop.f32.mrf.mxu1 }
 0x286   :  { %v3220_v47 = vadd.f32 %v3217_v2, %v310_v45 }
 0x288   :  { %331 = vrot.lane.b32.xlu1 %v3220_v47, %s3042_s10 }
 0x28d   :  { %v313_v7 = vpop.f32.mrf.mxu1 }
 0x28e   :  { %v3225_v40 = vadd.f32 %v3217_v2, %v313_v7 }
 0x290   :  { %333 = vrot.lane.b32.xlu2 %v3225_v40, %s3042_s10 }
 0x295   :  { %v316_v36 = vpop.f32.mrf.mxu1 }
 0x296   :  { %v3230_v48 = vadd.f32 %v3217_v2, %v316_v36 }
 0x298   :  { %335 = vrot.lane.b32.xlu0 %v3230_v48, %s3042_s10 }
 0x29d   :  { %v319_v49 = vpop.f32.mrf.mxu1 }
 0x29e   :  { %v3245_v54 = vadd.f32 %v3217_v2, %v319_v49 }
 0x2a5   :  { %v322_v50 = vpop.f32.mrf.mxu1 }
 0x2a6   :  { %v3235_v46 = vadd.f32 %v3217_v2, %v322_v50 }
 0x2a8   :  { %342 = vrot.lane.b32.xlu0 %v3235_v46, %s3042_s10 }
 0x2ad   :  { %v325_v52 = vpop.f32.mrf.mxu1 }
 0x2ae   :  { %v3240_v53 = vadd.f32 %v3217_v2, %v325_v52 }
 0x2b0   :  { %344 = vrot.lane.b32.xlu0 %v3240_v53, %s3042_s10 }
 0x2b8   :  { %340 = vrot.lane.b32.xlu0 %v3245_v54, %s3042_s10 }
 0x2c0   :  { %350 = vrot.lane.b32.xlu0 %v3230_v48, %s3043_s11 }
 0x2ea   :  { %v3251_v55 = vpop.permute.xlu2 %333 }
 0x2eb   :  { %393 = vrot.lane.b32.xlu2 %v3251_v55, %s3043_s11 }
 0x2fa   :  { %v3259_v58 = vpop.permute.xlu1 %331 }
 0x30a   :  { %v3255_v57 = vpop.permute.xlu0 %335 }
 0x30b   :  { %395 = vrot.lane.b32.xlu2 %v3255_v57, %s3043_s11  ;;  %v2765_v41 = vpack.i.bf16 %v3251_v55, %v3255_v57 }
 0x313   :  { %391 = vrot.lane.b32.xlu2 %v3259_v58, %s3043_s11 }
 0x31a   :  { %v3263_v59 = vpop.permute.xlu0 %342 }
 0x31b   :  { %481 = vrot.lane.b32.xlu2 %v3263_v59, %s3043_s11 }
 0x322   :  { %v3267_v60 = vpop.permute.xlu0 %344 }
 0x323   :  { %483 = vrot.lane.b32.xlu1 %v3267_v60, %s3043_s11  ;;  %346 = vrot.lane.b32.xlu2 %v3220_v47, %s3043_s11  ;;  %v2770_v44 = vpack.i.bf16 %v3267_v60, %v3259_v58 }
 0x32a   :  { %v3273_v62 = vpop.permute.xlu0 %340 }
 0x32b   :  { %479 = vrot.lane.b32.xlu0 %v3273_v62, %s3043_s11  ;;  %348 = vrot.lane.b32.xlu1 %v3225_v40, %s3043_s11  ;;  %v2775_v43 = vpack.i.bf16 %v3273_v62, %v3263_v59 }
 0x32c   :  { %435 = vrot.lane.b32.xlu2 %v3245_v54, %s3043_s11 }
 0x332   :  { %v351_v63 = vpop.permute.xlu0 %350 }
 0x333   :  { %437 = vrot.lane.b32.xlu0 %v3235_v46, %s3043_s11  ;;  %2633 = vmatpush.xpose.msk.msra.mxu2 %vm352_vm5, %v351_v63 }
 0x334   :  { %439 = vrot.lane.b32.xlu1 %v3240_v53, %s3043_s11 }
 0x345   :  { %v394_v0 = vpop.permute.xlu2 %393 }
 0x365   :  { %v396_v1 = vpop.permute.xlu2 %395 }
 0x366   :  { %2639 = vmatpush.xpose.msk.msra.mxu3 %vm352_vm5, %v396_v1 }
 0x36a   :  { %2640 = vmatpush.xpose.msk.msra.mxu3 %vm352_vm5, %v394_v0 }
 0x36d   :  { %v392_v51 = vpop.permute.xlu2 %391 }
 0x36e   :  { %2641 = vmatpush.xpose.msk.msra.mxu3 %vm352_vm5, %v392_v51 }
 0x371   :  { %2642 = vmatmul.msk.f32.vlgmr.msra.gmra.mxu3 %vm352_vm5, %v3259_v58 }
 0x375   :  { %v482_v4 = vpop.permute.xlu2 %481 }
 0x379   :  { %2643 = vmatmul.msk.f32.gmra.mxu3 %vm352_vm5, %v3251_v55 }
 0x37d   :  { %v347_v8 = vpop.permute.xlu2 %346 }
 0x381   :  { %2644 = vmatmul.msk.f32.gmra.mxu3 %vm352_vm5, %v3255_v57 }
 0x386   :  { %v436_v11 = vpop.permute.xlu2 %435 }
 0x395   :  { %v484_v3 = vpop.permute.xlu1 %483 }
 0x396   :  { %2651 = vmatpush.xpose.msk.msrb.mxu1 %vm352_vm5, %v484_v3  ;;  %2750 = vmatpush.xpose.msk.msrb.mxu3 %vm352_vm5, %v484_v3 }
 0x39a   :  { %2652 = vmatpush.xpose.msk.msrb.mxu1 %vm352_vm5, %v482_v4  ;;  %2751 = vmatpush.xpose.msk.msrb.mxu3 %vm352_vm5, %v482_v4 }
 0x39d   :  { %v480_v5 = vpop.permute.xlu0 %479  ;;  %v349_v6 = vpop.permute.xlu1 %348 }
 0x39e   :  { %2634 = vmatpush.xpose.msk.msra.mxu2 %vm352_vm5, %v349_v6  ;;  %2653 = vmatpush.xpose.msk.msrb.mxu1 %vm352_vm5, %v480_v5 }
 0x39f   :  { %2752 = vmatpush.xpose.msk.msrb.mxu3 %vm352_vm5, %v480_v5 }
 0x3a1   :  { %2654 = vmatmul.msk.f32.vlgmr.msrb.gmra.mxu1 %vm352_vm5, %v3273_v62 }
 0x3a2   :  { %2656 = vmatmul.msk.f32.vlgmr.msrb.gmra.mxu3 %vm352_vm5, %v3267_v60  ;;  %2635 = vmatpush.xpose.msk.msra.mxu2 %vm352_vm5, %v347_v8 }
 0x3a5   :  { %2636 = vmatmul.msk.f32.vlgmr.msra.gmra.mxu2 %vm352_vm5, %v3220_v47  ;;  %v438_v10 = vpop.permute.xlu0 %437 }
 0x3a6   :  { %v440_v9 = vpop.permute.xlu1 %439 }
 0x3a7   :  { %2645 = vmatpush.xpose.msk.msrb.mxu0 %vm352_vm5, %v440_v9  ;;  %2747 = vmatpush.xpose.msk.msrb.mxu2 %vm352_vm5, %v440_v9 }
 0x3a9   :  { %2655 = vmatmul.msk.f32.gmra.mxu1 %vm352_vm5, %v3263_v59 }
 0x3ab   :  { %2646 = vmatpush.xpose.msk.msrb.mxu0 %vm352_vm5, %v438_v10  ;;  %2748 = vmatpush.xpose.msk.msrb.mxu2 %vm352_vm5, %v438_v10 }
 0x3ad   :  { %2637 = vmatmul.msk.f32.gmra.mxu2 %vm352_vm5, %v3225_v40 }
 0x3af   :  { %2647 = vmatpush.xpose.msk.msrb.mxu0 %vm352_vm5, %v436_v11  ;;  %2749 = vmatpush.xpose.msk.msrb.mxu2 %vm352_vm5, %v436_v11 }
 0x3b2   :  { %2648 = vmatmul.msk.f32.vlgmr.msrb.gmra.mxu0 %vm352_vm5, %v3245_v54 }
 0x3b5   :  { %2638 = vmatmul.msk.f32.gmra.mxu2 %vm352_vm5, %v3230_v48 }
 0x3ba   :  { %2649 = vmatmul.msk.f32.gmra.mxu0 %vm352_vm5, %v3235_v46 }
 0x3bd   :  { %2650 = vmatmul.msk.f32.vlgmr.msrb.gmra.mxu2 %vm352_vm5, %v3240_v53 }
 0x3f4   :  { %v426_v13 = vpop.f32.mrf.mxu3 }
 0x3f5   :  { %v526_v38 = vsel %vm98_vm6, %v426_v13, -1e+30 }
 0x3f6   :  { %v545_v39 = vsel %vm535_vm7, %v526_v38, -inf }
 0x3fc   :  { %v429_v18 = vpop.f32.mrf.mxu3 }
 0x3fd   :  { %v527_v29 = vsel %vm98_vm6, %v429_v18, -1e+30 }
 0x3fe   :  { %v548_v61 = vsel %vm535_vm7, %v527_v29, -inf }
 0x404   :  { %v432_v27 = vpop.f32.mrf.mxu3 }
 0x405   :  { %v3346_v30 = vsel %vm98_vm6, %v432_v27, -1e+30 }
 0x406   :  { %v551_v37 = vsel %vm535_vm7, %v3346_v30, -inf }
 0x41e   :  { %v514_v45 = vpop.f32.mrf.mxu1 }
 0x41f   :  { %v3383_v57 = vsel %vm98_vm6, %v514_v45, -1e+30 }
 0x420   :  { %v563_v58 = vsel %vm535_vm7, %v3383_v57, -inf }
 0x425   :  { %v520_v63 = vpop.f32.mrf.mxu3 }
 0x426   :  { %v517_v50 = vpop.f32.mrf.mxu1  ;;  %v3395_v0 = vsel %vm98_vm6, %v520_v63, -1e+30 }
 0x427   :  { %v3377_v52 = vsel %vm98_vm6, %v517_v50, -1e+30  ;;  %v569_v1 = vsel %vm535_vm7, %v3395_v0, -inf }
 0x428   :  { %v382_v15 = vpop.f32.mrf.mxu2  ;;  %v566_v55 = vsel %vm535_vm7, %v3377_v52, -inf }
 0x429   :  { %v523_v56 = vsel %vm98_vm6, %v382_v15, -1e+30 }
 0x42a   :  { %v536_v16 = vsel %vm535_vm7, %v523_v56, -inf }
 0x42b   :  { %537 = vmax.xlane.f32.xlu2 %v536_v16 }
 0x42f   :  { %v470_v19 = vpop.f32.mrf.mxu0 }
 0x430   :  { %v3335_v20 = vsel %vm98_vm6, %v470_v19, -1e+30  ;;  %v385_v22 = vpop.f32.mrf.mxu2 }
 0x431   :  { %v524_v23 = vsel %vm98_vm6, %v385_v22, -1e+30  ;;  %v554_v26 = vsel %vm535_vm7, %v3335_v20, -inf }
 0x432   :  { %v539_v24 = vsel %vm535_vm7, %v524_v23, -inf }
 0x433   :  { %540 = vmax.xlane.f32.xlu0 %v539_v24  ;;  %555 = vmax.xlane.f32.xlu2 %v554_v26  ;;  %v2780_v24 = vpack.i.bf16 %v3225_v40, %v3230_v48 }
 0x437   :  { %v473_v7 = vpop.f32.mrf.mxu0 }
 0x438   :  { %v388_v32 = vpop.f32.mrf.mxu2  ;;  %v3371_v36 = vsel %vm98_vm6, %v473_v7, -1e+30 }
 0x439   :  { %v3350_v33 = vsel %vm98_vm6, %v388_v32, -1e+30  ;;  %v557_v49 = vsel %vm535_vm7, %v3371_v36, -inf }
 0x43a   :  { %v542_v35 = vsel %vm535_vm7, %v3350_v33, -inf }
 0x43b   :  { %549 = vmax.xlane.f32.xlu0 %v548_v61  ;;  %543 = vmax.xlane.f32.xlu1 %v542_v35 }
 0x43c   :  { %552 = vmax.xlane.f32.xlu2 %v551_v37 }
 0x440   :  { %v476_v59 = vpop.f32.mrf.mxu2 }
 0x441   :  { %v3389_v60 = vsel %vm98_vm6, %v476_v59, -1e+30 }
 0x442   :  { %v560_v62 = vsel %vm535_vm7, %v3389_v60, -inf }
 0x443   :  { %546 = vmax.xlane.f32.xlu1 %v545_v39 }
 0x44f   :  { %2766 = vrot.lane.b32.xlu0 %v2765_v41, %s3040_s16 }
 0x454   :  { %2776 = vrot.lane.b32.xlu2 %v2775_v43, %s3040_s16 }
 0x45c   :  { %2771 = vrot.lane.b32.xlu1 %v2770_v44, %s3040_s16 }
 0x479   :  { %558 = vmax.xlane.f32.xlu0 %v557_v49 }
 0x481   :  { %567 = vmax.xlane.f32.xlu0 %v566_v55 }
 0x486   :  { %564 = vmax.xlane.f32.xlu1 %v563_v58 }
 0x48e   :  { %561 = vmax.xlane.f32.xlu1 %v560_v62 }
 0x496   :  { %570 = vmax.xlane.f32.xlu1 %v569_v1 }
 0x49e   :  { %v538_v51 = vpop.xlane.xlu2 %537 }
 0x49f   :  { %v572_v3 = vsub.f32 %v523_v56, %v538_v51 }
 0x4a1   :  { %v584_v4 = vmul.f32 1.442695, %v572_v3 }
 0x4a3   :  { %2881 = vpow2.f32 %v584_v4 }
 0x4a6   :  { %v541_v5 = vpop.xlane.xlu0 %540  ;;  %v556_v15 = vpop.xlane.xlu2 %555 }
 0x4a7   :  { %v573_v6 = vsub.f32 %v524_v23, %v541_v5  ;;  %v578_v51 = vsub.f32 %v3335_v20, %v556_v15 }
 0x4a9   :  { %v3399_v8 = vpop.eup %2881  ;;  %v586_v9 = vmul.f32 1.442695, %v573_v6  ;;  %v596_v4 = vmul.f32 1.442695, %v578_v51 }
 0x4aa   :  { %v608_v10 = vsel %vm535_vm7, %v3399_v8, 0.0 }
 0x4ab   :  { %2883 = vpow2.f32 %v586_v9  ;;  %609 = vadd.xlane.f32.xlu0 %v608_v10 }
 0x4ae   :  { %v544_v11 = vpop.xlane.xlu1 %543  ;;  %v550_v56 = vpop.xlane.xlu0 %549 }
 0x4af   :  { %v576_v19 = vsub.f32 %v527_v29, %v550_v56  ;;  %v553_v26 = vpop.xlane.xlu2 %552  ;;  %v574_v50 = vsub.f32 %v3350_v33, %v544_v11 }
 0x4b0   :  { %v577_v32 = vsub.f32 %v3346_v30, %v553_v26 }
 0x4b1   :  { %v3403_v12 = vpop.eup %2883  ;;  %v592_v23 = vmul.f32 1.442695, %v576_v19  ;;  %v588_v55 = vmul.f32 1.442695, %v574_v50 }
 0x4b2   :  { %v611_v13 = vsel %vm535_vm7, %v3403_v12, 0.0 }
 0x4b3   :  { %612 = vadd.xlane.f32.xlu1 %v611_v13 }
 0x4b6   :  { %v547_v16 = vpop.xlane.xlu1 %546 }
 0x4b7   :  { %v575_v18 = vsub.f32 %v526_v38, %v547_v16  ;;  %v594_v38 = vmul.f32 1.442695, %v577_v32  ;;  %v2777_v48 = vpop.permute.xlu2 %2776 }
 0x4b8   :  { %v2778_v45 = vunpack.i.l.bf16 %v2777_v48  ;;  %v2779_v49 = vunpack.i.h.bf16 %v2777_v48 }
 0x4b9   :  { %v590_v22 = vmul.f32 1.442695, %v575_v18 }
 0x4bb   :  { %2885 = vpow2.f32 %v590_v22 }
 0x4bc   :  { %2887 = vpow2.f32 %v592_v23  ;;  %v2790_v23 = vpack.i.bf16 %v3245_v54, %v3235_v46 }
 0x4bd   :  { %2889 = vpow2.f32 %v594_v38 }
 0x4be   :  { %2891 = vpow2.f32 %v588_v55 }
 0x4bf   :  { %2781 = vrot.lane.b32.xlu0 %v2780_v24, %s3040_s16 }
 0x4c1   :  { %v3410_v27 = vpop.eup %2885  ;;  %v2767_v61 = vpop.permute.xlu0 %2766 }
 0x4c2   :  { %v2768_v35 = vunpack.i.l.bf16 %v2767_v61  ;;  %v617_v37 = vsel %vm535_vm7, %v3410_v27, 0.0  ;;  %v2769_v29 = vunpack.i.h.bf16 %v2767_v61  ;;  %v3415_v39 = vpop.eup %2887 }
 0x4c3   :  { %618 = vadd.xlane.f32.xlu2 %v617_v37  ;;  %v620_v40 = vsel %vm535_vm7, %v3415_v39, 0.0  ;;  %v3419_v30 = vpop.eup %2889 }
 0x4c4   :  { %743 = vmatpush.msra.mxu1 %v2768_v35  ;;  %v623_v7 = vsel %vm535_vm7, %v3419_v30, 0.0  ;;  %v3424_v58 = vpop.eup %2891 }
 0x4c5   :  { %v614_v59 = vsel %vm535_vm7, %v3424_v58, 0.0 }
 0x4c6   :  { %744 = vmatpush.msra.mxu1 %v2769_v29 }
 0x4cb   :  { %621 = vadd.xlane.f32.xlu2 %v620_v40 }
 0x4ce   :  { %v2772_v41 = vpop.permute.xlu1 %2771 }
 0x4cf   :  { %v2774_v43 = vunpack.i.h.bf16 %v2772_v41  ;;  %v2773_v44 = vunpack.i.l.bf16 %v2772_v41 }
 0x4d1   :  { %745 = vmatpush.msra.mxu1 %v2773_v44  ;;  %831 = vmatpush.msra.mxu3 %v2774_v43 }
 0x4d3   :  { %624 = vadd.xlane.f32.xlu2 %v623_v7  ;;  %832 = vmatpush.msra.mxu3 %v2778_v45 }
 0x4d5   :  { %833 = vmatpush.msra.mxu3 %v2779_v49 }
 0x4e9   :  { %615 = vadd.xlane.f32.xlu0 %v614_v59 }
 0x4ec   :  { %v559_v62 = vpop.xlane.xlu0 %558 }
 0x4ed   :  { %v579_v38 = vsub.f32 %v3371_v36, %v559_v62 }
 0x4ef   :  { %v598_v48 = vmul.f32 1.442695, %v579_v38 }
 0x4f4   :  { %v568_v5 = vpop.xlane.xlu0 %567 }
 0x4f5   :  { %v582_v9 = vsub.f32 %v3377_v52, %v568_v5 }
 0x4f7   :  { %v604_v11 = vmul.f32 1.442695, %v582_v9 }
 0x4f9   :  { %v565_v63 = vpop.xlane.xlu1 %564 }
 0x4fa   :  { %v581_v1 = vsub.f32 %v3383_v57, %v565_v63 }
 0x4fc   :  { %v602_v3 = vmul.f32 1.442695, %v581_v1 }
 0x4fe   :  { %2893 = vpow2.f32 %v602_v3 }
 0x4ff   :  { %2895 = vpow2.f32 %v596_v4 }
 0x500   :  { %2897 = vpow2.f32 %v604_v11 }
 0x501   :  { %v562_v6 = vpop.xlane.xlu1 %561 }
 0x504   :  { %v2894_v33 = vpop.eup %2893 }
 0x505   :  { %v635_v10 = vsel %vm535_vm7, %v2894_v33, 0.0  ;;  %v3432_v56 = vpop.eup %2895 }
 0x506   :  { %636 = vadd.xlane.f32.xlu2 %v635_v10  ;;  %v626_v15 = vsel %vm535_vm7, %v3432_v56, 0.0  ;;  %v2898_v16 = vpop.eup %2897 }
 0x507   :  { %v638_v19 = vsel %vm535_vm7, %v2898_v16, 0.0 }
 0x509   :  { %v571_v13 = vpop.xlane.xlu1 %570 }
 0x50a   :  { %v583_v57 = vsub.f32 %v3395_v0, %v571_v13  ;;  %v2785_v0 = vpack.i.bf16 %v3240_v53, %v3220_v47  ;;  %v580_v47 = vsub.f32 %v3389_v60, %v562_v6 }
 0x50c   :  { %v606_v20 = vmul.f32 1.442695, %v583_v57  ;;  %v600_v40 = vmul.f32 1.442695, %v580_v47 }
 0x50e   :  { %2899 = vpow2.f32 %v606_v20  ;;  %627 = vadd.xlane.f32.xlu2 %v626_v15 }
 0x514   :  { %v2900_v18 = vpop.eup %2899 }
 0x515   :  { %v641_v52 = vsel %vm535_vm7, %v2900_v18, 0.0 }
 0x516   :  { %642 = vadd.xlane.f32.xlu1 %v641_v52  ;;  %639 = vadd.xlane.f32.xlu2 %v638_v19 }
 0x51e   :  { %v610_v22 = vpop.xlane.xlu0 %609 }
 0x52e   :  { %2791 = vrot.lane.b32.xlu2 %v2790_v23, %s3040_s16 }
 0x52f   :  { %2786 = vrot.lane.b32.xlu1 %v2785_v0, %s3040_s16 }
 0x531   :  { %v2782_v24 = vpop.permute.xlu0 %2781 }
 0x532   :  { %v2783_v26 = vunpack.i.l.bf16 %v2782_v24  ;;  %v2784_v32 = vunpack.i.h.bf16 %v2782_v24 }
 0x534   :  { %699 = vmatpush.msra.mxu0 %v2783_v26 }
 0x536   :  { %700 = vmatpush.msra.mxu0 %v2784_v32  ;;  %v619_v61 = vpop.xlane.xlu2 %618 }
 0x537   :  { %2901 = vrcp.f32 %v619_v61 }
 0x53d   :  { %v2902_v35 = vpop.eup %2901 }
 0x53e   :  { %v659_v37 = vmul.f32 %v2902_v35, %v3410_v27  ;;  %v622_v29 = vpop.xlane.xlu2 %621 }
 0x53f   :  { %2903 = vrcp.f32 %v622_v29 }
 0x540   :  { %2660 = vmatmul.msk.f32.vlgmr.msra.gmra.mxu1 %vm535_vm7, %v659_v37 }
 0x545   :  { %v2904_v46 = vpop.eup %2903 }
 0x546   :  { %v625_v53 = vpop.xlane.xlu2 %624  ;;  %v660_v54 = vmul.f32 %v2904_v46, %v3415_v39 }
 0x547   :  { %2905 = vrcp.f32 %v625_v53 }
 0x548   :  { %2661 = vmatmul.msk.f32.gmra.mxu1 %vm535_vm7, %v660_v54  ;;  %2907 = vpow2.f32 %v600_v40 }
 0x549   :  { %2909 = vpow2.f32 %v598_v48 }
 0x54d   :  { %v2906_v41 = vpop.eup %2905 }
 0x54e   :  { %v661_v27 = vmul.f32 %v2906_v41, %v3419_v30  ;;  %v3453_v43 = vpop.eup %2907  ;;  %v613_v30 = vpop.xlane.xlu1 %612 }
 0x54f   :  { %v2910_v60 = vpop.eup %2909  ;;  %v632_v39 = vsel %vm535_vm7, %v3453_v43, 0.0 }
 0x550   :  { %2662 = vmatmul.msk.f32.gmra.mxu1 %vm535_vm7, %v661_v27  ;;  %v629_v36 = vsel %vm535_vm7, %v2910_v60, 0.0 }
 0x557   :  { %633 = vadd.xlane.f32.xlu2 %v632_v39 }
 0x559   :  { %630 = vadd.xlane.f32.xlu1 %v629_v36 }
 0x55c   :  { %v616_v13 = vpop.xlane.xlu0 %615 }
 0x579   :  { %v637_v44 = vpop.xlane.xlu2 %636 }
 0x57a   :  { %2911 = vrcp.f32 %v637_v44 }
 0x580   :  { %v2912_v45 = vpop.eup %2911 }
 0x581   :  { %v665_v7 = vmul.f32 %v2912_v45, %v2894_v33  ;;  %v628_v49 = vpop.xlane.xlu2 %627 }
 0x583   :  { %2666 = vmatmul.msk.f32.vlgmr.msra.gmra.mxu3 %vm535_vm7, %v665_v7 }
 0x589   :  { %v640_v50 = vpop.xlane.xlu2 %639  ;;  %v643_v55 = vpop.xlane.xlu1 %642 }
 0x58a   :  { %2913 = vrcp.f32 %v640_v50 }
 0x58b   :  { %2915 = vrcp.f32 %v643_v55 }
 0x58c   :  { %2917 = vrcp.f32 %v610_v22 }
 0x58d   :  { %2919 = vrcp.f32 %v628_v49 }
 0x58e   :  { %2921 = vrcp.f32 %v613_v30 }
 0x58f   :  { %2923 = vrcp.f32 %v616_v13 }
 0x590   :  { %v2914_v59 = vpop.eup %2913 }
 0x591   :  { %v666_v62 = vmul.f32 %v2914_v59, %v2898_v16  ;;  %v2916_v63 = vpop.eup %2915  ;;  %v2792_v3 = vpop.permute.xlu2 %2791 }
 0x592   :  { %v667_v1 = vmul.f32 %v2916_v63, %v2900_v18  ;;  %v2918_v51 = vpop.eup %2917  ;;  %v2793_v10 = vunpack.i.l.bf16 %v2792_v3  ;;  %v2794_v11 = vunpack.i.h.bf16 %v2792_v3 }
 0x593   :  { %2667 = vmatmul.msk.f32.gmra.mxu3 %vm535_vm7, %v666_v62  ;;  %v656_v33 = vmul.f32 %v2918_v51, %v3399_v8  ;;  %v2920_v9 = vpop.eup %2919 }
 0x594   :  { %v662_v57 = vmul.f32 %v2920_v9, %v3432_v56  ;;  %v2922_v20 = vpop.eup %2921  ;;  %v2859_v9 = vld [vmem:[%s4347_s1 + $0x13] ss:$0 sm:$0xff] }
 0x595   :  { %v657_v15 = vmul.f32 %v2922_v20, %v3403_v12  ;;  %v2924_v8 = vpop.eup %2923 }
 0x596   :  { %v658_v16 = vmul.f32 %v2924_v8, %v3424_v58  ;;  %v3037_v8 = vld [vmem:[%s4347_s1] sm:$0xff] }
 0x59b   :  { %2668 = vmatmul.msk.f32.gmra.mxu3 %vm535_vm7, %v667_v1 }
 0x5a1   :  { %v2787_v4 = vpop.permute.xlu1 %2786 }
 0x5a2   :  { %v2789_v5 = vunpack.i.h.bf16 %v2787_v4  ;;  %v2788_v6 = vunpack.i.l.bf16 %v2787_v4 }
 0x5a4   :  { %701 = vmatpush.msra.mxu0 %v2788_v6  ;;  %787 = vmatpush.msra.mxu2 %v2789_v5 }
 0x5a5   :  { %2657 = vmatmul.msk.f32.vlgmr.msra.gmra.mxu0 %vm535_vm7, %v656_v33 }
 0x5a6   :  { %788 = vmatpush.msra.mxu2 %v2793_v10 }
 0x5a8   :  { %789 = vmatpush.msra.mxu2 %v2794_v11 }
 0x5a9   :  { %2663 = vmatmul.msk.f32.vlgmr.msra.gmra.mxu2 %vm535_vm7, %v662_v57 }
 0x5ad   :  { %2658 = vmatmul.msk.f32.gmra.mxu0 %vm535_vm7, %v657_v15  ;;  %v2858_v15 = vld [vmem:[%s4347_s1 + $0x12] ss:$0 sm:$0xff] }
 0x5b5   :  { %2659 = vmatmul.msk.f32.gmra.mxu0 %vm535_vm7, %v658_v16  ;;  %v3038_v16 = vld [vmem:[%s4347_s1 + $0x8] sm:$0xff] }
 0x5bd   :  { %v747_v18 = vpop.f32.mrf.mxu1 }
 0x5be   :  { %847 = vrot.lane.b32.xlu0 %v747_v18, %s3044_s12  ;;  %v2795_v18 = vpack.i.bf16 %v3037_v8, %v3038_v16 }
 0x5c5   :  { %v750_v52 = vpop.f32.mrf.mxu1 }
 0x5c6   :  { %849 = vrot.lane.b32.xlu0 %v750_v52, %s3044_s12 }
 0x5ca   :  { %v634_v12 = vpop.xlane.xlu2 %633 }
 0x5cc   :  { %v631_v56 = vpop.xlane.xlu1 %630 }
 0x5cd   :  { %2925 = vrcp.f32 %v631_v56  ;;  %v753_v19 = vpop.f32.mrf.mxu1 }
 0x5ce   :  { %851 = vrot.lane.b32.xlu1 %v753_v19, %s3044_s12  ;;  %2927 = vrcp.f32 %v634_v12 }
 0x5d3   :  { %v2926_v22 = vpop.eup %2925 }
 0x5d4   :  { %v663_v23 = vmul.f32 %v2926_v22, %v2910_v60  ;;  %v2928_v58 = vpop.eup %2927 }
 0x5d5   :  { %v664_v0 = vmul.f32 %v2928_v58, %v3453_v43 }
 0x5d6   :  { %2664 = vmatmul.msk.f32.gmra.mxu2 %vm535_vm7, %v663_v23 }
 0x5de   :  { %2665 = vmatmul.msk.f32.gmra.mxu2 %vm535_vm7, %v664_v0 }
 0x606   :  { %v835_v24 = vpop.f32.mrf.mxu3 }
 0x607   :  { %862 = vrot.lane.b32.xlu0 %v835_v24, %s3044_s12 }
 0x616   :  { %v838_v26 = vpop.f32.mrf.mxu3 }
 0x617   :  { %864 = vrot.lane.b32.xlu2 %v838_v26, %s3044_s12 }
 0x61e   :  { %v841_v32 = vpop.f32.mrf.mxu3 }
 0x61f   :  { %866 = vrot.lane.b32.xlu2 %v841_v32, %s3044_s12 }
 0x622   :  { %v703_v61 = vpop.f32.mrf.mxu0 }
 0x62a   :  { %v706_v47 = vpop.f32.mrf.mxu0 }
 0x62c   :  { %v791_v60 = vpop.f32.mrf.mxu2 }
 0x630   :  { %v848_v35 = vpop.permute.xlu0 %847 }
 0x631   :  { %v856_v37 = vsel %vm352_vm5, %v703_v61, %v848_v35 }
 0x632   :  { %v3480_v29 = vadd.f32 %v856_v37, %v3104_v17  ;;  %v709_v48 = vpop.f32.mrf.mxu0 }
 0x634   :  { %v880_v46 = vsel %vm42_vm0, %v3480_v29, 0.0 }
 0x635   :  { %881 = vadd.xlane.f32.xlu0 %v880_v46 }
 0x638   :  { %v850_v53 = vpop.permute.xlu0 %849 }
 0x639   :  { %v857_v54 = vsel %vm352_vm5, %v706_v47, %v850_v53 }
 0x63a   :  { %v3486_v38 = vadd.f32 %v857_v54, %v3108_v21 }
 0x63c   :  { %v883_v40 = vsel %vm42_vm0, %v3486_v38, 0.0 }
 0x63d   :  { %884 = vadd.xlane.f32.xlu1 %v883_v40 }
 0x640   :  { %v852_v41 = vpop.permute.xlu1 %851 }
 0x641   :  { %v858_v17 = vsel %vm352_vm5, %v709_v48, %v852_v41 }
 0x642   :  { %v3492_v27 = vadd.f32 %v858_v17, %v3112_v25 }
 0x644   :  { %v886_v43 = vsel %vm42_vm0, %v3492_v27, 0.0 }
 0x648   :  { %887 = vadd.xlane.f32.xlu2 %v886_v43 }
 0x659   :  { %v794_v44 = vpop.f32.mrf.mxu2 }
 0x660   :  { %1025 = vrot.lane.b32.xlu2 %v2859_v9, %s3039_s13 }
 0x661   :  { %v797_v50 = vpop.f32.mrf.mxu2 }
 0x671   :  { %v865_v39 = vpop.permute.xlu2 %864 }
 0x672   :  { %v872_v49 = vsel %vm352_vm5, %v794_v44, %v865_v39 }
 0x673   :  { %v3504_v25 = vadd.f32 %v872_v49, %v3120_v31 }
 0x675   :  { %v892_v55 = vsel %vm42_vm0, %v3504_v25, 0.0 }
 0x679   :  { %v863_v36 = vpop.permute.xlu0 %862  ;;  %v867_v30 = vpop.permute.xlu2 %866 }
 0x67a   :  { %v871_v21 = vsel %vm352_vm5, %v791_v60, %v863_v36  ;;  %v873_v59 = vsel %vm352_vm5, %v797_v50, %v867_v30 }
 0x67b   :  { %v3498_v45 = vadd.f32 %v871_v21, %v3116_v28  ;;  %v3510_v28 = vadd.f32 %v873_v59, %v3124_v34 }
 0x67d   :  { %v889_v7 = vsel %vm42_vm0, %v3498_v45, 0.0  ;;  %v895_v62 = vsel %vm42_vm0, %v3510_v28, 0.0 }
 0x67e   :  { %890 = vadd.xlane.f32.xlu0 %v889_v7 }
 0x686   :  { %893 = vadd.xlane.f32.xlu0 %v892_v55 }
 0x68e   :  { %896 = vadd.xlane.f32.xlu0 %v895_v62 }
 0x6a8   :  { %v882_v63 = vpop.xlane.xlu0 %881 }
 0x6a9   :  { %v898_v1 = vmul.f32 %v882_v63, %v3128_v42 }
 0x6ab   :  { %v3516_v31 = vsub.f32 %v3480_v29, %v898_v1 }
 0x6ad   :  { %v910_v51 = vmul.f32 %v3516_v31, %v3516_v31 }
 0x6af   :  { %v916_v3 = vsel %vm42_vm0, %v910_v51, 0.0 }
 0x6b0   :  { %v885_v4 = vpop.xlane.xlu1 %884  ;;  %917 = vadd.xlane.f32.xlu1 %v916_v3 }
 0x6b1   :  { %v899_v34 = vmul.f32 %v885_v4, %v3128_v42 }
 0x6b3   :  { %v3523_v5 = vsub.f32 %v3486_v38, %v899_v34 }
 0x6b5   :  { %v911_v6 = vmul.f32 %v3523_v5, %v3523_v5 }
 0x6b7   :  { %v919_v33 = vsel %vm42_vm0, %v911_v6, 0.0 }
 0x6b8   :  { %920 = vadd.xlane.f32.xlu1 %v919_v33 }
 0x6bb   :  { %v888_v10 = vpop.xlane.xlu2 %887 }
 0x6bc   :  { %v900_v11 = vmul.f32 %v888_v10, %v3128_v42 }
 0x6be   :  { %v3534_v13 = vsub.f32 %v3492_v27, %v900_v11 }
 0x6c0   :  { %v912_v57 = vmul.f32 %v3534_v13, %v3534_v13 }
 0x6c2   :  { %v922_v20 = vsel %vm42_vm0, %v912_v57, 0.0 }
 0x6c3   :  { %923 = vadd.xlane.f32.xlu0 %v922_v20  ;;  %v3580_v57 = vpop.permute.xlu2 %1025 }
 0x6d1   :  { %1014 = vrot.lane.b32.xlu1 %v2858_v15, %s3039_s13 }
 0x6d7   :  { %2796 = vrot.lane.b32.xlu0 %v2795_v18, %s3045_s23 }
 0x6f1   :  { %v891_v52 = vpop.xlane.xlu0 %890 }
 0x6f2   :  { %v901_v56 = vmul.f32 %v891_v52, %v3128_v42 }
 0x6f4   :  { %v3552_v19 = vsub.f32 %v3498_v45, %v901_v56 }
 0x6f6   :  { %v913_v58 = vmul.f32 %v3552_v19, %v3552_v19 }
 0x6f8   :  { %v925_v32 = vsel %vm42_vm0, %v913_v58, 0.0 }
 0x6f9   :  { %v894_v12 = vpop.xlane.xlu0 %893 }
 0x6fa   :  { %v902_v22 = vmul.f32 %v894_v12, %v3128_v42 }
 0x6fc   :  { %v3556_v23 = vsub.f32 %v3504_v25, %v902_v22 }
 0x6fe   :  { %v914_v0 = vmul.f32 %v3556_v23, %v3556_v23 }
 0x700   :  { %v928_v24 = vsel %vm42_vm0, %v914_v0, 0.0 }
 0x701   :  { %929 = vadd.xlane.f32.xlu1 %v928_v24  ;;  %v897_v26 = vpop.xlane.xlu0 %896  ;;  %926 = vadd.xlane.f32.xlu0 %v925_v32 }
 0x702   :  { %v903_v61 = vmul.f32 %v897_v26, %v3128_v42 }
 0x704   :  { %v3566_v35 = vsub.f32 %v3510_v28, %v903_v61 }
 0x706   :  { %v915_v37 = vmul.f32 %v3566_v35, %v3566_v35 }
 0x708   :  { %v931_v46 = vsel %vm42_vm0, %v915_v37, 0.0 }
 0x709   :  { %932 = vadd.xlane.f32.xlu2 %v931_v46 }
 0x715   :  { %1041 = vrot.lane.b32.xlu0 %v3217_v2, %s3045_s23 }
 0x723   :  { %v918_v47 = vpop.xlane.xlu1 %917 }
 0x724   :  { %v934_v53 = vmul.f32 %v918_v47, %v3128_v42 }
 0x726   :  { %v940_v54 = vadd.f32 1e-05, %v934_v53 }
 0x728   :  { %2929 = vrsqrt.f32 %v940_v54  ;;  %vm952_vm9 = vweird.f32 %v940_v54 }
 0x72b   :  { %v921_v40 = vpop.xlane.xlu1 %920 }
 0x72c   :  { %v935_v48 = vmul.f32 %v921_v40, %v3128_v42 }
 0x72e   :  { %v2930_v41 = vpop.eup %2929  ;;  %v941_v17 = vadd.f32 1e-05, %v935_v48 }
 0x72f   :  { %v947_v43 = vmul.f32 %v2930_v41, %v940_v54  ;;  %vm953_vm8 = vweird.f32 %v2930_v41 }
 0x730   :  { %2931 = vrsqrt.f32 %v941_v17  ;;  %vm954_vm10 = vmor %vm952_vm9, %vm953_vm8  ;;  %vm962_vm12 = vweird.f32 %v941_v17 }
 0x731   :  { %v948_v60 = vmul.f32 %v2930_v41, %v947_v43 }
 0x733   :  { %v949_v7 = vmul.f32 0.5, %v948_v60 }
 0x735   :  { %v950_v30 = vsub.f32 1.5, %v949_v7 }
 0x736   :  { %v2932_v39 = vpop.eup %2931  ;;  %v924_v21 = vpop.xlane.xlu0 %923 }
 0x737   :  { %v957_v36 = vmul.f32 %v2932_v39, %v941_v17  ;;  %v936_v44 = vmul.f32 %v924_v21, %v3128_v42  ;;  %v951_v55 = vmul.f32 %v2930_v41, %v950_v30  ;;  %vm963_vm11 = vweird.f32 %v2932_v39 }
 0x738   :  { %vm964_vm13 = vmor %vm962_vm12, %vm963_vm11 }
 0x739   :  { %v942_v2 = vadd.f32 1e-05, %v936_v44  ;;  %v958_v49 = vmul.f32 %v2932_v39, %v957_v36  ;;  %v955_v1 = vsel %vm954_vm10, %v2930_v41, %v951_v55 }
 0x73a   :  { %v1006_v6 = vmul.f32 %v955_v1, %v3516_v31 }
 0x73b   :  { %2933 = vrsqrt.f32 %v942_v2  ;;  %v959_v50 = vmul.f32 0.5, %v958_v49  ;;  %vm972_vm15 = vweird.f32 %v942_v2 }
 0x73d   :  { %v960_v62 = vsub.f32 1.5, %v959_v50 }
 0x73f   :  { %v961_v3 = vmul.f32 %v2932_v39, %v960_v62 }
 0x741   :  { %v2934_v59 = vpop.eup %2933  ;;  %v965_v10 = vsel %vm964_vm13, %v2932_v39, %v961_v3 }
 0x742   :  { %v967_v63 = vmul.f32 %v2934_v59, %v942_v2  ;;  %v1007_v16 = vmul.f32 %v965_v10, %v3523_v5  ;;  %vm973_vm14 = vweird.f32 %v2934_v59  ;;  %v105_v10 = vld [vmem:[%s4347_s1 + $0x50] sm:$0xff] }
 0x743   :  { %v3576_v34 = vpop.permute.xlu1 %1014  ;;  %vm974_vm1 = vmor %vm972_vm15, %vm973_vm14  ;;  %vm1282_vm14 = vcmask 523264  }
 0x744   :  { %v968_v51 = vmul.f32 %v2934_v59, %v967_v63  ;;  %v1017_v33 = vmul.f32 %v3576_v34, %v1006_v6  ;;  %v1018_v31 = vmul.f32 %v3576_v34, %v1007_v16  ;;  %v101_v16 = vld [vmem:[%s4347_s1 + $0x30] sm:$0xff] }
 0x746   :  { %v969_v4 = vmul.f32 0.5, %v968_v51  ;;  %v1028_v8 = vadd.f32 %v3580_v57, %v1017_v33  ;;  %v1029_v56 = vadd.f32 %v3580_v57, %v1018_v31  ;;  %v100_v31 = vld [vmem:[%s4347_s1 + $0x28] sm:$0xff] }
 0x748   :  { %v970_v11 = vsub.f32 1.5, %v969_v4 }
 0x749   :  { %v2797_v9 = vpop.permute.xlu0 %2796 }
 0x74a   :  { %v2798_v20 = vunpack.i.l.bf16 %v2797_v9  ;;  %v2799_v15 = vunpack.i.h.bf16 %v2797_v9  ;;  %v971_v18 = vmul.f32 %v2934_v59, %v970_v11 }
 0x74c   :  { %1076 = vmatpush.msrb.mxu0 %v2798_v20  ;;  %v975_v52 = vsel %vm974_vm1, %v2934_v59, %v971_v18 }
 0x74d   :  { %v1008_v12 = vmul.f32 %v975_v52, %v3534_v13 }
 0x74e   :  { %1077 = vmatpush.msrb.mxu0 %v2799_v15  ;;  %v102_v15 = vld [vmem:[%s4347_s1 + $0x38] sm:$0xff] }
 0x74f   :  { %2669 = vmatmul.msk.f32.vlgmr.msrb.gmra.mxu0 %vm42_vm0, %v1028_v8  ;;  %v1019_v22 = vmul.f32 %v3576_v34, %v1008_v12  ;;  %v99_v12 = vld [vmem:[%s4347_s1 + $0x20] sm:$0xff] }
 0x751   :  { %v1030_v5 = vadd.f32 %v3580_v57, %v1019_v22 }
 0x757   :  { %2670 = vmatmul.msk.f32.gmra.mxu0 %vm42_vm0, %v1029_v56 }
 0x75f   :  { %2671 = vmatmul.msk.f32.gmra.mxu0 %vm42_vm0, %v1030_v5 }
 0x774   :  { %v930_v58 = vpop.xlane.xlu1 %929  ;;  %v927_v24 = vpop.xlane.xlu0 %926 }
 0x775   :  { %v938_v0 = vmul.f32 %v930_v58, %v3128_v42  ;;  %v937_v26 = vmul.f32 %v927_v24, %v3128_v42 }
 0x777   :  { %v944_v32 = vadd.f32 1e-05, %v938_v0  ;;  %v943_v61 = vadd.f32 1e-05, %v937_v26 }
 0x779   :  { %2935 = vrsqrt.f32 %v944_v32  ;;  %vm982_vm4 = vweird.f32 %v943_v61  ;;  %vm992_vm9 = vweird.f32 %v944_v32 }
 0x77a   :  { %2937 = vrsqrt.f32 %v943_v61 }
 0x77c   :  { %v933_v37 = vpop.xlane.xlu2 %932 }
 0x77d   :  { %v939_v13 = vmul.f32 %v933_v37, %v3128_v42 }
 0x77f   :  { %v2936_v46 = vpop.eup %2935  ;;  %v945_v47 = vadd.f32 1e-05, %v939_v13 }
 0x780   :  { %v2938_v53 = vpop.eup %2937  ;;  %v987_v54 = vmul.f32 %v2936_v46, %v944_v32  ;;  %vm993_vm3 = vweird.f32 %v2936_v46 }
 0x781   :  { %v977_v40 = vmul.f32 %v2938_v53, %v943_v61  ;;  %2939 = vrsqrt.f32 %v945_v47  ;;  %vm983_vm2 = vweird.f32 %v2938_v53  ;;  %vm994_vm10 = vmor %vm992_vm9, %vm993_vm3  ;;  %vm1002_vm12 = vweird.f32 %v945_v47 }
 0x782   :  { %v988_v48 = vmul.f32 %v2936_v46, %v987_v54  ;;  %vm984_vm8 = vmor %vm982_vm4, %vm983_vm2 }
 0x783   :  { %v978_v41 = vmul.f32 %v2938_v53, %v977_v40 }
 0x784   :  { %v989_v17 = vmul.f32 0.5, %v988_v48 }
 0x785   :  { %v979_v43 = vmul.f32 0.5, %v978_v41 }
 0x786   :  { %v990_v60 = vsub.f32 1.5, %v989_v17 }
 0x787   :  { %v2940_v39 = vpop.eup %2939  ;;  %v980_v36 = vsub.f32 1.5, %v979_v43  ;;  %v3613_v11 = vpop.permute.xlu0 %1041  ;;  %v2860_v43 = vld [vmem:[%s4347_s1 + $0x14] ss:$0 sm:$0xff] }
 0x788   :  { %v997_v21 = vmul.f32 %v2940_v39, %v945_v47  ;;  %v991_v44 = vmul.f32 %v2936_v46, %v990_v60  ;;  %vm1003_vm11 = vweird.f32 %v2940_v39  ;;  %1279 = vrot.lane.b32.xlu1 %v2860_v43, %s3039_s13 }
 0x789   :  { %v981_v7 = vmul.f32 %v2938_v53, %v980_v36  ;;  %vm1004_vm13 = vmor %vm1002_vm12, %vm1003_vm11 }
 0x78a   :  { %v998_v2 = vmul.f32 %v2940_v39, %v997_v21  ;;  %v995_v55 = vsel %vm994_vm10, %v2936_v46, %v991_v44 }
 0x78b   :  { %v985_v49 = vsel %vm984_vm8, %v2938_v53, %v981_v7  ;;  %v1010_v1 = vmul.f32 %v995_v55, %v3556_v23  ;;  %v106_v23 = vld [vmem:[%s4347_s1 + $0x58] sm:$0xff] }
 0x78c   :  { %v999_v30 = vmul.f32 0.5, %v998_v2  ;;  %v1009_v50 = vmul.f32 %v985_v49, %v3552_v19  ;;  %1309 = vmatpush.msrb.mxu1 %v106_v23 }
 0x78d   :  { %v1021_v3 = vmul.f32 %v3576_v34, %v1010_v1 }
 0x78e   :  { %v1000_v59 = vsub.f32 1.5, %v999_v30  ;;  %v1020_v62 = vmul.f32 %v3576_v34, %v1009_v50  ;;  %1310 = vmatpush.msrb.mxu1 %v105_v10 }
 0x78f   :  { %v1032_v6 = vadd.f32 %v3580_v57, %v1021_v3 }
 0x790   :  { %v1031_v63 = vadd.f32 %v3580_v57, %v1020_v62  ;;  %v1001_v51 = vmul.f32 %v2940_v39, %v1000_v59 }
 0x792   :  { %2672 = vmatmul.msk.f32.gmra.mxu0 %vm42_vm0, %v1031_v63  ;;  %v1005_v4 = vsel %vm1004_vm13, %v2940_v39, %v1001_v51 }
 0x793   :  { %v1011_v19 = vmul.f32 %v1005_v4, %v3566_v35  ;;  %v104_v35 = vld [vmem:[%s4347_s1 + $0x48] sm:$0xff] }
 0x794   :  { %1311 = vmatpush.msrb.mxu1 %v104_v35 }
 0x795   :  { %v1022_v33 = vmul.f32 %v3576_v34, %v1011_v19 }
 0x797   :  { %v1033_v9 = vadd.f32 %v3580_v57, %v1022_v33  ;;  %v103_v57 = vld [vmem:[%s4347_s1 + $0x40] sm:$0xff] }
 0x798   :  { %1312 = vmatpush.msrb.mxu1 %v103_v57 }
 0x79a   :  { %2673 = vmatmul.msk.f32.gmra.mxu0 %vm42_vm0, %v1032_v6  ;;  %1313 = vmatpush.msrb.mxu1 %v102_v15 }
 0x79c   :  { %1314 = vmatpush.msrb.mxu1 %v101_v16 }
 0x79e   :  { %1315 = vmatpush.msrb.mxu1 %v100_v31 }
 0x7a0   :  { %1316 = vmatpush.msrb.mxu1 %v99_v12 }
 0x7a2   :  { %2674 = vmatmul.msk.f32.gmra.mxu0 %vm42_vm0, %v1033_v9 }
 0x7cc   :  { %v1079_v34 = vpop.f32.mrf.mxu0 }
 0x7cd   :  { %v3622_v20 = vadd.f32 %v1079_v34, %v3613_v11 }
 0x7cf   :  { %v1103_v8 = vmul.f32 0.70710677, %v3622_v20 }
 0x7d1   :  { %v2675_v18 = vclamps-f32 %v1103_v8, 4.0 }
 0x7d3   :  { %v1121_v52 = vmul.f32 %v2675_v18, %v2675_v18 }
 0x7d4   :  { %v1082_v56 = vpop.f32.mrf.mxu0 }
 0x7d5   :  { %v1127_v22 = vmul.f32 -2.7261424e-10, %v1121_v52  ;;  %v1205_v5 = vmul.f32 -1.45660715e-05, %v1121_v52  ;;  %v3638_v58 = vadd.f32 %v1082_v56, %v3613_v11 }
 0x7d7   :  { %v1133_v0 = vadd.f32 2.7706815e-08, %v1127_v22  ;;  %v1211_v24 = vadd.f32 -0.00021337405, %v1205_v5  ;;  %v1104_v26 = vmul.f32 0.70710677, %v3638_v58 }
 0x7d9   :  { %v1139_v32 = vmul.f32 %v1133_v0, %v1121_v52  ;;  %v1217_v61 = vmul.f32 %v1211_v24, %v1121_v52  ;;  %v3641_v37 = vclamps-f32 %v1104_v26, 4.0 }
 0x7db   :  { %v1145_v13 = vadd.f32 -2.101024e-06, %v1139_v32  ;;  %v1223_v46 = vadd.f32 -0.001682827, %v1217_v61  ;;  %v1122_v47 = vmul.f32 %v3641_v37, %v3641_v37 }
 0x7dc   :  { %v1085_v53 = vpop.f32.mrf.mxu0 }
 0x7dd   :  { %v1151_v54 = vmul.f32 %v1145_v13, %v1121_v52  ;;  %v1229_v40 = vmul.f32 %v1223_v46, %v1121_v52  ;;  %v3646_v48 = vadd.f32 %v1085_v53, %v3613_v11  ;;  %v1128_v41 = vmul.f32 -2.7261424e-10, %v1122_v47 }
 0x7de   :  { %v1206_v17 = vmul.f32 -1.45660715e-05, %v1122_v47 }
 0x7df   :  { %v1157_v60 = vadd.f32 -5.6925062e-05, %v1151_v54  ;;  %v1235_v39 = vadd.f32 -0.0073733293, %v1229_v40  ;;  %v1134_v36 = vadd.f32 2.7706815e-08, %v1128_v41 }
 0x7e0   :  { %v1105_v21 = vmul.f32 0.70710677, %v3646_v48  ;;  %v1212_v44 = vadd.f32 -0.00021337405, %v1206_v17 }
 0x7e1   :  { %v1163_v7 = vmul.f32 %v1157_v60, %v1121_v52  ;;  %v1241_v2 = vmul.f32 %v1235_v39, %v1121_v52  ;;  %v1140_v49 = vmul.f32 %v1134_v36, %v1122_v47 }
 0x7e2   :  { %v2677_v30 = vclamps-f32 %v1105_v21, 4.0  ;;  %v1218_v50 = vmul.f32 %v1212_v44, %v1122_v47 }
 0x7e3   :  { %v1169_v55 = vadd.f32 -0.00073499064, %v1163_v7  ;;  %v1247_v59 = vadd.f32 -0.014264739, %v1241_v2  ;;  %v1146_v62 = vadd.f32 -2.101024e-06, %v1140_v49 }
 0x7e4   :  { %v1123_v63 = vmul.f32 %v2677_v30, %v2677_v30  ;;  %v1224_v1 = vadd.f32 -0.001682827, %v1218_v50 }
 0x7e5   :  { %v1175_v51 = vmul.f32 %v1169_v55, %v1121_v52  ;;  %v1152_v3 = vmul.f32 %v1146_v62, %v1122_v47  ;;  %2941 = vrcp.f32 %v1247_v59 }
 0x7e6   :  { %v1129_v4 = vmul.f32 -2.7261424e-10, %v1123_v63  ;;  %v1230_v6 = vmul.f32 %v1224_v1, %v1122_v47  ;;  %v1207_v19 = vmul.f32 -1.45660715e-05, %v1123_v63 }
 0x7e7   :  { %v1181_v33 = vadd.f32 -0.0029546, %v1175_v51  ;;  %v1158_v9 = vadd.f32 -5.6925062e-05, %v1152_v3  ;;  %v1099_v3 = vmul.f32 0.5, %v3646_v48 }
 0x7e8   :  { %v1135_v23 = vadd.f32 2.7706815e-08, %v1129_v4  ;;  %v1236_v10 = vadd.f32 -0.0073733293, %v1230_v6  ;;  %v1213_v34 = vadd.f32 -0.00021337405, %v1207_v19 }
 0x7e9   :  { %v1187_v35 = vmul.f32 %v1181_v33, %v1121_v52  ;;  %v1164_v57 = vmul.f32 %v1158_v9, %v1122_v47  ;;  %v1097_v52 = vmul.f32 0.5, %v3622_v20  ;;  %v1098_v20 = vmul.f32 0.5, %v3638_v58 }
 0x7ea   :  { %v1141_v15 = vmul.f32 %v1135_v23, %v1123_v63  ;;  %v1242_v8 = vmul.f32 %v1236_v10, %v1122_v47  ;;  %v1219_v31 = vmul.f32 %v1213_v34, %v1123_v63 }
 0x7eb   :  { %v1193_v16 = vadd.f32 -0.016096033, %v1187_v35  ;;  %v1170_v56 = vadd.f32 -0.00073499064, %v1164_v57  ;;  %v2942_v24 = vpop.eup %2941 }
 0x7ec   :  { %v1147_v12 = vadd.f32 -2.101024e-06, %v1141_v15  ;;  %v1248_v5 = vadd.f32 -0.014264739, %v1242_v8  ;;  %v1225_v0 = vadd.f32 -0.001682827, %v1219_v31 }
 0x7ed   :  { %v1199_v22 = vmul.f32 %v2675_v18, %v1193_v16  ;;  %v1176_v26 = vmul.f32 %v1170_v56, %v1122_v47 }
 0x7ee   :  { %v1153_v32 = vmul.f32 %v1147_v12, %v1123_v63  ;;  %v1231_v13 = vmul.f32 %v1225_v0, %v1123_v63  ;;  %2943 = vrcp.f32 %v1248_v5 }
 0x7ef   :  { %v1259_v61 = vmul.f32 %v2942_v24, %v1199_v22  ;;  %v1182_v46 = vadd.f32 -0.0029546, %v1176_v26 }
 0x7f0   :  { %v1159_v53 = vadd.f32 -5.6925062e-05, %v1153_v32  ;;  %v1237_v40 = vadd.f32 -0.0073733293, %v1231_v13 }
 0x7f1   :  { %v1265_v54 = vadd.f32 1.0, %v1259_v61  ;;  %v1188_v41 = vmul.f32 %v1182_v46, %v1122_v47 }
 0x7f2   :  { %v1165_v17 = vmul.f32 %v1159_v53, %v1123_v63  ;;  %v1243_v60 = vmul.f32 %v1237_v40, %v1123_v63 }
 0x7f3   :  { %v1271_v43 = vmul.f32 %v1265_v54, %v1097_v52  ;;  %v1194_v18 = vadd.f32 -0.016096033, %v1188_v41 }
 0x7f4   :  { %v1171_v39 = vadd.f32 -0.00073499064, %v1165_v17  ;;  %v1249_v36 = vadd.f32 -0.014264739, %v1243_v60  ;;  %v2944_v7 = vpop.eup %2943 }
 0x7f5   :  { %2681 = vmatmul.msk.f32.vlgmr.msrb.gmra.mxu1 %vm1282_vm14, %v1271_v43  ;;  %v1200_v21 = vmul.f32 %v3641_v37, %v1194_v18 }
 0x7f6   :  { %v1177_v44 = vmul.f32 %v1171_v39, %v1123_v63  ;;  %2945 = vrcp.f32 %v1249_v36 }
 0x7f7   :  { %v1260_v49 = vmul.f32 %v2944_v7, %v1200_v21 }
 0x7f8   :  { %v1183_v2 = vadd.f32 -0.0029546, %v1177_v44 }
 0x7f9   :  { %v1266_v47 = vadd.f32 1.0, %v1260_v49 }
 0x7fa   :  { %v1189_v50 = vmul.f32 %v1183_v2, %v1123_v63 }
 0x7fb   :  { %v1272_v59 = vmul.f32 %v1266_v47, %v1098_v20 }
 0x7fc   :  { %v1195_v55 = vadd.f32 -0.016096033, %v1189_v50  ;;  %v2946_v1 = vpop.eup %2945 }
 0x7fd   :  { %2682 = vmatmul.msk.f32.gmra.mxu1 %vm1282_vm14, %v1272_v59 }
 0x7fe   :  { %v1201_v62 = vmul.f32 %v2677_v30, %v1195_v55 }
 0x800   :  { %v1261_v51 = vmul.f32 %v2946_v1, %v1201_v62 }
 0x802   :  { %v1267_v4 = vadd.f32 1.0, %v1261_v51 }
 0x804   :  { %v1273_v37 = vmul.f32 %v1267_v4, %v1099_v3 }
 0x806   :  { %2683 = vmatmul.msk.f32.gmra.mxu1 %vm1282_vm14, %v1273_v37 }
 0x80f   :  { %v1088_v6 = vpop.f32.mrf.mxu0 }
 0x810   :  { %v3661_v19 = vadd.f32 %v1088_v6, %v3613_v11 }
 0x812   :  { %v1106_v58 = vmul.f32 0.70710677, %v3661_v19 }
 0x814   :  { %v2678_v63 = vclamps-f32 %v1106_v58, 4.0 }
 0x816   :  { %v1124_v33 = vmul.f32 %v2678_v63, %v2678_v63 }
 0x817   :  { %v1091_v9 = vpop.f32.mrf.mxu0 }
 0x818   :  { %v1130_v30 = vmul.f32 -2.7261424e-10, %v1124_v33  ;;  %v3665_v23 = vadd.f32 %v1091_v9, %v3613_v11  ;;  %v1208_v10 = vmul.f32 -1.45660715e-05, %v1124_v33 }
 0x81a   :  { %v1136_v35 = vadd.f32 2.7706815e-08, %v1130_v30  ;;  %v1107_v48 = vmul.f32 0.70710677, %v3665_v23  ;;  %v1214_v34 = vadd.f32 -0.00021337405, %v1208_v10 }
 0x81c   :  { %v1142_v57 = vmul.f32 %v1136_v35, %v1124_v33  ;;  %v3668_v15 = vclamps-f32 %v1107_v48, 4.0  ;;  %v1220_v8 = vmul.f32 %v1214_v34, %v1124_v33 }
 0x81e   :  { %v1148_v16 = vadd.f32 -2.101024e-06, %v1142_v57  ;;  %v1125_v31 = vmul.f32 %v3668_v15, %v3668_v15  ;;  %v1226_v12 = vadd.f32 -0.001682827, %v1220_v8 }
 0x81f   :  { %v1094_v56 = vpop.f32.mrf.mxu0 }
 0x820   :  { %v1154_v22 = vmul.f32 %v1148_v16, %v1124_v33  ;;  %v1131_v5 = vmul.f32 -2.7261424e-10, %v1125_v31  ;;  %v3673_v0 = vadd.f32 %v1094_v56, %v3613_v11  ;;  %v1209_v24 = vmul.f32 -1.45660715e-05, %v1125_v31 }
 0x821   :  { %v1232_v26 = vmul.f32 %v1226_v12, %v1124_v33 }
 0x822   :  { %v1160_v32 = vadd.f32 -5.6925062e-05, %v1154_v22  ;;  %v1137_v61 = vadd.f32 2.7706815e-08, %v1131_v5  ;;  %v1108_v13 = vmul.f32 0.70710677, %v3673_v0 }
 0x823   :  { %v1238_v46 = vadd.f32 -0.0073733293, %v1232_v26  ;;  %v1215_v53 = vadd.f32 -0.00021337405, %v1209_v24 }
 0x824   :  { %v1166_v52 = vmul.f32 %v1160_v32, %v1124_v33  ;;  %v1143_v54 = vmul.f32 %v1137_v61, %v1125_v31  ;;  %v2680_v40 = vclamps-f32 %v1108_v13, 4.0 }
 0x825   :  { %v1244_v41 = vmul.f32 %v1238_v46, %v1124_v33  ;;  %v1221_v17 = vmul.f32 %v1215_v53, %v1125_v31 }
 0x826   :  { %v1172_v43 = vadd.f32 -0.00073499064, %v1166_v52  ;;  %v1149_v60 = vadd.f32 -2.101024e-06, %v1143_v54  ;;  %v1126_v18 = vmul.f32 %v2680_v40, %v2680_v40 }
 0x827   :  { %v1250_v39 = vadd.f32 -0.014264739, %v1244_v41  ;;  %v1227_v36 = vadd.f32 -0.001682827, %v1221_v17  ;;  %v1101_v41 = vmul.f32 0.5, %v3665_v23 }
 0x828   :  { %v1178_v11 = vmul.f32 %v1172_v43, %v1124_v33  ;;  %v1155_v21 = vmul.f32 %v1149_v60, %v1125_v31  ;;  %v1132_v44 = vmul.f32 -2.7261424e-10, %v1126_v18  ;;  %v1210_v2 = vmul.f32 -1.45660715e-05, %v1126_v18 }
 0x829   :  { %v1233_v7 = vmul.f32 %v1227_v36, %v1125_v31  ;;  %2947 = vrcp.f32 %v1250_v39 }
 0x82a   :  { %v1184_v49 = vadd.f32 -0.0029546, %v1178_v11  ;;  %v1161_v20 = vadd.f32 -5.6925062e-05, %v1155_v21  ;;  %v1138_v50 = vadd.f32 2.7706815e-08, %v1132_v44  ;;  %v1280_v44 = vpop.permute.xlu1 %1279 }
 0x82b   :  { %v1239_v47 = vadd.f32 -0.0073733293, %v1233_v7  ;;  %v1216_v55 = vadd.f32 -0.00021337405, %v1210_v2 }
 0x82c   :  { %v1190_v59 = vmul.f32 %v1184_v49, %v1124_v33  ;;  %v1167_v62 = vmul.f32 %v1161_v20, %v1125_v31  ;;  %v1144_v1 = vmul.f32 %v1138_v50, %v1126_v18  ;;  %v1100_v33 = vmul.f32 0.5, %v3661_v19 }
 0x82d   :  { %v1245_v51 = vmul.f32 %v1239_v47, %v1125_v31  ;;  %v1222_v3 = vmul.f32 %v1216_v55, %v1126_v18 }
 0x82e   :  { %v1196_v4 = vadd.f32 -0.016096033, %v1190_v59  ;;  %v1173_v37 = vadd.f32 -0.00073499064, %v1167_v62  ;;  %v1150_v6 = vadd.f32 -2.101024e-06, %v1144_v1 }
 0x82f   :  { %v1251_v58 = vadd.f32 -0.014264739, %v1245_v51  ;;  %v1228_v9 = vadd.f32 -0.001682827, %v1222_v3  ;;  %v2948_v35 = vpop.eup %2947 }
 0x830   :  { %v1202_v30 = vmul.f32 %v2678_v63, %v1196_v4  ;;  %v1179_v10 = vmul.f32 %v1173_v37, %v1125_v31  ;;  %v1156_v48 = vmul.f32 %v1150_v6, %v1126_v18 }
 0x831   :  { %v1234_v34 = vmul.f32 %v1228_v9, %v1126_v18  ;;  %2949 = vrcp.f32 %v1251_v58  ;;  %v2861_v9 = vld [vmem:[%s4347_s1 + $0x16] ss:$0 sm:$0xff] }
 0x832   :  { %v1185_v57 = vadd.f32 -0.0029546, %v1179_v10  ;;  %v1262_v8 = vmul.f32 %v2948_v35, %v1202_v30  ;;  %v1162_v16 = vadd.f32 -5.6925062e-05, %v1156_v48 }
 0x833   :  { %v1240_v56 = vadd.f32 -0.0073733293, %v1234_v34 }
 0x834   :  { %v1191_v12 = vmul.f32 %v1185_v57, %v1125_v31  ;;  %v1268_v22 = vadd.f32 1.0, %v1262_v8  ;;  %v1168_v5 = vmul.f32 %v1162_v16, %v1126_v18 }
 0x835   :  { %v1246_v24 = vmul.f32 %v1240_v56, %v1126_v18 }
 0x836   :  { %v1197_v26 = vadd.f32 -0.016096033, %v1191_v12  ;;  %v1274_v32 = vmul.f32 %v1268_v22, %v1100_v33  ;;  %v1174_v61 = vadd.f32 -0.00073499064, %v1168_v5 }
 0x837   :  { %v1252_v13 = vadd.f32 -0.014264739, %v1246_v24  ;;  %v2950_v46 = vpop.eup %2949  ;;  %v2862_v24 = vld [vmem:[%s4347_s1 + $0x15] ss:$0 sm:$0xff] }
 0x838   :  { %v1203_v63 = vmul.f32 %v3668_v15, %v1197_v26  ;;  %2684 = vmatmul.msk.f32.gmra.mxu1 %vm1282_vm14, %v1274_v32  ;;  %v1180_v53 = vmul.f32 %v1174_v61, %v1126_v18  ;;  %v1102_v15 = vmul.f32 0.5, %v3673_v0 }
 0x839   :  { %2951 = vrcp.f32 %v1252_v13 }
 0x83a   :  { %v1263_v52 = vmul.f32 %v2950_v46, %v1203_v63  ;;  %v1186_v54 = vadd.f32 -0.0029546, %v1180_v53 }
 0x83c   :  { %v1269_v17 = vadd.f32 1.0, %v1263_v52  ;;  %v1192_v19 = vmul.f32 %v1186_v54, %v1126_v18 }
 0x83e   :  { %v1275_v31 = vmul.f32 %v1269_v17, %v1101_v41  ;;  %v1198_v43 = vadd.f32 -0.016096033, %v1192_v19 }
 0x83f   :  { %v2952_v39 = vpop.eup %2951 }
 0x840   :  { %2685 = vmatmul.msk.f32.gmra.mxu1 %vm1282_vm14, %v1275_v31  ;;  %v1204_v60 = vmul.f32 %v2680_v40, %v1198_v43 }
 0x842   :  { %v1264_v36 = vmul.f32 %v2952_v39, %v1204_v60  ;;  %v3766_v39 = vld [vmem:[%s4347_s1 + $0x18] sm:$0xff] }
 0x843   :  { %1545 = vmatpush.msrb.mxu2 %v3766_v39 }
 0x844   :  { %v1270_v11 = vadd.f32 1.0, %v1264_v36  ;;  %v3772_v36 = vld [vmem:[%s4347_s1 + $0x10] sm:$0xff] }
 0x845   :  { %1546 = vmatpush.msrb.mxu2 %v3772_v36 }
 0x846   :  { %v1276_v21 = vmul.f32 %v1270_v11, %v1102_v15 }
 0x848   :  { %2686 = vmatmul.msk.f32.gmra.mxu1 %vm1282_vm14, %v1276_v21 }
 0x872   :  { %v1318_v7 = vpop.f32.mrf.mxu1 }
 0x873   :  { %v1319_v2 = vadd.f32 %v1318_v7, %v1280_v44 }
 0x875   :  { %v3684_v23 = vadd.f32 %v1319_v2, %v3480_v29 }
 0x877   :  { %v1358_v18 = vsel %vm42_vm0, %v3684_v23, 0.0 }
 0x878   :  { %1359 = vadd.xlane.f32.xlu2 %v1358_v18 }
 0x87a   :  { %v1321_v49 = vpop.f32.mrf.mxu1 }
 0x87b   :  { %v1322_v40 = vadd.f32 %v1321_v49, %v1280_v44 }
 0x87d   :  { %v3689_v20 = vadd.f32 %v1322_v40, %v3486_v38 }
 0x87f   :  { %v1361_v0 = vsel %vm42_vm0, %v3689_v20, 0.0 }
 0x880   :  { %1362 = vadd.xlane.f32.xlu2 %v1361_v0 }
 0x883   :  { %v1324_v50 = vpop.f32.mrf.mxu1 }
 0x884   :  { %v1325_v47 = vadd.f32 %v1324_v50, %v1280_v44 }
 0x886   :  { %v3694_v55 = vadd.f32 %v1325_v47, %v3492_v27 }
 0x888   :  { %v1364_v29 = vsel %vm42_vm0, %v3694_v55, 0.0 }
 0x889   :  { %1365 = vadd.xlane.f32.xlu0 %v1364_v29 }
 0x89d   :  { %1503 = vrot.lane.b32.xlu0 %v2861_v9, %s3039_s13 }
 0x8b5   :  { %v1327_v59 = vpop.f32.mrf.mxu1 }
 0x8b6   :  { %v1328_v62 = vadd.f32 %v1327_v59, %v1280_v44 }
 0x8b8   :  { %v3699_v1 = vadd.f32 %v1328_v62, %v3498_v45 }
 0x8ba   :  { %v1367_v38 = vsel %vm42_vm0, %v3699_v1, 0.0 }
 0x8bb   :  { %1368 = vadd.xlane.f32.xlu2 %v1367_v38 }
 0x8bd   :  { %v1330_v51 = vpop.f32.mrf.mxu1 }
 0x8be   :  { %v1331_v3 = vadd.f32 %v1330_v51, %v1280_v44 }
 0x8c0   :  { %v3704_v4 = vadd.f32 %v1331_v3, %v3504_v25 }
 0x8c2   :  { %v1370_v27 = vsel %vm42_vm0, %v3704_v4, 0.0 }
 0x8c3   :  { %1371 = vadd.xlane.f32.xlu1 %v1370_v27 }
 0x8c5   :  { %v1333_v37 = vpop.f32.mrf.mxu1 }
 0x8c6   :  { %v1334_v6 = vadd.f32 %v1333_v37, %v1280_v44  ;;  %v2830_v44 = vpack.i.bf16 %v3772_v36, %v3766_v39 }
 0x8c8   :  { %v3709_v58 = vadd.f32 %v1334_v6, %v3510_v28 }
 0x8ca   :  { %v1373_v45 = vsel %vm42_vm0, %v3709_v58, 0.0 }
 0x8cb   :  { %1374 = vadd.xlane.f32.xlu2 %v1373_v45 }
 0x8eb   :  { %v1360_v25 = vpop.xlane.xlu2 %1359 }
 0x8ec   :  { %v1376_v30 = vmul.f32 %v1360_v25, %v3128_v42 }
 0x8ee   :  { %v3719_v10 = vsub.f32 %v3684_v23, %v1376_v30 }
 0x8f0   :  { %v1388_v28 = vmul.f32 %v3719_v10, %v3719_v10 }
 0x8f2   :  { %v1394_v35 = vsel %vm42_vm0, %v1388_v28, 0.0 }
 0x8f3   :  { %1395 = vadd.xlane.f32.xlu2 %v1394_v35  ;;  %v1363_v48 = vpop.xlane.xlu2 %1362 }
 0x8f4   :  { %v1377_v34 = vmul.f32 %v1363_v48, %v3128_v42 }
 0x8f6   :  { %v3726_v57 = vsub.f32 %v3689_v20, %v1377_v34 }
 0x8f8   :  { %v1389_v8 = vmul.f32 %v3726_v57, %v3726_v57 }
 0x8fa   :  { %v1397_v16 = vsel %vm42_vm0, %v1389_v8, 0.0 }
 0x8fb   :  { %1398 = vadd.xlane.f32.xlu2 %v1397_v16 }
 0x8fc   :  { %v1366_v56 = vpop.xlane.xlu0 %1365 }
 0x8fd   :  { %v1378_v33 = vmul.f32 %v1366_v56, %v3128_v42 }
 0x8ff   :  { %v3733_v12 = vsub.f32 %v3694_v55, %v1378_v33 }
 0x901   :  { %v1390_v22 = vmul.f32 %v3733_v12, %v3733_v12 }
 0x903   :  { %v1400_v5 = vsel %vm42_vm0, %v1390_v22, 0.0 }
 0x904   :  { %1401 = vadd.xlane.f32.xlu2 %v1400_v5 }
 0x90f   :  { %v3783_v25 = vpop.permute.xlu0 %1503 }
 0x91c   :  { %1492 = vrot.lane.b32.xlu2 %v2862_v24, %s3039_s13 }
 0x92e   :  { %v1369_v26 = vpop.xlane.xlu2 %1368 }
 0x92f   :  { %v1379_v32 = vmul.f32 %v1369_v26, %v3128_v42 }
 0x931   :  { %v3744_v61 = vsub.f32 %v3699_v1, %v1379_v32 }
 0x933   :  { %v1391_v63 = vmul.f32 %v3744_v61, %v3744_v61 }
 0x935   :  { %v1403_v13 = vsel %vm42_vm0, %v1391_v63, 0.0 }
 0x936   :  { %v1372_v46 = vpop.xlane.xlu1 %1371  ;;  %1404 = vadd.xlane.f32.xlu1 %v1403_v13 }
 0x937   :  { %v1380_v53 = vmul.f32 %v1372_v46, %v3128_v42 }
 0x939   :  { %v3751_v52 = vsub.f32 %v3704_v4, %v1380_v53 }
 0x93b   :  { %v1392_v54 = vmul.f32 %v3751_v52, %v3751_v52 }
 0x93d   :  { %v1406_v41 = vsel %vm42_vm0, %v1392_v54, 0.0 }
 0x93e   :  { %1407 = vadd.xlane.f32.xlu1 %v1406_v41  ;;  %v1375_v17 = vpop.xlane.xlu2 %1374 }
 0x93f   :  { %v1381_v19 = vmul.f32 %v1375_v17, %v3128_v42 }
 0x941   :  { %v3758_v31 = vsub.f32 %v3709_v58, %v1381_v19 }
 0x943   :  { %v1393_v43 = vmul.f32 %v3758_v31, %v3758_v31 }
 0x945   :  { %v1409_v60 = vsel %vm42_vm0, %v1393_v43, 0.0 }
 0x946   :  { %1410 = vadd.xlane.f32.xlu0 %v1409_v60 }
 0x966   :  { %v1396_v15 = vpop.xlane.xlu2 %1395 }
 0x967   :  { %v1412_v11 = vmul.f32 %v1396_v15, %v3128_v42 }
 0x969   :  { %v1418_v21 = vadd.f32 1e-05, %v1412_v11 }
 0x96b   :  { %2953 = vrsqrt.f32 %v1418_v21  ;;  %vm1430_vm1 = vweird.f32 %v1418_v21 }
 0x96e   :  { %v1399_v7 = vpop.xlane.xlu2 %1398 }
 0x96f   :  { %v1413_v2 = vmul.f32 %v1399_v7, %v3128_v42 }
 0x971   :  { %v2954_v18 = vpop.eup %2953  ;;  %v1419_v40 = vadd.f32 1e-05, %v1413_v2 }
 0x972   :  { %v1425_v49 = vmul.f32 %v2954_v18, %v1418_v21  ;;  %vm1431_vm15 = vweird.f32 %v2954_v18 }
 0x973   :  { %2955 = vrsqrt.f32 %v1419_v40  ;;  %vm1432_vm2 = vmor %vm1430_vm1, %vm1431_vm15  ;;  %vm1440_vm4 = vweird.f32 %v1419_v40 }
 0x974   :  { %v1426_v0 = vmul.f32 %v2954_v18, %v1425_v49 }
 0x976   :  { %v1427_v50 = vmul.f32 0.5, %v1426_v0 }
 0x977   :  { %v1402_v47 = vpop.xlane.xlu2 %1401 }
 0x978   :  { %v1428_v29 = vsub.f32 1.5, %v1427_v50  ;;  %v1414_v59 = vmul.f32 %v1402_v47, %v3128_v42 }
 0x979   :  { %v2956_v62 = vpop.eup %2955 }
 0x97a   :  { %v1429_v38 = vmul.f32 %v2954_v18, %v1428_v29  ;;  %v1420_v51 = vadd.f32 1e-05, %v1414_v59  ;;  %v1435_v3 = vmul.f32 %v2956_v62, %v1419_v40  ;;  %vm1441_vm3 = vweird.f32 %v2956_v62 }
 0x97b   :  { %vm1442_vm8 = vmor %vm1440_vm4, %vm1441_vm3 }
 0x97c   :  { %v1433_v27 = vsel %vm1432_vm2, %v2954_v18, %v1429_v38  ;;  %2957 = vrsqrt.f32 %v1420_v51  ;;  %v1436_v6 = vmul.f32 %v2956_v62, %v1435_v3  ;;  %vm1450_vm10 = vweird.f32 %v1420_v51 }
 0x97d   :  { %v1484_v37 = vmul.f32 %v1433_v27, %v3719_v10 }
 0x97e   :  { %v1437_v45 = vmul.f32 0.5, %v1436_v6 }
 0x97f   :  { %v3781_v9 = vpop.permute.xlu2 %1492 }
 0x980   :  { %v1495_v30 = vmul.f32 %v3781_v9, %v1484_v37  ;;  %v1438_v28 = vsub.f32 1.5, %v1437_v45 }
 0x982   :  { %v2958_v35 = vpop.eup %2957  ;;  %v1506_v48 = vadd.f32 %v3783_v25, %v1495_v30  ;;  %v1439_v34 = vmul.f32 %v2956_v62, %v1438_v28 }
 0x983   :  { %v1445_v8 = vmul.f32 %v2958_v35, %v1420_v51  ;;  %vm1451_vm9 = vweird.f32 %v2958_v35 }
 0x984   :  { %2687 = vmatmul.msk.f32.vlgmr.msrb.gmra.mxu2 %vm42_vm0, %v1506_v48  ;;  %v1443_v10 = vsel %vm1442_vm8, %v2956_v62, %v1439_v34  ;;  %vm1452_vm11 = vmor %vm1450_vm10, %vm1451_vm9 }
 0x985   :  { %v1446_v16 = vmul.f32 %v2958_v35, %v1445_v8  ;;  %v1485_v56 = vmul.f32 %v1443_v10, %v3726_v57 }
 0x987   :  { %v1447_v33 = vmul.f32 0.5, %v1446_v16  ;;  %v1496_v22 = vmul.f32 %v3781_v9, %v1485_v56  ;;  %v3814_v56 = vld [vmem:[%s4347_s1 + $0x61] ss:$0 sm:$0xff] }
 0x989   :  { %v1448_v5 = vsub.f32 1.5, %v1447_v33  ;;  %v1507_v24 = vadd.f32 %v3783_v25, %v1496_v22 }
 0x98b   :  { %v1449_v26 = vmul.f32 %v2958_v35, %v1448_v5 }
 0x98c   :  { %2688 = vmatmul.msk.f32.gmra.mxu2 %vm42_vm0, %v1507_v24 }
 0x98d   :  { %v1453_v32 = vsel %vm1452_vm11, %v2958_v35, %v1449_v26 }
 0x98e   :  { %v1486_v63 = vmul.f32 %v1453_v32, %v3733_v12 }
 0x990   :  { %v1497_v13 = vmul.f32 %v3781_v9, %v1486_v63 }
 0x992   :  { %v1508_v46 = vadd.f32 %v3783_v25, %v1497_v13 }
 0x994   :  { %2689 = vmatmul.msk.f32.gmra.mxu2 %vm42_vm0, %v1508_v46 }
 0x9a9   :  { %v1405_v57 = vpop.xlane.xlu1 %1404 }
 0x9aa   :  { %v1415_v53 = vmul.f32 %v1405_v57, %v3128_v42 }
 0x9ac   :  { %v1421_v54 = vadd.f32 1e-05, %v1415_v53 }
 0x9ae   :  { %2959 = vrsqrt.f32 %v1421_v54  ;;  %vm1460_vm13 = vweird.f32 %v1421_v54 }
 0x9b1   :  { %v1408_v41 = vpop.xlane.xlu1 %1407 }
 0x9b2   :  { %v1416_v17 = vmul.f32 %v1408_v41, %v3128_v42 }
 0x9b4   :  { %v2960_v19 = vpop.eup %2959  ;;  %v1422_v43 = vadd.f32 1e-05, %v1416_v17 }
 0x9b5   :  { %v1455_v60 = vmul.f32 %v2960_v19, %v1421_v54  ;;  %vm1461_vm12 = vweird.f32 %v2960_v19 }
 0x9b6   :  { %2961 = vrsqrt.f32 %v1422_v43  ;;  %vm1462_vm15 = vmor %vm1460_vm13, %vm1461_vm12  ;;  %vm1470_vm2 = vweird.f32 %v1422_v43 }
 0x9b7   :  { %v1456_v15 = vmul.f32 %v2960_v19, %v1455_v60 }
 0x9b9   :  { %v1457_v12 = vmul.f32 0.5, %v1456_v15  ;;  %v1411_v11 = vpop.xlane.xlu0 %1410 }
 0x9ba   :  { %v1417_v7 = vmul.f32 %v1411_v11, %v3128_v42 }
 0x9bb   :  { %v1458_v21 = vsub.f32 1.5, %v1457_v12 }
 0x9bc   :  { %v2962_v2 = vpop.eup %2961  ;;  %v1423_v40 = vadd.f32 1e-05, %v1417_v7 }
 0x9bd   :  { %v1459_v18 = vmul.f32 %v2960_v19, %v1458_v21  ;;  %v1465_v49 = vmul.f32 %v2962_v2, %v1422_v43  ;;  %vm1471_vm1 = vweird.f32 %v2962_v2 }
 0x9be   :  { %2963 = vrsqrt.f32 %v1423_v40  ;;  %vm1472_vm3 = vmor %vm1470_vm2, %vm1471_vm1  ;;  %vm1480_vm8 = vweird.f32 %v1423_v40 }
 0x9bf   :  { %v1463_v0 = vsel %vm1462_vm15, %v2960_v19, %v1459_v18  ;;  %v1466_v50 = vmul.f32 %v2962_v2, %v1465_v49 }
 0x9c0   :  { %v1487_v47 = vmul.f32 %v1463_v0, %v3744_v61 }
 0x9c1   :  { %v1467_v29 = vmul.f32 0.5, %v1466_v50 }
 0x9c2   :  { %v1498_v59 = vmul.f32 %v3781_v9, %v1487_v47 }
 0x9c3   :  { %v1468_v62 = vsub.f32 1.5, %v1467_v29 }
 0x9c4   :  { %v1509_v38 = vadd.f32 %v3783_v25, %v1498_v59  ;;  %v2964_v51 = vpop.eup %2963 }
 0x9c5   :  { %v1469_v3 = vmul.f32 %v2962_v2, %v1468_v62  ;;  %v1475_v27 = vmul.f32 %v2964_v51, %v1423_v40  ;;  %vm1481_vm4 = vweird.f32 %v2964_v51 }
 0x9c6   :  { %2690 = vmatmul.msk.f32.gmra.mxu2 %vm42_vm0, %v1509_v38  ;;  %vm1482_vm9 = vmor %vm1480_vm8, %vm1481_vm4 }
 0x9c7   :  { %v1473_v37 = vsel %vm1472_vm3, %v2962_v2, %v1469_v3  ;;  %v1476_v6 = vmul.f32 %v2964_v51, %v1475_v27 }
 0x9c8   :  { %v1488_v45 = vmul.f32 %v1473_v37, %v3751_v52 }
 0x9c9   :  { %v1477_v30 = vmul.f32 0.5, %v1476_v6 }
 0x9ca   :  { %v1499_v61 = vmul.f32 %v3781_v9, %v1488_v45 }
 0x9cb   :  { %v1478_v28 = vsub.f32 1.5, %v1477_v30 }
 0x9cc   :  { %v1510_v35 = vadd.f32 %v3783_v25, %v1499_v61 }
 0x9cd   :  { %v1479_v48 = vmul.f32 %v2964_v51, %v1478_v28 }
 0x9ce   :  { %2691 = vmatmul.msk.f32.gmra.mxu2 %vm42_vm0, %v1510_v35 }
 0x9cf   :  { %v1483_v34 = vsel %vm1482_vm9, %v2964_v51, %v1479_v48 }
 0x9d0   :  { %v1489_v8 = vmul.f32 %v1483_v34, %v3758_v31 }
 0x9d2   :  { %v1500_v10 = vmul.f32 %v3781_v9, %v1489_v8 }
 0x9d4   :  { %v1511_v16 = vadd.f32 %v3783_v25, %v1500_v10 }
 0x9d6   :  { %2692 = vmatmul.msk.f32.gmra.mxu2 %vm42_vm0, %v1511_v16 }
 0xa07   :  { %v1548_v52 = vpop.f32.mrf.mxu2 }
 0xa08   :  { %v3822_v9 = vadd.f32 %v3814_v56, %v1548_v52 }
 0xa0f   :  { %v1551_v33 = vpop.f32.mrf.mxu2 }
 0xa10   :  { %v3817_v22 = vadd.f32 %v3814_v56, %v1551_v33 }
 0xa12   :  { %1571 = vrot.lane.b32.xlu2 %v3817_v22, %s3042_s10 }
 0xa17   :  { %v1554_v31 = vpop.f32.mrf.mxu2 }
 0xa18   :  { %v3825_v25 = vadd.f32 %v3814_v56, %v1554_v31 }
 0xa1a   :  { %1573 = vrot.lane.b32.xlu1 %v3825_v25, %s3042_s10  ;;  %1569 = vrot.lane.b32.xlu2 %v3822_v9, %s3042_s10 }
 0xa22   :  { %1586 = vrot.lane.b32.xlu1 %v3817_v22, %s3043_s11  ;;  %1588 = vrot.lane.b32.xlu2 %v3825_v25, %s3043_s11 }
 0xa2a   :  { %1584 = vrot.lane.b32.xlu2 %v3822_v9, %s3043_s11 }
 0xa49   :  { %v1557_v5 = vpop.f32.mrf.mxu2 }
 0xa4a   :  { %v3863_v54 = vadd.f32 %v3814_v56, %v1557_v5 }
 0xa51   :  { %v1560_v24 = vpop.f32.mrf.mxu2 }
 0xa52   :  { %v3838_v26 = vadd.f32 %v3814_v56, %v1560_v24 }
 0xa54   :  { %1580 = vrot.lane.b32.xlu0 %v3838_v26, %s3042_s10 }
 0xa59   :  { %v1563_v32 = vpop.f32.mrf.mxu2 }
 0xa5a   :  { %v3843_v63 = vadd.f32 %v3814_v56, %v1563_v32 }
 0xa5c   :  { %1676 = vrot.lane.b32.xlu0 %v3843_v63, %s3043_s11  ;;  %1582 = vrot.lane.b32.xlu1 %v3843_v63, %s3042_s10 }
 0xa6c   :  { %v3849_v13 = vpop.permute.xlu2 %1571 }
 0xa6d   :  { %1630 = vrot.lane.b32.xlu1 %v3849_v13, %s3043_s11 }
 0xa74   :  { %v3853_v46 = vpop.permute.xlu2 %1569 }
 0xa75   :  { %1628 = vrot.lane.b32.xlu1 %v3853_v46, %s3043_s11 }
 0xa7c   :  { %v1589_v57 = vpop.permute.xlu2 %1588 }
 0xa7d   :  { %2693 = vmatpush.xpose.msk.msrb.mxu3 %vm352_vm5, %v1589_v57 }
 0xa84   :  { %v1585_v17 = vpop.permute.xlu2 %1584 }
 0xa8c   :  { %v3858_v53 = vpop.permute.xlu1 %1573 }
 0xa8d   :  { %1632 = vrot.lane.b32.xlu2 %v3858_v53, %s3043_s11 }
 0xa94   :  { %v1587_v41 = vpop.permute.xlu1 %1586 }
 0xa95   :  { %1578 = vrot.lane.b32.xlu2 %v3863_v54, %s3042_s10  ;;  %2694 = vmatpush.xpose.msk.msrb.mxu3 %vm352_vm5, %v1587_v41 }
 0xa99   :  { %2695 = vmatpush.xpose.msk.msrb.mxu3 %vm352_vm5, %v1585_v17 }
 0xa9c   :  { %2696 = vmatmul.msk.f32.vlgmr.msrb.gmra.mxu3 %vm352_vm5, %v3822_v9 }
 0xaa4   :  { %2697 = vmatmul.msk.f32.gmra.mxu3 %vm352_vm5, %v3817_v22 }
 0xaac   :  { %2698 = vmatmul.msk.f32.gmra.mxu3 %vm352_vm5, %v3825_v25 }
 0xac6   :  { %v3875_v19 = vpop.permute.xlu0 %1580 }
 0xac7   :  { %1718 = vrot.lane.b32.xlu1 %v3875_v19, %s3043_s11 }
 0xace   :  { %v1677_v43 = vpop.permute.xlu0 %1676  ;;  %v3879_v60 = vpop.permute.xlu1 %1582 }
 0xacf   :  { %1674 = vrot.lane.b32.xlu1 %v3838_v26, %s3043_s11  ;;  %2705 = vmatpush.xpose.msk.msra.mxu0 %vm352_vm5, %v1677_v43  ;;  %v2805_v57 = vpack.i.bf16 %v3879_v60, %v3853_v46 }
 0xad0   :  { %1720 = vrot.lane.b32.xlu2 %v3879_v60, %s3043_s11 }
 0xadf   :  { %v1631_v15 = vpop.permute.xlu1 %1630 }
 0xae7   :  { %v1633_v12 = vpop.permute.xlu2 %1632  ;;  %v1629_v11 = vpop.permute.xlu1 %1628 }
 0xae8   :  { %2699 = vmatpush.xpose.msk.msra.mxu3 %vm352_vm5, %v1633_v12  ;;  %v2800_v12 = vpack.i.bf16 %v3849_v13, %v3858_v53 }
 0xaec   :  { %2700 = vmatpush.xpose.msk.msra.mxu3 %vm352_vm5, %v1631_v15 }
 0xaef   :  { %v3888_v21 = vpop.permute.xlu2 %1578 }
 0xaf0   :  { %2701 = vmatpush.xpose.msk.msra.mxu3 %vm352_vm5, %v1629_v11  ;;  %1716 = vrot.lane.b32.xlu2 %v3888_v21, %s3043_s11 }
 0xaf3   :  { %2702 = vmatmul.msk.f32.vlgmr.msra.gmra.mxu3 %vm352_vm5, %v3853_v46 }
 0xaf8   :  { %1672 = vrot.lane.b32.xlu2 %v3863_v54, %s3043_s11 }
 0xafb   :  { %2703 = vmatmul.msk.f32.gmra.mxu3 %vm352_vm5, %v3849_v13 }
 0xb03   :  { %2704 = vmatmul.msk.f32.gmra.mxu3 %vm352_vm5, %v3858_v53 }
 0xb1f   :  { %v1619_v7 = vpop.f32.mrf.mxu3 }
 0xb20   :  { %v3903_v2 = vsel %vm98_vm6, %v1619_v7, -1e+30 }
 0xb21   :  { %v1772_v18 = vsel %vm535_vm7, %v3903_v2, -inf }
 0xb22   :  { %1773 = vmax.xlane.f32.xlu1 %v1772_v18 }
 0xb27   :  { %v1622_v49 = vpop.f32.mrf.mxu3 }
 0xb28   :  { %v3909_v40 = vsel %vm98_vm6, %v1622_v49, -1e+30 }
 0xb29   :  { %v1775_v0 = vsel %vm535_vm7, %v3909_v40, -inf }
 0xb2a   :  { %v1721_v50 = vpop.permute.xlu2 %1720  ;;  %1776 = vmax.xlane.f32.xlu2 %v1775_v0 }
 0xb2b   :  { %2711 = vmatpush.xpose.msk.msra.mxu1 %vm352_vm5, %v1721_v50 }
 0xb2f   :  { %v1625_v47 = vpop.f32.mrf.mxu3 }
 0xb30   :  { %v3916_v29 = vsel %vm98_vm6, %v1625_v47, -1e+30 }
 0xb31   :  { %v1778_v59 = vsel %vm535_vm7, %v3916_v29, -inf }
 0xb32   :  { %1779 = vmax.xlane.f32.xlu0 %v1778_v59 }
 0xb39   :  { %v1719_v62 = vpop.permute.xlu1 %1718 }
 0xb3a   :  { %2712 = vmatpush.xpose.msk.msra.mxu1 %vm352_vm5, %v1719_v62 }
 0xb41   :  { %v1675_v38 = vpop.permute.xlu1 %1674 }
 0xb42   :  { %2706 = vmatpush.xpose.msk.msra.mxu0 %vm352_vm5, %v1675_v38 }
 0xb4a   :  { %v1717_v51 = vpop.permute.xlu2 %1716 }
 0xb4b   :  { %2713 = vmatpush.xpose.msk.msra.mxu1 %vm352_vm5, %v1717_v51 }
 0xb4e   :  { %2714 = vmatmul.msk.f32.vlgmr.msra.gmra.mxu1 %vm352_vm5, %v3888_v21 }
 0xb52   :  { %v1673_v3 = vpop.permute.xlu2 %1672 }
 0xb53   :  { %2707 = vmatpush.xpose.msk.msra.mxu0 %vm352_vm5, %v1673_v3 }
 0xb56   :  { %2708 = vmatmul.msk.f32.vlgmr.msra.gmra.mxu0 %vm352_vm5, %v3863_v54  ;;  %2715 = vmatmul.msk.f32.gmra.mxu1 %vm352_vm5, %v3875_v19 }
 0xb5e   :  { %2709 = vmatmul.msk.f32.gmra.mxu0 %vm352_vm5, %v3838_v26  ;;  %2716 = vmatmul.msk.f32.gmra.mxu1 %vm352_vm5, %v3879_v60 }
 0xb66   :  { %2710 = vmatmul.msk.f32.gmra.mxu0 %vm352_vm5, %v3843_v63 }
 0xb76   :  { %v1663_v27 = vpop.f32.mrf.mxu3 }
 0xb77   :  { %v1763_v37 = vsel %vm98_vm6, %v1663_v27, -1e+30 }
 0xb78   :  { %v1781_v6 = vsel %vm535_vm7, %v1763_v37, -inf }
 0xb79   :  { %1782 = vmax.xlane.f32.xlu0 %v1781_v6 }
 0xb7e   :  { %v1666_v45 = vpop.f32.mrf.mxu3 }
 0xb7f   :  { %v1764_v30 = vsel %vm98_vm6, %v1666_v45, -1e+30 }
 0xb80   :  { %v1784_v61 = vsel %vm535_vm7, %v1764_v30, -inf }
 0xb81   :  { %1785 = vmax.xlane.f32.xlu1 %v1784_v61 }
 0xb86   :  { %v1669_v28 = vpop.f32.mrf.mxu3 }
 0xb87   :  { %v1765_v35 = vsel %vm98_vm6, %v1669_v28, -1e+30  ;;  %v2810_v28 = vpack.i.bf16 %v3888_v21, %v3875_v19 }
 0xb88   :  { %v1787_v48 = vsel %vm535_vm7, %v1765_v35, -inf }
 0xb89   :  { %1788 = vmax.xlane.f32.xlu2 %v1787_v48  ;;  %v2820_v48 = vpack.i.bf16 %v3843_v63, %v3822_v9 }
 0xb95   :  { %v1774_v11 = vpop.xlane.xlu1 %1773 }
 0xb9d   :  { %v1777_v60 = vpop.xlane.xlu2 %1776 }
 0xb9e   :  { %v1809_v9 = vsub.f32 %v3909_v40, %v1777_v60 }
 0xba5   :  { %v3963_v17 = vpop.xlane.xlu0 %1779 }
 0xbcb   :  { %v1751_v34 = vpop.f32.mrf.mxu1 }
 0xbcc   :  { %v1769_v8 = vsel %vm98_vm6, %v1751_v34, -1e+30 }
 0xbcd   :  { %v1799_v10 = vsel %vm535_vm7, %v1769_v8, -inf }
 0xbce   :  { %1800 = vmax.xlane.f32.xlu0 %v1799_v10  ;;  %v1808_v10 = vsub.f32 %v3903_v2, %v1774_v11  ;;  %v1822_v2 = vmul.f32 1.442695, %v1809_v9 }
 0xbd3   :  { %v1707_v16 = vpop.f32.mrf.mxu0  ;;  %v1754_v52 = vpop.f32.mrf.mxu1 }
 0xbd4   :  { %v3950_v33 = vsel %vm98_vm6, %v1707_v16, -1e+30  ;;  %v3954_v31 = vsel %vm98_vm6, %v1754_v52, -1e+30  ;;  %v1820_v52 = vmul.f32 1.442695, %v1808_v10 }
 0xbd5   :  { %v1802_v5 = vsel %vm535_vm7, %v3954_v31, -inf  ;;  %v1790_v24 = vsel %vm535_vm7, %v3950_v33, -inf }
 0xbd6   :  { %1803 = vmax.xlane.f32.xlu2 %v1802_v5  ;;  %1791 = vmax.xlane.f32.xlu1 %v1790_v24 }
 0xbdb   :  { %v1710_v32 = vpop.f32.mrf.mxu0  ;;  %v1757_v3 = vpop.f32.mrf.mxu1 }
 0xbe2   :  { %2806 = vrot.lane.b32.xlu0 %v2805_v57, %s3040_s16 }
 0xbe3   :  { %v1713_v41 = vpop.f32.mrf.mxu0 }
 0xbe4   :  { %v3967_v43 = vsel %vm98_vm6, %v1713_v41, -1e+30 }
 0xbe5   :  { %v1796_v15 = vsel %vm535_vm7, %v3967_v43, -inf }
 0xbe6   :  { %1797 = vmax.xlane.f32.xlu1 %v1796_v15 }
 0xbec   :  { %v1783_v7 = vpop.xlane.xlu0 %1782 }
 0xbed   :  { %v1811_v18 = vsub.f32 %v1763_v37, %v1783_v7  ;;  %v3986_v37 = vsel %vm98_vm6, %v1757_v3, -1e+30 }
 0xbee   :  { %2801 = vrot.lane.b32.xlu2 %v2800_v12, %s3040_s16  ;;  %v1805_v45 = vsel %vm535_vm7, %v3986_v37, -inf }
 0xbef   :  { %v1826_v46 = vmul.f32 1.442695, %v1811_v18 }
 0xbf1   :  { %2965 = vpow2.f32 %v1826_v46 }
 0xbf4   :  { %v1786_v49 = vpop.xlane.xlu1 %1785 }
 0xbf5   :  { %v1812_v0 = vsub.f32 %v1764_v30, %v1786_v49  ;;  %v3994_v30 = vsel %vm98_vm6, %v1710_v32, -1e+30 }
 0xbf6   :  { %v1793_v61 = vsel %vm535_vm7, %v3994_v30, -inf }
 0xbf7   :  { %v3974_v50 = vpop.eup %2965  ;;  %v1828_v47 = vmul.f32 1.442695, %v1812_v0 }
 0xbf8   :  { %v1853_v59 = vsel %vm535_vm7, %v3974_v50, 0.0 }
 0xbf9   :  { %2967 = vpow2.f32 %v1828_v47  ;;  %1854 = vadd.xlane.f32.xlu1 %v1853_v59 }
 0xbfc   :  { %v1789_v62 = vpop.xlane.xlu2 %1788 }
 0xbfd   :  { %v1813_v13 = vsub.f32 %v1765_v35, %v1789_v62  ;;  %v2815_v35 = vpack.i.bf16 %v3817_v22, %v3825_v25 }
 0xbff   :  { %v3978_v53 = vpop.eup %2967  ;;  %v1830_v38 = vmul.f32 1.442695, %v1813_v13 }
 0xc00   :  { %v1856_v51 = vsel %vm535_vm7, %v3978_v53, 0.0 }
 0xc01   :  { %2969 = vpow2.f32 %v1830_v38  ;;  %1857 = vadd.xlane.f32.xlu1 %v1856_v51 }
 0xc07   :  { %v3982_v27 = vpop.eup %2969 }
 0xc08   :  { %v1859_v6 = vsel %vm535_vm7, %v3982_v27, 0.0 }
 0xc09   :  { %1860 = vadd.xlane.f32.xlu1 %v1859_v6 }
 0xc0c   :  { %1806 = vmax.xlane.f32.xlu0 %v1805_v45 }
 0xc14   :  { %1794 = vmax.xlane.f32.xlu0 %v1793_v61 }
 0xc22   :  { %2811 = vrot.lane.b32.xlu1 %v2810_v28, %s3040_s16 }
 0xc28   :  { %2816 = vrot.lane.b32.xlu0 %v2815_v35, %s3040_s16 }
 0xc30   :  { %2821 = vrot.lane.b32.xlu0 %v2820_v48, %s3040_s16 }
 0xc41   :  { %v1801_v14 = vpop.xlane.xlu0 %1800 }
 0xc42   :  { %v1817_v34 = vsub.f32 %v1769_v8, %v1801_v14 }
 0xc44   :  { %v1838_v16 = vmul.f32 1.442695, %v1817_v34 }
 0xc46   :  { %2971 = vpow2.f32 %v1838_v16 }
 0xc47   :  { %2973 = vpow2.f32 %v1820_v52 }
 0xc49   :  { %v1792_v19 = vpop.xlane.xlu1 %1791  ;;  %v1804_v21 = vpop.xlane.xlu2 %1803 }
 0xc4a   :  { %v1814_v5 = vsub.f32 %v3950_v33, %v1792_v19  ;;  %v1818_v22 = vsub.f32 %v3954_v31, %v1804_v21  ;;  %v1810_v31 = vsub.f32 %v3916_v29, %v3963_v17 }
 0xc4c   :  { %v4010_v25 = vpop.eup %2971  ;;  %v1832_v63 = vmul.f32 1.442695, %v1814_v5  ;;  %v1840_v24 = vmul.f32 1.442695, %v1818_v22  ;;  %v1824_v29 = vmul.f32 1.442695, %v1810_v31 }
 0xc4d   :  { %v1871_v8 = vsel %vm535_vm7, %v4010_v25, 0.0  ;;  %v4015_v57 = vpop.eup %2973 }
 0xc4e   :  { %1872 = vadd.xlane.f32.xlu2 %v1871_v8  ;;  %2975 = vpow2.f32 %v1840_v24  ;;  %v1844_v7 = vsel %vm535_vm7, %v4015_v57, 0.0 }
 0xc4f   :  { %2977 = vpow2.f32 %v1832_v63 }
 0xc50   :  { %2979 = vpow2.f32 %v1822_v2  ;;  %v2825_v2 = vpack.i.bf16 %v3863_v54, %v3838_v26 }
 0xc51   :  { %v2802_v32 = vpop.permute.xlu2 %2801  ;;  %2981 = vpow2.f32 %v1824_v29 }
 0xc52   :  { %v2803_v33 = vunpack.i.l.bf16 %v2802_v32  ;;  %v2804_v41 = vunpack.i.h.bf16 %v2802_v32 }
 0xc54   :  { %v2807_v15 = vpop.permute.xlu0 %2806  ;;  %1979 = vmatpush.msrb.mxu3 %v2803_v33  ;;  %v4019_v40 = vpop.eup %2975 }
 0xc55   :  { %v2809_v12 = vunpack.i.h.bf16 %v2807_v15  ;;  %v2808_v11 = vunpack.i.l.bf16 %v2807_v15  ;;  %v4023_v18 = vpop.eup %2977  ;;  %v1874_v46 = vsel %vm535_vm7, %v4019_v40, 0.0 }
 0xc56   :  { %1845 = vadd.xlane.f32.xlu2 %v1844_v7  ;;  %1980 = vmatpush.msrb.mxu3 %v2804_v41  ;;  %v1862_v17 = vsel %vm535_vm7, %v4023_v18, 0.0  ;;  %v4029_v60 = vpop.eup %2979 }
 0xc57   :  { %1875 = vadd.xlane.f32.xlu1 %v1874_v46  ;;  %2067 = vmatpush.msrb.mxu1 %v2809_v12  ;;  %v1847_v49 = vsel %vm535_vm7, %v4029_v60, 0.0  ;;  %v4033_v0 = vpop.eup %2981 }
 0xc58   :  { %1981 = vmatpush.msrb.mxu3 %v2808_v11  ;;  %v1850_v59 = vsel %vm535_vm7, %v4033_v0, 0.0 }
 0xc59   :  { %v1798_v47 = vpop.xlane.xlu1 %1797 }
 0xc5a   :  { %1863 = vadd.xlane.f32.xlu0 %v1862_v17 }
 0xc5e   :  { %1848 = vadd.xlane.f32.xlu2 %v1847_v49 }
 0xc66   :  { %1851 = vadd.xlane.f32.xlu2 %v1850_v59 }
 0xc6c   :  { %v1855_v62 = vpop.xlane.xlu1 %1854 }
 0xc6d   :  { %2983 = vrcp.f32 %v1855_v62 }
 0xc73   :  { %v2984_v13 = vpop.eup %2983 }
 0xc74   :  { %v1895_v38 = vmul.f32 %v2984_v13, %v3974_v50  ;;  %v1858_v51 = vpop.xlane.xlu1 %1857 }
 0xc75   :  { %2985 = vrcp.f32 %v1858_v51 }
 0xc76   :  { %2720 = vmatmul.msk.f32.vlgmr.msrb.gmra.mxu3 %vm535_vm7, %v1895_v38 }
 0xc7b   :  { %v2986_v3 = vpop.eup %2985 }
 0xc7c   :  { %v1861_v6 = vpop.xlane.xlu1 %1860  ;;  %v1896_v45 = vmul.f32 %v2986_v3, %v3978_v53  ;;  %v1816_v53 = vsub.f32 %v3967_v43, %v1798_v47 }
 0xc7d   :  { %2987 = vrcp.f32 %v1861_v6 }
 0xc7e   :  { %2721 = vmatmul.msk.f32.gmra.mxu3 %vm535_vm7, %v1896_v45 }
 0xc7f   :  { %v1807_v61 = vpop.xlane.xlu0 %1806 }
 0xc80   :  { %v1819_v28 = vsub.f32 %v3986_v37, %v1807_v61  ;;  %v1836_v37 = vmul.f32 1.442695, %v1816_v53 }
 0xc82   :  { %v1842_v35 = vmul.f32 1.442695, %v1819_v28 }
 0xc83   :  { %v2988_v48 = vpop.eup %2987 }
 0xc84   :  { %2989 = vpow2.f32 %v1842_v35  ;;  %v1897_v14 = vmul.f32 %v2988_v48, %v3982_v27 }
 0xc86   :  { %2722 = vmatmul.msk.f32.gmra.mxu3 %vm535_vm7, %v1897_v14 }
 0xc87   :  { %v1795_v50 = vpop.xlane.xlu0 %1794 }
 0xc88   :  { %v1815_v34 = vsub.f32 %v3994_v30, %v1795_v50 }
 0xc8a   :  { %v4045_v10 = vpop.eup %2989  ;;  %v1834_v16 = vmul.f32 1.442695, %v1815_v34 }
 0xc8b   :  { %v1877_v52 = vsel %vm535_vm7, %v4045_v10, 0.0 }
 0xc8c   :  { %2991 = vpow2.f32 %v1834_v16  ;;  %1878 = vadd.xlane.f32.xlu2 %v1877_v52 }
 0xc8d   :  { %2993 = vpow2.f32 %v1836_v37 }
 0xc92   :  { %v4050_v19 = vpop.eup %2991 }
 0xc93   :  { %v1865_v27 = vsel %vm535_vm7, %v4050_v19, 0.0  ;;  %v4054_v22 = vpop.eup %2993 }
 0xc94   :  { %v2812_v21 = vpop.permute.xlu1 %2811  ;;  %1866 = vadd.xlane.f32.xlu1 %v1865_v27  ;;  %v1868_v63 = vsel %vm535_vm7, %v4054_v22, 0.0 }
 0xc95   :  { %v2813_v30 = vunpack.i.l.bf16 %v2812_v21  ;;  %v2814_v5 = vunpack.i.h.bf16 %v2812_v21 }
 0xc97   :  { %2068 = vmatpush.msrb.mxu1 %v2813_v30 }
 0xc99   :  { %2069 = vmatpush.msrb.mxu1 %v2814_v5 }
 0xc9a   :  { %v2817_v43 = vpop.permute.xlu0 %2816 }
 0xc9b   :  { %v2818_v9 = vunpack.i.l.bf16 %v2817_v43  ;;  %v2819_v24 = vunpack.i.h.bf16 %v2817_v43 }
 0xc9c   :  { %1869 = vadd.xlane.f32.xlu1 %v1868_v63 }
 0xc9d   :  { %1935 = vmatpush.msra.mxu2 %v2818_v9 }
 0xc9f   :  { %1936 = vmatpush.msra.mxu2 %v2819_v24 }
 0xca2   :  { %v2822_v8 = vpop.permute.xlu0 %2821 }
 0xca3   :  { %v2824_v32 = vunpack.i.h.bf16 %v2822_v8  ;;  %v2823_v33 = vunpack.i.l.bf16 %v2822_v8 }
 0xca4   :  { %2826 = vrot.lane.b32.xlu2 %v2825_v2, %s3040_s16 }
 0xca5   :  { %1937 = vmatpush.msra.mxu2 %v2823_v33  ;;  %2023 = vmatpush.msrb.mxu0 %v2824_v32 }
 0xcc1   :  { %v1873_v31 = vpop.xlane.xlu2 %1872 }
 0xcc2   :  { %2995 = vrcp.f32 %v1873_v31 }
 0xcc8   :  { %v2996_v41 = vpop.eup %2995 }
 0xcc9   :  { %v1901_v15 = vmul.f32 %v2996_v41, %v4010_v25  ;;  %v1846_v12 = vpop.xlane.xlu2 %1845 }
 0xcca   :  { %v1876_v11 = vpop.xlane.xlu1 %1875  ;;  %2997 = vrcp.f32 %v1846_v12 }
 0xccb   :  { %2999 = vrcp.f32 %v1876_v11  ;;  %2726 = vmatmul.msk.f32.vlgmr.msrb.gmra.mxu1 %vm535_vm7, %v1901_v15 }
 0xcd0   :  { %v2998_v7 = vpop.eup %2997 }
 0xcd1   :  { %v3000_v46 = vpop.eup %2999  ;;  %v1892_v26 = vmul.f32 %v2998_v7, %v4015_v57  ;;  %v1849_v54 = vpop.xlane.xlu2 %1848 }
 0xcd2   :  { %3001 = vrcp.f32 %v1849_v54  ;;  %v1902_v29 = vmul.f32 %v3000_v46, %v4019_v40  ;;  %v1864_v40 = vpop.xlane.xlu0 %1863 }
 0xcd3   :  { %2717 = vmatmul.msk.f32.vlgmr.msra.gmra.mxu2 %vm535_vm7, %v1892_v26 }
 0xcd4   :  { %2727 = vmatmul.msk.f32.gmra.mxu1 %vm535_vm7, %v1902_v29 }
 0xcd8   :  { %v3002_v17 = vpop.eup %3001 }
 0xcd9   :  { %v1852_v25 = vpop.xlane.xlu2 %1851  ;;  %v1893_v49 = vmul.f32 %v3002_v17, %v4029_v60 }
 0xcda   :  { %3003 = vrcp.f32 %v1852_v25 }
 0xcdb   :  { %2718 = vmatmul.msk.f32.gmra.mxu2 %vm535_vm7, %v1893_v49 }
 0xce0   :  { %v3004_v47 = vpop.eup %3003 }
 0xce1   :  { %v1894_v59 = vmul.f32 %v3004_v47, %v4033_v0 }
 0xce3   :  { %2719 = vmatmul.msk.f32.gmra.mxu2 %vm535_vm7, %v1894_v59 }
 0xcf9   :  { %v1983_v57 = vpop.f32.mrf.mxu3 }
 0xcfa   :  { %2083 = vrot.lane.b32.xlu1 %v1983_v57, %s3044_s12 }
 0xcff   :  { %v1879_v62 = vpop.xlane.xlu2 %1878 }
 0xd00   :  { %3005 = vrcp.f32 %v1879_v62 }
 0xd01   :  { %v1986_v13 = vpop.f32.mrf.mxu3  ;;  %3007 = vrcp.f32 %v1864_v40 }
 0xd02   :  { %2085 = vrot.lane.b32.xlu2 %v1986_v13, %s3044_s12 }
 0xd06   :  { %v3006_v38 = vpop.eup %3005 }
 0xd07   :  { %v1867_v60 = vpop.xlane.xlu1 %1866  ;;  %v2827_v51 = vpop.permute.xlu2 %2826  ;;  %v1903_v3 = vmul.f32 %v3006_v38, %v4045_v10 }
 0xd08   :  { %v3008_v6 = vpop.eup %3007  ;;  %v2828_v45 = vunpack.i.l.bf16 %v2827_v51  ;;  %3009 = vrcp.f32 %v1867_v60  ;;  %v2829_v61 = vunpack.i.h.bf16 %v2827_v51 }
 0xd09   :  { %v1989_v0 = vpop.f32.mrf.mxu3  ;;  %2728 = vmatmul.msk.f32.gmra.mxu1 %vm535_vm7, %v1903_v3  ;;  %v1898_v28 = vmul.f32 %v3008_v6, %v4023_v18 }
 0xd0a   :  { %2024 = vmatpush.msrb.mxu0 %v2828_v45  ;;  %2087 = vrot.lane.b32.xlu2 %v1989_v0, %s3044_s12  ;;  %v2865_v45 = vld [vmem:[%s4347_s1 + $0x18] ss:$0 sm:$0xff] }
 0xd0c   :  { %2025 = vmatpush.msrb.mxu0 %v2829_v61 }
 0xd0d   :  { %2723 = vmatmul.msk.f32.vlgmr.msrb.gmra.mxu0 %vm535_vm7, %v1898_v28 }
 0xd0e   :  { %v3010_v48 = vpop.eup %3009 }
 0xd0f   :  { %v1870_v35 = vpop.xlane.xlu1 %1869  ;;  %v1899_v14 = vmul.f32 %v3010_v48, %v4050_v19 }
 0xd10   :  { %3011 = vrcp.f32 %v1870_v35 }
 0xd15   :  { %2724 = vmatmul.msk.f32.gmra.mxu0 %vm535_vm7, %v1899_v14 }
 0xd16   :  { %v3012_v50 = vpop.eup %3011 }
 0xd17   :  { %v1900_v34 = vmul.f32 %v3012_v50, %v4054_v22 }
 0xd1d   :  { %2725 = vmatmul.msk.f32.gmra.mxu0 %vm535_vm7, %v1900_v34 }
 0xd48   :  { %v2071_v10 = vpop.f32.mrf.mxu1 }
 0xd49   :  { %2098 = vrot.lane.b32.xlu0 %v2071_v10, %s3044_s12 }
 0xd51   :  { %v2074_v53 = vpop.f32.mrf.mxu1 }
 0xd52   :  { %2100 = vrot.lane.b32.xlu2 %v2074_v53, %s3044_s12 }
 0xd56   :  { %v1939_v18 = vpop.f32.mrf.mxu2 }
 0xd5c   :  { %v2086_v16 = vpop.permute.xlu2 %2085 }
 0xd5e   :  { %v1942_v52 = vpop.f32.mrf.mxu2 }
 0xd5f   :  { %v2093_v37 = vsel %vm352_vm5, %v1942_v52, %v2086_v16 }
 0xd64   :  { %v2088_v19 = vpop.permute.xlu2 %2087 }
 0xd66   :  { %v1945_v27 = vpop.f32.mrf.mxu2 }
 0xd67   :  { %v2094_v21 = vsel %vm352_vm5, %v1945_v27, %v2088_v19 }
 0xd68   :  { %v4087_v30 = vadd.f32 %v2094_v21, %v3694_v55  ;;  %v4099_v55 = vadd.f32 %v2093_v37, %v3689_v20 }
 0xd6a   :  { %v2122_v22 = vsel %vm42_vm0, %v4087_v30, 0.0  ;;  %v2119_v33 = vsel %vm42_vm0, %v4099_v55, 0.0 }
 0xd6c   :  { %v2084_v5 = vpop.permute.xlu1 %2083 }
 0xd6d   :  { %v2092_v43 = vsel %vm352_vm5, %v1939_v18, %v2084_v5 }
 0xd6e   :  { %v4093_v9 = vadd.f32 %v2092_v43, %v3684_v23 }
 0xd70   :  { %v2116_v63 = vsel %vm42_vm0, %v4093_v9, 0.0 }
 0xd73   :  { %2123 = vadd.xlane.f32.xlu0 %v2122_v22 }
 0xd7b   :  { %2117 = vadd.xlane.f32.xlu2 %v2116_v63 }
 0xd86   :  { %v2077_v24 = vpop.f32.mrf.mxu1 }
 0xd87   :  { %2102 = vrot.lane.b32.xlu1 %v2077_v24, %s3044_s12 }
 0xd8a   :  { %v2027_v8 = vpop.f32.mrf.mxu0 }
 0xd92   :  { %v2030_v32 = vpop.f32.mrf.mxu0 }
 0xd9a   :  { %v2033_v17 = vpop.f32.mrf.mxu0 }
 0xdac   :  { %v2101_v2 = vpop.permute.xlu2 %2100 }
 0xdad   :  { %v2108_v31 = vsel %vm352_vm5, %v2030_v32, %v2101_v2 }
 0xdae   :  { %v4105_v23 = vadd.f32 %v2108_v31, %v3704_v4 }
 0xdb0   :  { %v2128_v41 = vsel %vm42_vm0, %v4105_v23, 0.0 }
 0xdb1   :  { %2120 = vadd.xlane.f32.xlu1 %v2119_v33 }
 0xdb9   :  { %2129 = vadd.xlane.f32.xlu1 %v2128_v41 }
 0xdbb   :  { %v2099_v15 = vpop.permute.xlu0 %2098 }
 0xdbc   :  { %v2107_v12 = vsel %vm352_vm5, %v2027_v8, %v2099_v15 }
 0xdbd   :  { %v4111_v20 = vadd.f32 %v2107_v12, %v3699_v1 }
 0xdbf   :  { %v2125_v11 = vsel %vm42_vm0, %v4111_v20, 0.0 }
 0xdc0   :  { %2126 = vadd.xlane.f32.xlu2 %v2125_v11 }
 0xde6   :  { %v2124_v29 = vpop.xlane.xlu0 %2123 }
 0xde7   :  { %v2136_v1 = vmul.f32 %v2124_v29, %v3128_v42 }
 0xde9   :  { %v4128_v59 = vsub.f32 %v4087_v30, %v2136_v1 }
 0xdeb   :  { %v2148_v40 = vmul.f32 %v4128_v59, %v4128_v59 }
 0xded   :  { %v2158_v62 = vsel %vm42_vm0, %v2148_v40, 0.0 }
 0xdee   :  { %v2118_v7 = vpop.xlane.xlu2 %2117 }
 0xdef   :  { %v2134_v46 = vmul.f32 %v2118_v7, %v3128_v42 }
 0xdf1   :  { %v4117_v4 = vsub.f32 %v4093_v9, %v2134_v46 }
 0xdf3   :  { %v2146_v26 = vmul.f32 %v4117_v4, %v4117_v4 }
 0xdf5   :  { %v2152_v54 = vsel %vm42_vm0, %v2146_v26, 0.0 }
 0xdf6   :  { %2153 = vadd.xlane.f32.xlu0 %v2152_v54 }
 0xdf9   :  { %v2103_v25 = vpop.permute.xlu1 %2102 }
 0xdfa   :  { %v2109_v49 = vsel %vm352_vm5, %v2033_v17, %v2103_v25 }
 0xdfb   :  { %v4125_v47 = vadd.f32 %v2109_v49, %v3709_v58 }
 0xdfd   :  { %v2131_v57 = vsel %vm42_vm0, %v4125_v47, 0.0 }
 0xdfe   :  { %2132 = vadd.xlane.f32.xlu2 %v2131_v57 }
 0xe06   :  { %2159 = vadd.xlane.f32.xlu2 %v2158_v62 }
 0xe1e   :  { %2831 = vrot.lane.b32.xlu2 %v2830_v44, %s3045_s23 }
 0xe24   :  { %v2121_v58 = vpop.xlane.xlu1 %2120 }
 0xe25   :  { %v2135_v13 = vmul.f32 %v2121_v58, %v3128_v42 }
 0xe26   :  { %2279 = vrot.lane.b32.xlu2 %v3814_v56, %s3045_s23  ;;  %v2864_v56 = vld [vmem:[%s4347_s1 + $0x17] ss:$0 sm:$0xff] }
 0xe27   :  { %v4143_v38 = vsub.f32 %v4099_v55, %v2135_v13 }
 0xe29   :  { %v2147_v60 = vmul.f32 %v4143_v38, %v4143_v38 }
 0xe2b   :  { %v2155_v51 = vsel %vm42_vm0, %v2147_v60, 0.0 }
 0xe2c   :  { %2156 = vadd.xlane.f32.xlu1 %v2155_v51  ;;  %v2130_v0 = vpop.xlane.xlu1 %2129 }
 0xe2d   :  { %v2138_v61 = vmul.f32 %v2130_v0, %v3128_v42 }
 0xe2f   :  { %v4165_v28 = vsub.f32 %v4105_v23, %v2138_v61 }
 0xe31   :  { %v2150_v35 = vmul.f32 %v4165_v28, %v4165_v28 }
 0xe33   :  { %v2127_v3 = vpop.xlane.xlu2 %2126  ;;  %v2164_v48 = vsel %vm42_vm0, %v2150_v35, 0.0 }
 0xe34   :  { %v2137_v6 = vmul.f32 %v2127_v3, %v3128_v42 }
 0xe36   :  { %v4150_v39 = vsub.f32 %v4111_v20, %v2137_v6 }
 0xe38   :  { %v2149_v36 = vmul.f32 %v4150_v39, %v4150_v39 }
 0xe3a   :  { %v2161_v44 = vsel %vm42_vm0, %v2149_v36, 0.0 }
 0xe3b   :  { %2162 = vadd.xlane.f32.xlu0 %v2161_v44 }
 0xe45   :  { %2250 = vrot.lane.b32.xlu1 %v2864_v56, %s3039_s13 }
 0xe4f   :  { %2261 = vrot.lane.b32.xlu0 %v2865_v45, %s3039_s13 }
 0xe69   :  { %v2154_v18 = vpop.xlane.xlu0 %2153 }
 0xe6a   :  { %v2170_v16 = vmul.f32 %v2154_v18, %v3128_v42 }
 0xe6c   :  { %v2176_v37 = vadd.f32 1e-05, %v2170_v16 }
 0xe6e   :  { %3013 = vrsqrt.f32 %v2176_v37  ;;  %vm2188_vm6 = vweird.f32 %v2176_v37 }
 0xe6f   :  { %2165 = vadd.xlane.f32.xlu1 %v2164_v48 }
 0xe71   :  { %v2133_v14 = vpop.xlane.xlu2 %2132 }
 0xe72   :  { %v2139_v50 = vmul.f32 %v2133_v14, %v3128_v42 }
 0xe74   :  { %v4172_v34 = vsub.f32 %v4125_v47, %v2139_v50  ;;  %v3014_v63 = vpop.eup %3013 }
 0xe75   :  { %v2183_v8 = vmul.f32 %v3014_v63, %v2176_v37  ;;  %vm2189_vm5 = vweird.f32 %v3014_v63  ;;  %v1350_v37 = vld [vmem:[%s4347_s1 + $0x50] sm:$0xff] }
 0xe76   :  { %v2151_v10 = vmul.f32 %v4172_v34, %v4172_v34  ;;  %vm2190_vm7 = vmor %vm2188_vm6, %vm2189_vm5 }
 0xe77   :  { %v2184_v33 = vmul.f32 %v3014_v63, %v2183_v8 }
 0xe78   :  { %v2167_v53 = vsel %vm42_vm0, %v2151_v10, 0.0 }
 0xe79   :  { %2168 = vadd.xlane.f32.xlu0 %v2167_v53  ;;  %v2160_v52 = vpop.xlane.xlu2 %2159  ;;  %v2185_v15 = vmul.f32 0.5, %v2184_v33  ;;  %v1345_v33 = vld [vmem:[%s4347_s1 + $0x28] sm:$0xff] }
 0xe7a   :  { %v2172_v24 = vmul.f32 %v2160_v52, %v3128_v42 }
 0xe7b   :  { %v2186_v46 = vsub.f32 1.5, %v2185_v15 }
 0xe7c   :  { %v2178_v32 = vadd.f32 1e-05, %v2172_v24 }
 0xe7d   :  { %v2187_v29 = vmul.f32 %v3014_v63, %v2186_v46 }
 0xe7e   :  { %vm2208_vm15 = vweird.f32 %v2178_v32 }
 0xe7f   :  { %v2191_v49 = vsel %vm2190_vm7, %v3014_v63, %v2187_v29  ;;  %v1347_v63 = vld [vmem:[%s4347_s1 + $0x38] sm:$0xff] }
 0xe80   :  { %v2242_v13 = vmul.f32 %v2191_v49, %v4117_v4 }
 0xe81   :  { %v2832_v19 = vpop.permute.xlu2 %2831 }
 0xe82   :  { %v2833_v5 = vunpack.i.l.bf16 %v2832_v19  ;;  %v2834_v43 = vunpack.i.h.bf16 %v2832_v19 }
 0xe84   :  { %2314 = vmatpush.msrb.mxu2 %v2833_v5 }
 0xe86   :  { %2315 = vmatpush.msrb.mxu2 %v2834_v43  ;;  %v1346_v43 = vld [vmem:[%s4347_s1 + $0x30] sm:$0xff] }
 0xe9f   :  { %v2157_v27 = vpop.xlane.xlu1 %2156 }
 0xea0   :  { %v2171_v21 = vmul.f32 %v2157_v27, %v3128_v42  ;;  %v1351_v27 = vld [vmem:[%s4347_s1 + $0x58] sm:$0xff] }
 0xea2   :  { %v2177_v22 = vadd.f32 1e-05, %v2171_v21  ;;  %v1349_v21 = vld [vmem:[%s4347_s1 + $0x48] sm:$0xff] }
 0xea4   :  { %3015 = vrsqrt.f32 %v2177_v22  ;;  %vm2198_vm11 = vweird.f32 %v2177_v22 }
 0xea5   :  { %3017 = vrsqrt.f32 %v2178_v32 }
 0xeaa   :  { %v3016_v2 = vpop.eup %3015 }
 0xeab   :  { %v2193_v31 = vmul.f32 %v3016_v2, %v2177_v22  ;;  %v3018_v26 = vpop.eup %3017  ;;  %vm2199_vm10 = vweird.f32 %v3016_v2 }
 0xeac   :  { %v2203_v17 = vmul.f32 %v3018_v26, %v2178_v32  ;;  %vm2200_vm12 = vmor %vm2198_vm11, %vm2199_vm10  ;;  %vm2209_vm13 = vweird.f32 %v3018_v26  ;;  %v1344_v32 = vld [vmem:[%s4347_s1 + $0x20] sm:$0xff] }
 0xead   :  { %v2194_v11 = vmul.f32 %v3016_v2, %v2193_v31  ;;  %vm2210_vm1 = vmor %vm2208_vm15, %vm2209_vm13 }
 0xeae   :  { %v2163_v41 = vpop.xlane.xlu0 %2162  ;;  %v2204_v57 = vmul.f32 %v3018_v26, %v2203_v17 }
 0xeaf   :  { %v2173_v12 = vmul.f32 %v2163_v41, %v3128_v42  ;;  %v2195_v54 = vmul.f32 0.5, %v2194_v11 }
 0xeb0   :  { %v2205_v60 = vmul.f32 0.5, %v2204_v57 }
 0xeb1   :  { %v2179_v7 = vadd.f32 1e-05, %v2173_v12  ;;  %v2196_v25 = vsub.f32 1.5, %v2195_v54  ;;  %v2850_v12 = vpack.i.bf16 %v1344_v32, %v1345_v33 }
 0xeb2   :  { %v2206_v56 = vsub.f32 1.5, %v2205_v60 }
 0xeb3   :  { %3019 = vrsqrt.f32 %v2179_v7  ;;  %v2197_v62 = vmul.f32 %v3016_v2, %v2196_v25  ;;  %vm2218_vm3 = vweird.f32 %v2179_v7 }
 0xeb4   :  { %v2207_v61 = vmul.f32 %v3018_v26, %v2206_v56 }
 0xeb5   :  { %v2201_v6 = vsel %vm2200_vm12, %v3016_v2, %v2197_v62  ;;  %v2845_v2 = vpack.i.bf16 %v1346_v43, %v1347_v63 }
 0xeb6   :  { %v2243_v0 = vmul.f32 %v2201_v6, %v4143_v38  ;;  %v2211_v14 = vsel %vm2210_vm1, %v3018_v26, %v2207_v61 }
 0xeb7   :  { %v4181_v58 = vpop.permute.xlu1 %2250  ;;  %v2244_v10 = vmul.f32 %v2211_v14, %v4128_v59  ;;  %v2835_v59 = vpack.i.bf16 %v1350_v37, %v1351_v27 }
 0xeb8   :  { %v2253_v3 = vmul.f32 %v4181_v58, %v2242_v13  ;;  %v2254_v35 = vmul.f32 %v4181_v58, %v2243_v0 }
 0xeb9   :  { %v3020_v1 = vpop.eup %3019  ;;  %v2255_v38 = vmul.f32 %v4181_v58, %v2244_v10  ;;  %2836 = vrot.lane.b32.xlu2 %v2835_v59, %s3043_s11 }
 0xeba   :  { %v2213_v40 = vmul.f32 %v3020_v1, %v2179_v7  ;;  %vm2219_vm2 = vweird.f32 %v3020_v1 }
 0xebb   :  { %vm2220_vm4 = vmor %vm2218_vm3, %vm2219_vm2 }
 0xebc   :  { %v2214_v51 = vmul.f32 %v3020_v1, %v2213_v40 }
 0xebe   :  { %v2215_v45 = vmul.f32 0.5, %v2214_v51 }
 0xec0   :  { %v2216_v4 = vsub.f32 1.5, %v2215_v45 }
 0xec1   :  { %v4185_v36 = vpop.permute.xlu0 %2261 }
 0xec2   :  { %v2264_v44 = vadd.f32 %v4185_v36, %v2253_v3  ;;  %v2265_v48 = vadd.f32 %v4185_v36, %v2254_v35  ;;  %v2217_v50 = vmul.f32 %v3020_v1, %v2216_v4  ;;  %v2266_v18 = vadd.f32 %v4185_v36, %v2255_v38 }
 0xec4   :  { %2729 = vmatmul.msk.f32.vlgmr.msrb.gmra.mxu2 %vm42_vm0, %v2264_v44  ;;  %v2221_v53 = vsel %vm2220_vm4, %v3020_v1, %v2217_v50  ;;  %v4239_v44 = vpop.permute.xlu2 %2279 }
 0xec5   :  { %v2245_v16 = vmul.f32 %v2221_v53, %v4150_v39  ;;  %v1348_v39 = vld [vmem:[%s4347_s1 + $0x40] sm:$0xff] }
 0xec6   :  { %v2840_v5 = vpack.i.bf16 %v1348_v39, %v1349_v21 }
 0xec7   :  { %v2256_v52 = vmul.f32 %v4181_v58, %v2245_v16 }
 0xec8   :  { %2841 = vrot.lane.b32.xlu2 %v2840_v5, %s3043_s11 }
 0xec9   :  { %v2267_v19 = vadd.f32 %v4185_v36, %v2256_v52 }
 0xecc   :  { %2730 = vmatmul.msk.f32.gmra.mxu2 %vm42_vm0, %v2265_v48 }
 0xed0   :  { %2846 = vrot.lane.b32.xlu2 %v2845_v2, %s3043_s11 }
 0xed4   :  { %2731 = vmatmul.msk.f32.gmra.mxu2 %vm42_vm0, %v2266_v18 }
 0xed8   :  { %2851 = vrot.lane.b32.xlu2 %v2850_v12, %s3043_s11 }
 0xedc   :  { %2732 = vmatmul.msk.f32.gmra.mxu2 %vm42_vm0, %v2267_v19 }
 0xee2   :  { %v2166_v22 = vpop.xlane.xlu1 %2165 }
 0xee3   :  { %v2174_v24 = vmul.f32 %v2166_v22, %v3128_v42 }
 0xee5   :  { %v2180_v8 = vadd.f32 1e-05, %v2174_v24 }
 0xee7   :  { %3021 = vrsqrt.f32 %v2180_v8  ;;  %vm2228_vm9 = vweird.f32 %v2180_v8 }
 0xeec   :  { %v2169_v31 = vpop.xlane.xlu0 %2168 }
 0xeed   :  { %v3022_v41 = vpop.eup %3021  ;;  %v2175_v15 = vmul.f32 %v2169_v31, %v3128_v42 }
 0xeee   :  { %v2223_v11 = vmul.f32 %v3022_v41, %v2180_v8  ;;  %vm2229_vm8 = vweird.f32 %v3022_v41 }
 0xeef   :  { %v2181_v7 = vadd.f32 1e-05, %v2175_v15  ;;  %vm2230_vm5 = vmor %vm2228_vm9, %vm2229_vm8 }
 0xef0   :  { %v2224_v46 = vmul.f32 %v3022_v41, %v2223_v11 }
 0xef1   :  { %3023 = vrsqrt.f32 %v2181_v7  ;;  %vm2238_vm7 = vweird.f32 %v2181_v7 }
 0xef2   :  { %v2225_v26 = vmul.f32 0.5, %v2224_v46 }
 0xef4   :  { %v2226_v54 = vsub.f32 1.5, %v2225_v26 }
 0xef6   :  { %v2227_v29 = vmul.f32 %v3022_v41, %v2226_v54 }
 0xef7   :  { %v3024_v17 = vpop.eup %3023 }
 0xef8   :  { %v2231_v1 = vsel %vm2230_vm5, %v3022_v41, %v2227_v29  ;;  %v2233_v25 = vmul.f32 %v3024_v17, %v2181_v7  ;;  %vm2239_vm6 = vweird.f32 %v3024_v17 }
 0xef9   :  { %v2246_v49 = vmul.f32 %v2231_v1, %v4165_v28  ;;  %vm2240_vm10 = vmor %vm2238_vm7, %vm2239_vm6 }
 0xefa   :  { %v2234_v57 = vmul.f32 %v3024_v17, %v2233_v25 }
 0xefb   :  { %v2257_v42 = vmul.f32 %v4181_v58, %v2246_v49 }
 0xefc   :  { %v2235_v40 = vmul.f32 0.5, %v2234_v57 }
 0xefd   :  { %v2268_v62 = vadd.f32 %v4185_v36, %v2257_v42 }
 0xefe   :  { %v2236_v13 = vsub.f32 1.5, %v2235_v40 }
 0xeff   :  { %2733 = vmatmul.msk.f32.gmra.mxu2 %vm42_vm0, %v2268_v62 }
 0xf00   :  { %v2237_v60 = vmul.f32 %v3024_v17, %v2236_v13 }
 0xf02   :  { %v2241_v51 = vsel %vm2240_vm10, %v3024_v17, %v2237_v60 }
 0xf03   :  { %v2247_v3 = vmul.f32 %v2241_v51, %v4172_v34 }
 0xf05   :  { %v2258_v6 = vmul.f32 %v4181_v58, %v2247_v3 }
 0xf07   :  { %v2269_v28 = vadd.f32 %v4185_v36, %v2258_v6 }
 0xf09   :  { %2734 = vmatmul.msk.f32.gmra.mxu2 %vm42_vm0, %v2269_v28 }
 0xf13   :  { %v2837_v56 = vpop.permute.xlu2 %2836 }
 0xf14   :  { %v2838_v0 = vunpack.i.l.bf16 %v2837_v56  ;;  %v2839_v61 = vunpack.i.h.bf16 %v2837_v56 }
 0xf16   :  { %2578 = vmatpush.msra.mxu3 %v2838_v0 }
 0xf18   :  { %2579 = vmatpush.msra.mxu3 %v2839_v61 }
 0xf22   :  { %v2842_v45 = vpop.permute.xlu2 %2841 }
 0xf23   :  { %v2843_v35 = vunpack.i.l.bf16 %v2842_v45  ;;  %v2844_v48 = vunpack.i.h.bf16 %v2842_v45  ;;  %v2866_v45 = vld [vmem:[%s4347_s1 + $0x19] ss:$0 sm:$0xff] }
 0xf24   :  { %2549 = vrot.lane.b32.xlu1 %v2866_v45, %s3039_s13 }
 0xf25   :  { %2580 = vmatpush.msra.mxu3 %v2843_v35 }
 0xf27   :  { %2581 = vmatpush.msra.mxu3 %v2844_v48 }
 0xf2a   :  { %v2847_v4 = vpop.permute.xlu2 %2846 }
 0xf2b   :  { %v2848_v58 = vunpack.i.l.bf16 %v2847_v4  ;;  %v2849_v50 = vunpack.i.h.bf16 %v2847_v4 }
 0xf2d   :  { %2582 = vmatpush.msra.mxu3 %v2848_v58 }
 0xf2f   :  { %2583 = vmatpush.msra.mxu3 %v2849_v50 }
 0xf32   :  { %v2852_v10 = vpop.permute.xlu2 %2851 }
 0xf33   :  { %v2853_v38 = vunpack.i.l.bf16 %v2852_v10  ;;  %v2854_v16 = vunpack.i.h.bf16 %v2852_v10 }
 0xf35   :  { %2584 = vmatpush.msra.mxu3 %v2853_v38 }
 0xf37   :  { %2585 = vmatpush.msra.mxu3 %v2854_v16 }
 0xf47   :  { %v2317_v14 = vpop.f32.mrf.mxu2 }
 0xf48   :  { %v4242_v34 = vadd.f32 %v2317_v14, %v4239_v44 }
 0xf4a   :  { %v2341_v36 = vmul.f32 0.70710677, %v4242_v34 }
 0xf4c   :  { %v4245_v53 = vclamps-f32 %v2341_v36, 4.0 }
 0xf4e   :  { %v2359_v18 = vmul.f32 %v4245_v53, %v4245_v53 }
 0xf4f   :  { %v2320_v52 = vpop.f32.mrf.mxu2 }
 0xf50   :  { %v2365_v37 = vmul.f32 -2.7261424e-10, %v2359_v18  ;;  %v2443_v27 = vmul.f32 -1.45660715e-05, %v2359_v18  ;;  %v4250_v59 = vadd.f32 %v2320_v52, %v4239_v44 }
 0xf52   :  { %v2371_v19 = vadd.f32 2.7706815e-08, %v2365_v37  ;;  %v2449_v39 = vadd.f32 -0.00021337405, %v2443_v27  ;;  %v2342_v21 = vmul.f32 0.70710677, %v4250_v59 }
 0xf54   :  { %v2377_v5 = vmul.f32 %v2371_v19, %v2359_v18  ;;  %v2455_v22 = vmul.f32 %v2449_v39, %v2359_v18  ;;  %v4253_v43 = vclamps-f32 %v2342_v21, 4.0 }
 0xf56   :  { %v2383_v63 = vadd.f32 -2.101024e-06, %v2377_v5  ;;  %v2461_v24 = vadd.f32 -0.001682827, %v2455_v22  ;;  %v4257_v8 = vmul.f32 %v4253_v43, %v4253_v43 }
 0xf57   :  { %v2323_v2 = vpop.f32.mrf.mxu2 }
 0xf58   :  { %v2389_v32 = vmul.f32 %v2383_v63, %v2359_v18  ;;  %v2467_v33 = vmul.f32 %v2461_v24, %v2359_v18  ;;  %v4260_v31 = vadd.f32 %v2323_v2, %v4239_v44  ;;  %v2366_v41 = vmul.f32 -2.7261424e-10, %v4257_v8 }
 0xf59   :  { %v2444_v15 = vmul.f32 -1.45660715e-05, %v4257_v8 }
 0xf5a   :  { %v2395_v12 = vadd.f32 -5.6925062e-05, %v2389_v32  ;;  %v2473_v11 = vadd.f32 -0.0073733293, %v2467_v33  ;;  %v2372_v7 = vadd.f32 2.7706815e-08, %v2366_v41 }
 0xf5b   :  { %v2343_v46 = vmul.f32 0.70710677, %v4260_v31  ;;  %v2450_v26 = vadd.f32 -0.00021337405, %v2444_v15 }
 0xf5c   :  { %v2401_v54 = vmul.f32 %v2395_v12, %v2359_v18  ;;  %v2479_v29 = vmul.f32 %v2473_v11, %v2359_v18  ;;  %v2378_v17 = vmul.f32 %v2372_v7, %v4257_v8  ;;  %v2335_v12 = vmul.f32 0.5, %v4242_v34 }
 0xf5d   :  { %v4266_v1 = vclamps-f32 %v2343_v46, 4.0  ;;  %v2456_v25 = vmul.f32 %v2450_v26, %v4257_v8 }
 0xf5e   :  { %v2407_v49 = vadd.f32 -0.00073499064, %v2401_v54  ;;  %v2485_v57 = vadd.f32 -0.014264739, %v2479_v29  ;;  %v2384_v42 = vadd.f32 -2.101024e-06, %v2378_v17 }
 0xf5f   :  { %v4271_v40 = vmul.f32 %v4266_v1, %v4266_v1  ;;  %v2326_v62 = vpop.f32.mrf.mxu2  ;;  %v2462_v13 = vadd.f32 -0.001682827, %v2456_v25 }
 0xf60   :  { %v2413_v60 = vmul.f32 %v2407_v49, %v2359_v18  ;;  %v4274_v51 = vadd.f32 %v2326_v62, %v4239_v44  ;;  %v2390_v3 = vmul.f32 %v2384_v42, %v4257_v8  ;;  %3025 = vrcp.f32 %v2485_v57 }
 0xf61   :  { %v2367_v6 = vmul.f32 -2.7261424e-10, %v4271_v40  ;;  %v2468_v28 = vmul.f32 %v2462_v13, %v4257_v8  ;;  %v2445_v56 = vmul.f32 -1.45660715e-05, %v4271_v40 }
 0xf62   :  { %v2419_v0 = vadd.f32 -0.0029546, %v2413_v60  ;;  %v2344_v61 = vmul.f32 0.70710677, %v4274_v51  ;;  %v2396_v4 = vadd.f32 -5.6925062e-05, %v2390_v3 }
 0xf63   :  { %v2373_v35 = vadd.f32 2.7706815e-08, %v2367_v6  ;;  %v2474_v48 = vadd.f32 -0.0073733293, %v2468_v28  ;;  %v2451_v36 = vadd.f32 -0.00021337405, %v2445_v56 }
 0xf64   :  { %v2425_v14 = vmul.f32 %v2419_v0, %v2359_v18  ;;  %v4285_v58 = vclamps-f32 %v2344_v61, 4.0  ;;  %v2402_v50 = vmul.f32 %v2396_v4, %v4257_v8 }
 0xf65   :  { %v2379_v10 = vmul.f32 %v2373_v35, %v4271_v40  ;;  %v2480_v38 = vmul.f32 %v2474_v48, %v4257_v8  ;;  %v2457_v37 = vmul.f32 %v2451_v36, %v4271_v40  ;;  %v2336_v48 = vmul.f32 0.5, %v4250_v59 }
 0xf66   :  { %v2431_v16 = vadd.f32 -0.016096033, %v2425_v14  ;;  %v2362_v52 = vmul.f32 %v4285_v58, %v4285_v58  ;;  %v2408_v27 = vadd.f32 -0.00073499064, %v2402_v50  ;;  %v3026_v63 = vpop.eup %3025 }
 0xf67   :  { %v2385_v19 = vadd.f32 -2.101024e-06, %v2379_v10  ;;  %v2486_v39 = vadd.f32 -0.014264739, %v2480_v38  ;;  %v2463_v5 = vadd.f32 -0.001682827, %v2457_v37 }
 0xf68   :  { %v2437_v18 = vmul.f32 %v4245_v53, %v2431_v16  ;;  %v2368_v21 = vmul.f32 -2.7261424e-10, %v2362_v52  ;;  %v2446_v22 = vmul.f32 -1.45660715e-05, %v2362_v52  ;;  %v2414_v24 = vmul.f32 %v2408_v27, %v4257_v8 }
 0xf69   :  { %v2391_v2 = vmul.f32 %v2385_v19, %v4271_v40  ;;  %v2469_v41 = vmul.f32 %v2463_v5, %v4271_v40  ;;  %3027 = vrcp.f32 %v2486_v39 }
 0xf6a   :  { %v2497_v32 = vmul.f32 %v3026_v63, %v2437_v18  ;;  %v2374_v33 = vadd.f32 2.7706815e-08, %v2368_v21  ;;  %v2452_v15 = vadd.f32 -0.00021337405, %v2446_v22  ;;  %v2420_v11 = vadd.f32 -0.0029546, %v2414_v24 }
 0xf6b   :  { %v2397_v7 = vadd.f32 -5.6925062e-05, %v2391_v2  ;;  %v2475_v26 = vadd.f32 -0.0073733293, %v2469_v41  ;;  %v2337_v21 = vmul.f32 0.5, %v4260_v31 }
 0xf6c   :  { %v2503_v46 = vadd.f32 1.0, %v2497_v32  ;;  %v2380_v53 = vmul.f32 %v2374_v33, %v2362_v52  ;;  %v2458_v54 = vmul.f32 %v2452_v15, %v2362_v52  ;;  %v2426_v29 = vmul.f32 %v2420_v11, %v4257_v8 }
 0xf6d   :  { %v2403_v17 = vmul.f32 %v2397_v7, %v4271_v40  ;;  %v2481_v57 = vmul.f32 %v2475_v26, %v4271_v40  ;;  %v2338_v32 = vmul.f32 0.5, %v4274_v51 }
 0xf6e   :  { %v2509_v25 = vmul.f32 %v2503_v46, %v2335_v12  ;;  %v2386_v49 = vadd.f32 -2.101024e-06, %v2380_v53  ;;  %v2464_v42 = vadd.f32 -0.001682827, %v2458_v54  ;;  %v2432_v62 = vadd.f32 -0.016096033, %v2426_v29 }
 0xf6f   :  { %v2409_v13 = vadd.f32 -0.00073499064, %v2403_v17  ;;  %v2487_v34 = vadd.f32 -0.014264739, %v2481_v57  ;;  %v3028_v6 = vpop.eup %3027 }
 0xf70   :  { %v2392_v60 = vmul.f32 %v2386_v49, %v2362_v52  ;;  %2741 = vmatmul.msk.f32.vlgmr.msra.gmra.mxu3 %vm1282_vm14, %v2509_v25  ;;  %v2470_v3 = vmul.f32 %v2464_v42, %v2362_v52  ;;  %v2438_v28 = vmul.f32 %v4253_v43, %v2432_v62 }
 0xf71   :  { %v2415_v56 = vmul.f32 %v2409_v13, %v4271_v40  ;;  %3029 = vrcp.f32 %v2487_v34 }
 0xf72   :  { %v2398_v8 = vadd.f32 -5.6925062e-05, %v2392_v60  ;;  %v2476_v45 = vadd.f32 -0.0073733293, %v2470_v3  ;;  %v2498_v61 = vmul.f32 %v3028_v6, %v2438_v28 }
 0xf73   :  { %v2421_v0 = vadd.f32 -0.0029546, %v2415_v56 }
 0xf74   :  { %v2404_v4 = vmul.f32 %v2398_v8, %v2362_v52  ;;  %v2482_v35 = vmul.f32 %v2476_v45, %v2362_v52  ;;  %v2504_v36 = vadd.f32 1.0, %v2498_v61 }
 0xf75   :  { %v2427_v14 = vmul.f32 %v2421_v0, %v4271_v40 }
 0xf76   :  { %v2410_v50 = vadd.f32 -0.00073499064, %v2404_v4  ;;  %v2510_v38 = vmul.f32 %v2504_v36, %v2336_v48  ;;  %v2488_v16 = vadd.f32 -0.014264739, %v2482_v35 }
 0xf77   :  { %v2433_v10 = vadd.f32 -0.016096033, %v2427_v14  ;;  %v3030_v27 = vpop.eup %3029 }
 0xf78   :  { %v2416_v37 = vmul.f32 %v2410_v50, %v2362_v52  ;;  %2742 = vmatmul.msk.f32.gmra.mxu3 %vm1282_vm14, %v2510_v38  ;;  %3031 = vrcp.f32 %v2488_v16 }
 0xf79   :  { %v2439_v43 = vmul.f32 %v4266_v1, %v2433_v10 }
 0xf7a   :  { %v2422_v19 = vadd.f32 -0.0029546, %v2416_v37 }
 0xf7b   :  { %v2499_v39 = vmul.f32 %v3030_v27, %v2439_v43 }
 0xf7c   :  { %v2428_v18 = vmul.f32 %v2422_v19, %v2362_v52 }
 0xf7d   :  { %v2505_v59 = vadd.f32 1.0, %v2499_v39 }
 0xf7e   :  { %v2434_v5 = vadd.f32 -0.016096033, %v2428_v18  ;;  %v3032_v63 = vpop.eup %3031 }
 0xf7f   :  { %v2511_v40 = vmul.f32 %v2505_v59, %v2337_v21 }
 0xf80   :  { %v2440_v22 = vmul.f32 %v4285_v58, %v2434_v5 }
 0xf81   :  { %2743 = vmatmul.msk.f32.gmra.mxu3 %vm1282_vm14, %v2511_v40 }
 0xf82   :  { %v2329_v24 = vpop.f32.mrf.mxu2  ;;  %v2500_v2 = vmul.f32 %v3032_v63, %v2440_v22 }
 0xf83   :  { %v2330_v1 = vadd.f32 %v2329_v24, %v4239_v44 }
 0xf84   :  { %v2506_v33 = vadd.f32 1.0, %v2500_v2 }
 0xf85   :  { %v2345_v41 = vmul.f32 0.70710677, %v2330_v1  ;;  %v2339_v5 = vmul.f32 0.5, %v2330_v1 }
 0xf86   :  { %v2512_v15 = vmul.f32 %v2506_v33, %v2338_v32 }
 0xf87   :  { %v2739_v52 = vclamps-f32 %v2345_v41, 4.0 }
 0xf89   :  { %v2363_v12 = vmul.f32 %v2739_v52, %v2739_v52  ;;  %2744 = vmatmul.msk.f32.gmra.mxu3 %vm1282_vm14, %v2512_v15 }
 0xf8b   :  { %v2369_v31 = vmul.f32 -2.7261424e-10, %v2363_v12  ;;  %v2447_v11 = vmul.f32 -1.45660715e-05, %v2363_v12 }
 0xf8c   :  { %v2332_v7 = vpop.f32.mrf.mxu2 }
 0xf8d   :  { %v2375_v58 = vadd.f32 2.7706815e-08, %v2369_v31  ;;  %v2333_v46 = vadd.f32 %v2332_v7, %v4239_v44  ;;  %v2453_v53 = vadd.f32 -0.00021337405, %v2447_v11 }
 0xf8f   :  { %v2381_v26 = vmul.f32 %v2375_v58, %v2363_v12  ;;  %v2346_v54 = vmul.f32 0.70710677, %v2333_v46  ;;  %v2459_v29 = vmul.f32 %v2453_v53, %v2363_v12  ;;  %v2340_v15 = vmul.f32 0.5, %v2333_v46 }
 0xf91   :  { %v2387_v17 = vadd.f32 -2.101024e-06, %v2381_v26  ;;  %v2740_v25 = vclamps-f32 %v2346_v54, 4.0  ;;  %v2465_v51 = vadd.f32 -0.001682827, %v2459_v29 }
 0xf93   :  { %v2393_v49 = vmul.f32 %v2387_v17, %v2363_v12  ;;  %v2364_v57 = vmul.f32 %v2740_v25, %v2740_v25  ;;  %v2471_v42 = vmul.f32 %v2465_v51, %v2363_v12 }
 0xf95   :  { %v2399_v62 = vadd.f32 -5.6925062e-05, %v2393_v49  ;;  %v2370_v13 = vmul.f32 -2.7261424e-10, %v2364_v57  ;;  %v2477_v60 = vadd.f32 -0.0073733293, %v2471_v42 }
 0xf96   :  { %v2448_v34 = vmul.f32 -1.45660715e-05, %v2364_v57  ;;  %v2550_v31 = vpop.permute.xlu1 %2549 }
 0xf97   :  { %v2405_v3 = vmul.f32 %v2399_v62, %v2363_v12  ;;  %v2376_v6 = vadd.f32 2.7706815e-08, %v2370_v13  ;;  %v2483_v28 = vmul.f32 %v2477_v60, %v2363_v12 }
 0xf98   :  { %v2454_v56 = vadd.f32 -0.00021337405, %v2448_v34 }
 0xf99   :  { %v2411_v8 = vadd.f32 -0.00073499064, %v2405_v3  ;;  %v2382_v44 = vmul.f32 %v2376_v6, %v2364_v57  ;;  %v2489_v45 = vadd.f32 -0.014264739, %v2483_v28 }
 0xf9a   :  { %v2460_v0 = vmul.f32 %v2454_v56, %v2364_v57 }
 0xf9b   :  { %v2417_v61 = vmul.f32 %v2411_v8, %v2363_v12  ;;  %v2388_v4 = vadd.f32 -2.101024e-06, %v2382_v44  ;;  %3033 = vrcp.f32 %v2489_v45 }
 0xf9c   :  { %v2466_v35 = vadd.f32 -0.001682827, %v2460_v0 }
 0xf9d   :  { %v2423_v48 = vadd.f32 -0.0029546, %v2417_v61  ;;  %v2394_v14 = vmul.f32 %v2388_v4, %v2364_v57 }
 0xf9e   :  { %v2472_v36 = vmul.f32 %v2466_v35, %v2364_v57 }
 0xf9f   :  { %v2429_v50 = vmul.f32 %v2423_v48, %v2363_v12  ;;  %v2400_v10 = vadd.f32 -5.6925062e-05, %v2394_v14 }
 0xfa0   :  { %v2478_v38 = vadd.f32 -0.0073733293, %v2472_v36 }
 0xfa1   :  { %v2435_v16 = vadd.f32 -0.016096033, %v2429_v50  ;;  %v2406_v37 = vmul.f32 %v2400_v10, %v2364_v57  ;;  %v3034_v39 = vpop.eup %3033 }
 0xfa2   :  { %v2484_v43 = vmul.f32 %v2478_v38, %v2364_v57 }
 0xfa3   :  { %v2441_v27 = vmul.f32 %v2739_v52, %v2435_v16  ;;  %v2412_v19 = vadd.f32 -0.00073499064, %v2406_v37 }
 0xfa4   :  { %v2490_v18 = vadd.f32 -0.014264739, %v2484_v43 }
 0xfa5   :  { %v2418_v21 = vmul.f32 %v2412_v19, %v2364_v57  ;;  %v2501_v59 = vmul.f32 %v3034_v39, %v2441_v27 }
 0xfa6   :  { %3035 = vrcp.f32 %v2490_v18 }
 0xfa7   :  { %v2424_v40 = vadd.f32 -0.0029546, %v2418_v21  ;;  %v2507_v22 = vadd.f32 1.0, %v2501_v59 }
 0xfa9   :  { %v2430_v63 = vmul.f32 %v2424_v40, %v2364_v57  ;;  %v2513_v24 = vmul.f32 %v2507_v22, %v2339_v5 }
 0xfab   :  { %v2436_v2 = vadd.f32 -0.016096033, %v2430_v63  ;;  %2745 = vmatmul.msk.f32.gmra.mxu3 %vm1282_vm14, %v2513_v24 }
 0xfac   :  { %v3036_v33 = vpop.eup %3035 }
 0xfad   :  { %v2442_v32 = vmul.f32 %v2740_v25, %v2436_v2 }
 0xfaf   :  { %v2502_v41 = vmul.f32 %v3036_v33, %v2442_v32 }
 0xfb1   :  { %v2508_v12 = vadd.f32 1.0, %v2502_v41 }
 0xfb3   :  { %v2514_v52 = vmul.f32 %v2508_v12, %v2340_v15 }
 0xfb5   :  { %2746 = vmatmul.msk.f32.gmra.mxu3 %vm1282_vm14, %v2514_v52 }
 0xff3   :  { %v2587_v11 = vpop.f32.mrf.mxu3 }
 0xff4   :  { %v2588_v7 = vadd.f32 %v2587_v11, %v2550_v31 }
 0xff6   :  { %v2605_v1 = vadd.f32 %v2588_v7, %v4093_v9 }
 0xff8   :  { %2611 = vst.msk [vmem:[%s4349_s2] sm:$0xff] %vm42_vm0, %v2605_v1 }
 0xffb   :  { %v2590_v58 = vpop.f32.mrf.mxu3 }
 0xffc   :  { %v2591_v53 = vadd.f32 %v2590_v58, %v2550_v31 }
 0xffe   :  { %v2606_v26 = vadd.f32 %v2591_v53, %v4099_v55 }
0x1000   :  { %2612 = vst.msk [vmem:[%s4349_s2 + $0x8] sm:$0xff] %vm42_vm0, %v2606_v26 }
0x1004   :  { %v2593_v46 = vpop.f32.mrf.mxu3 }
0x1005   :  { %v2594_v54 = vadd.f32 %v2593_v46, %v2550_v31 }
0x1007   :  { %v2607_v29 = vadd.f32 %v2594_v54, %v4087_v30 }
0x1009   :  { %2613 = vst.msk [vmem:[%s4349_s2 + $0x10] sm:$0xff] %vm42_vm0, %v2607_v29 }
0x100c   :  { %v2596_v9 = vpop.f32.mrf.mxu3 }
0x100d   :  { %v2597_v17 = vadd.f32 %v2596_v9, %v2550_v31 }
0x100f   :  { %v2608_v25 = vadd.f32 %v2597_v17, %v4111_v20 }
0x1011   :  { %2614 = vst.msk [vmem:[%s4349_s2 + $0x18] sm:$0xff] %vm42_vm0, %v2608_v25 }
0x102e   :  { %v2599_v55 = vpop.f32.mrf.mxu3 }
0x102f   :  { %v2600_v51 = vadd.f32 %v2599_v55, %v2550_v31 }
0x1031   :  { %v2609_v49 = vadd.f32 %v2600_v51, %v4105_v23 }
0x1033   :  { %2615 = vst.msk [vmem:[%s4349_s2 + $0x20] sm:$0xff] %vm42_vm0, %v2609_v49 }
0x1038   :  { %v2602_v30 = vpop.f32.mrf.mxu3 }
0x1039   :  { %v2603_v57 = vadd.f32 %v2602_v30, %v2550_v31 }
0x103b   :  { %v2610_v42 = vadd.f32 %v2603_v57, %v4125_v47 }
0x103d   :  { %2616 = vst.msk [vmem:[%s4349_s2 + $0x28] sm:$0xff] %vm42_vm0, %v2610_v42 }

</bundles_post_ra>
